<compile_context>
chip_gen: v7x
topology: tpu7x:2x2x1
jax: 0.10.0
libtpu: 0.0.40
codegen_flags: <defaults>
</compile_context>

<pallas_src>
import jax
import jax.numpy as jnp
from jax.experimental import pallas as pl
from jax.experimental.pallas import tpu as pltpu

_TB = 8  # batch tile = f32 sublane depth


# ----------------------------------------------------------------------------
# Fused kernel: stacked BiLSTM recurrence + max-pool over time + FC
# ----------------------------------------------------------------------------
def _make_birnn_kernel(num_layers, T, TB, H):
    """Packed layouts (built in init_params):

      wih  layer l : (in_dim, 8H) bf16, cols = [fwd(i,f,o,g) | bwd(i,f,o,g)]
      whh_f / whh_b: (H, 4H) bf16, cols = [i,f,o,g] for that direction
      bias layer l : (1, 8H) f32 (b_ih + b_hh), same column order as wih
      fcw_f / fcw_b: (H, O) bf16  (fc weight rows for fwd / bwd features)
      fc_b         : (1, O) f32

    Kernel refs: x(T*TB, E) time-major within the batch tile,
                 [wih, whh_f, whh_b, bias] * num_layers, fcw_f, fcw_b, fc_b,
                 out (TB, O), scratches hs_f / hs_b (T*TB, H) f32.
    """
    G4 = 4 * H
    G8 = 8 * H

    def kernel(*refs):
        x_ref = refs[0]
        off = 1 + 4 * num_layers
        fcwf_ref = refs[off]
        fcwb_ref = refs[off + 1]
        fcb_ref = refs[off + 2]
        out_ref = refs[off + 3]
        hs_f = refs[off + 4]
        hs_b = refs[off + 5]

        pool_f = pool_b = None
        for l in range(num_layers):
            wih_ref = refs[1 + 4 * l]
            whhf_ref = refs[2 + 4 * l]
            whhb_ref = refs[3 + 4 * l]
            b_ref = refs[4 + 4 * l]
            is_last = l == num_layers - 1

            # ---- Hoisted input projection: one matmul (per direction-source)
            #      covering all timesteps of this layer. -----------------------
            if l == 0:
                xg = (jnp.dot(x_ref[...], wih_ref[...],
                              preferred_element_type=jnp.float32)
                      + b_ref[...])                                   # (T*TB, 8H)
            else:
                xg = (jnp.dot(hs_f[...].astype(jnp.bfloat16), wih_ref[0:H, :],
                              preferred_element_type=jnp.float32)
                      + jnp.dot(hs_b[...].astype(jnp.bfloat16), wih_ref[H:2 * H, :],
                                preferred_element_type=jnp.float32)
                      + b_ref[...])                                   # (T*TB, 8H)

            whh_f = whhf_ref[...]                                     # (H, 4H) bf16
            whh_b = whhb_ref[...]

            h_f = jnp.zeros((TB, H), jnp.float32)
            h_b = jnp.zeros((TB, H), jnp.float32)
            c_f = jnp.zeros((TB, H), jnp.float32)
            c_b = jnp.zeros((TB, H), jnp.float32)
            pool_f = pool_b = None

            # TODO(synk): switch to lax.fori_loop(..., unroll=2..4) with pl.ds
            # starts once T grows beyond ~16 (full unroll is fine at T=8).
            for t in range(T):
                tr = T - 1 - t
                # Two contiguous, lane-aligned slices replace the old where(mask).
                gf = (jnp.dot(h_f.astype(jnp.bfloat16), whh_f,
                              preferred_element_type=jnp.float32)
                      + xg[t * TB:(t + 1) * TB, 0:G4])                # (TB, 4H)
                gb = (jnp.dot(h_b.astype(jnp.bfloat16), whh_b,
                              preferred_element_type=jnp.float32)
                      + xg[tr * TB:(tr + 1) * TB, G4:G8])             # (TB, 4H)

                # [i | f | o] contiguous -> one sigmoid per direction; g last.
                sf = jax.nn.sigmoid(gf[:, 0:3 * H])
                sb = jax.nn.sigmoid(gb[:, 0:3 * H])
                gtf = jnp.tanh(gf[:, 3 * H:4 * H])
                gtb = jnp.tanh(gb[:, 3 * H:4 * H])

                c_f = sf[:, H:2 * H] * c_f + sf[:, 0:H] * gtf
                c_b = sb[:, H:2 * H] * c_b + sb[:, 0:H] * gtb
                h_f = sf[:, 2 * H:3 * H] * jnp.tanh(c_f)
                h_b = sb[:, 2 * H:3 * H] * jnp.tanh(c_b)

                if is_last:
                    # Max over time commutes with the fwd/bwd concat -> running max.
                    pool_f = h_f if pool_f is None else jnp.maximum(pool_f, h_f)
                    pool_b = h_b if pool_b is None else jnp.maximum(pool_b, h_b)
                else:
                    # fwd hidden belongs to time t, bwd hidden to time T-1-t.
                    hs_f[t * TB:(t + 1) * TB, :] = h_f
                    hs_b[tr * TB:(tr + 1) * TB, :] = h_b

        # ---- Fused max-pool result -> Linear (split over fwd/bwd features). --
        out_ref[...] = (jnp.dot(pool_f.astype(jnp.bfloat16), fcwf_ref[...],
                                preferred_element_type=jnp.float32)
                        + jnp.dot(pool_b.astype(jnp.bfloat16), fcwb_ref[...],
                                  preferred_element_type=jnp.float32)
                        + fcb_ref[...]).astype(out_ref.dtype)

    return kernel


def _birnn_pallas_call(x2d, lstm_layers, fcw_f, fcw_b, fc_b, *, nb, T, TB, H, E, O):
    num_layers = len(lstm_layers)

    inputs = [x2d]
    in_specs = [pl.BlockSpec((T * TB, E), lambda j: (j, 0))]
    for wih, whh_f, whh_b, b in lstm_layers:
        inputs += [wih, whh_f, whh_b, b]
        in_specs += [
            pl.BlockSpec(wih.shape, lambda j: (0, 0)),
            pl.BlockSpec(whh_f.shape, lambda j: (0, 0)),
            pl.BlockSpec(whh_b.shape, lambda j: (0, 0)),
            pl.BlockSpec(b.shape, lambda j: (0, 0)),
        ]
    inputs += [fcw_f, fcw_b, fc_b]
    in_specs += [
        pl.BlockSpec(fcw_f.shape, lambda j: (0, 0)),
        pl.BlockSpec(fcw_b.shape, lambda j: (0, 0)),
        pl.BlockSpec(fc_b.shape, lambda j: (0, 0)),
    ]

    # Explicit scoped-VMEM limit (defaults are 16/32 MiB, well below physical).
    per_step = 2 * (T * TB * E * x2d.dtype.itemsize)                     # x block (dbl-buffered)
    per_step += 2 * sum(int(a.size) * a.dtype.itemsize for a in inputs[1:])  # weights / biases
    per_step += T * TB * 8 * H * 4                                        # xg (f32 temp)
    per_step += 2 * T * TB * H * 4                                        # hs_f / hs_b scratch
    per_step += 2 * TB * O * 4                                            # output block
    vmem_limit = int(min(64 * 1024 * 1024, max(16 * 1024 * 1024, 8 * per_step)))

    grid_spec = pltpu.PrefetchScalarGridSpec(
        num_scalar_prefetch=0,
        grid=(nb,),
        in_specs=in_specs,
        out_specs=pl.BlockSpec((TB, O), lambda j: (j, 0)),
        scratch_shapes=[pltpu.VMEM((T * TB, H), jnp.float32),
                        pltpu.VMEM((T * TB, H), jnp.float32)],
    )
    return pl.pallas_call(
        _make_birnn_kernel(num_layers, T, TB, H),
        out_shape=jax.ShapeDtypeStruct((nb * TB, O), jnp.float32),
        grid_spec=grid_spec,
        compiler_params=pltpu.CompilerParams(
            dimension_semantics=("parallel",),
            vmem_limit_bytes=vmem_limit),
    )(*inputs)


# ----------------------------------------------------------------------------
# Parameter initialization (PyTorch-like init, packed for the kernel)
# ----------------------------------------------------------------------------
def init_params(key, vocab_size, embedding_dim, hidden_size, output_size, num_layers=2):
    H = hidden_size
    GATE_ORDER = (0, 1, 3, 2)   # PyTorch row order [i, f, g, o] -> packed cols [i, f, o, g]
    n_keys = 1 + num_layers * 2 * 4 + 2
    keys = iter(jax.random.split(key, n_keys))

    # nn.Embedding(vocab, E, padding_idx=0): row 0 zeroed.
    emb = jax.random.normal(next(keys), (vocab_size, embedding_dim), jnp.float32)
    emb = emb.at[0].set(0.0)

    k_h = float(H) ** -0.5
    layers = []
    for layer in range(num_layers):
        in_dim = embedding_dim if layer == 0 else 2 * H
        dirs = []
        for _ in range(2):  # forward, backward
            w_ih = jax.random.uniform(next(keys), (4 * H, in_dim), jnp.float32, -k_h, k_h)
            w_hh = jax.random.uniform(next(keys), (4 * H, H), jnp.float32, -k_h, k_h)
            b_ih = jax.random.uniform(next(keys), (4 * H,), jnp.float32, -k_h, k_h)
            b_hh = jax.random.uniform(next(keys), (4 * H,), jnp.float32, -k_h, k_h)
            dirs.append((w_ih, w_hh, b_ih + b_hh))

        wih_cols, b_segs, whh_per_dir = [], [], []
        for (w_ih_d, w_hh_d, b_d) in dirs:               # fwd first, then bwd
            whh_cols = []
            for g in GATE_ORDER:
                wih_cols.append(w_ih_d[g * H:(g + 1) * H, :].T)    # (in_dim, H)
                whh_cols.append(w_hh_d[g * H:(g + 1) * H, :].T)    # (H, H)
                b_segs.append(b_d[g * H:(g + 1) * H])
            whh_per_dir.append(jnp.concatenate(whh_cols, axis=1))  # (H, 4H)

        wih_packed = jnp.concatenate(wih_cols, axis=1).astype(jnp.bfloat16)   # (in_dim, 8H)
        whh_f = whh_per_dir[0].astype(jnp.bfloat16)                            # (H, 4H)
        whh_b = whh_per_dir[1].astype(jnp.bfloat16)                            # (H, 4H)
        b_packed = jnp.concatenate(b_segs)[None, :].astype(jnp.float32)        # (1, 8H)
        layers.append((wih_packed, whh_f, whh_b, b_packed))

    fc_in = 2 * H
    k_f = float(fc_in) ** -0.5
    fc_w = jax.random.uniform(next(keys), (output_size, fc_in), jnp.float32, -k_f, k_f)
    fc_b = jax.random.uniform(next(keys), (output_size,), jnp.float32, -k_f, k_f)

    return {
        "embedding": emb,
        "lstm": layers,
        "fc_w_f": fc_w[:, 0:H].T.astype(jnp.bfloat16),     # (H, O) — fwd features
        "fc_w_b": fc_w[:, H:2 * H].T.astype(jnp.bfloat16), # (H, O) — bwd features
        "fc_b": fc_b[None, :].astype(jnp.float32),         # (1, O)
    }


# ----------------------------------------------------------------------------
# Forward pass
# ----------------------------------------------------------------------------
@jax.jit
def stacked_birnn_forward(params, x_tokens):
    emb_tab = params["embedding"]
    B, T = x_tokens.shape
    E = emb_tab.shape[1]
    H = params["lstm"][0][1].shape[0]     # whh_f is (H, 4H)
    O = params["fc_b"].shape[1]

    # Embedding lookup (plain-JAX glue).
    # TODO(synk): fuse the gather into the kernel via PrefetchScalarGridSpec row-gather.
    emb = jnp.take(emb_tab, x_tokens, axis=0)            # (B, T, E) f32

    # Pad batch to a multiple of the 8-row sublane tile; extra rows are discarded.
    TB = _TB
    B_pad = ((B + TB - 1) // TB) * TB
    if B_pad != B:
        emb = jnp.pad(emb, ((0, B_pad - B), (0, 0), (0, 0)))
    nb = B_pad // TB

    # Batch-tile-major, time-major-within-tile layout:
    # row (j*T*TB + t*TB + r) = (batch j*TB + r, time t).
    x2d = (emb.reshape(nb, TB, T, E)
              .transpose(0, 2, 1, 3)
              .reshape(nb * T * TB, E)
              .astype(jnp.bfloat16))

    out = _birnn_pallas_call(x2d, params["lstm"],
                             params["fc_w_f"], params["fc_w_b"], params["fc_b"],
                             nb=nb, T=T, TB=TB, H=H, E=E, O=O)
    return out[:B]


# ----------------------------------------------------------------------------
if __name__ == "__main__":
    VOCAB = 50
    EMB = 16
    HIDDEN = 32
    OUT = 4
    NUM_LAYERS = 2
    B, T = 2, 8

    key = jax.random.PRNGKey(0)
    k_params, k_tokens = jax.random.split(key)

    params = init_params(k_params, VOCAB, EMB, HIDDEN, OUT, NUM_LAYERS)
    x = jax.random.randint(k_tokens, (B, T), 0, VOCAB, dtype=jnp.int32)

    out = stacked_birnn_forward(params, x)
    out = jax.block_until_ready(out)
    assert out.shape == (B, OUT), out.shape
    assert out.dtype == jnp.float32
    print("KERNEL_OK")
</pallas_src>

<mosaic_0001>
module attributes {stable_mosaic.version = 11 : i64} {
  func.func @kernel(%arg0: i32, %arg1: memref<64x16xbf16, #tpu.memory_space<vmem>>, %arg2: memref<16x256xbf16, #tpu.memory_space<vmem>>, %arg3: memref<32x128xbf16, #tpu.memory_space<vmem>>, %arg4: memref<32x128xbf16, #tpu.memory_space<vmem>>, %arg5: memref<1x256xf32, #tpu.memory_space<vmem>>, %arg6: memref<64x256xbf16, #tpu.memory_space<vmem>>, %arg7: memref<32x128xbf16, #tpu.memory_space<vmem>>, %arg8: memref<32x128xbf16, #tpu.memory_space<vmem>>, %arg9: memref<1x256xf32, #tpu.memory_space<vmem>>, %arg10: memref<32x4xbf16, #tpu.memory_space<vmem>>, %arg11: memref<32x4xbf16, #tpu.memory_space<vmem>>, %arg12: memref<1x4xf32, #tpu.memory_space<vmem>>, %arg13: memref<8x4xf32, #tpu.memory_space<vmem>>, %arg14: memref<64x32xf32, #tpu.memory_space<vmem>>, %arg15: memref<64x32xf32, #tpu.memory_space<vmem>>) attributes {dimension_semantics = [#tpu.dimension_semantics<parallel>], iteration_bounds = array<i64: 1>, scalar_prefetch = 0 : i64, scratch_operands = 2 : i64, tpu.core_type = #tpu.core_type<tc>, window_params = [{transform_indices = @transform_0, window_bounds = array<i64: 64, 16>}, {pipeline_mode = #tpu.pipeline_mode<synchronous>, transform_indices = @transform_1, window_bounds = array<i64: 16, 256>}, {pipeline_mode = #tpu.pipeline_mode<synchronous>, transform_indices = @transform_2, window_bounds = array<i64: 32, 128>}, {pipeline_mode = #tpu.pipeline_mode<synchronous>, transform_indices = @transform_3, window_bounds = array<i64: 32, 128>}, {pipeline_mode = #tpu.pipeline_mode<synchronous>, transform_indices = @transform_4, window_bounds = array<i64: 1, 256>}, {pipeline_mode = #tpu.pipeline_mode<synchronous>, transform_indices = @transform_5, window_bounds = array<i64: 64, 256>}, {pipeline_mode = #tpu.pipeline_mode<synchronous>, transform_indices = @transform_6, window_bounds = array<i64: 32, 128>}, {pipeline_mode = #tpu.pipeline_mode<synchronous>, transform_indices = @transform_7, window_bounds = array<i64: 32, 128>}, {pipeline_mode = #tpu.pipeline_mode<synchronous>, transform_indices = @transform_8, window_bounds = array<i64: 1, 256>}, {pipeline_mode = #tpu.pipeline_mode<synchronous>, transform_indices = @transform_9, window_bounds = array<i64: 32, 4>}, {pipeline_mode = #tpu.pipeline_mode<synchronous>, transform_indices = @transform_10, window_bounds = array<i64: 32, 4>}, {pipeline_mode = #tpu.pipeline_mode<synchronous>, transform_indices = @transform_11, window_bounds = array<i64: 1, 4>}, {transform_indices = @transform_12, window_bounds = array<i64: 8, 4>}]} {
    %c0 = arith.constant 0 : index
    %c0_0 = arith.constant 0 : index
    %0 = vector.load %arg1[%c0, %c0_0] : memref<64x16xbf16, #tpu.memory_space<vmem>>, vector<64x16xbf16>
    %c0_1 = arith.constant 0 : index
    %c0_2 = arith.constant 0 : index
    %1 = vector.load %arg2[%c0_1, %c0_2] : memref<16x256xbf16, #tpu.memory_space<vmem>>, vector<16x256xbf16>
    %cst = arith.constant dense<0.000000e+00> : vector<64x256xf32>
    %2 = tpu.matmul %0, %1, %cst {dimension_numbers = #tpu.dot_dimension_numbers<[1], [0], [0], [1], [0, 0, 1, 1], [], []>} : vector<64x16xbf16>, vector<16x256xbf16>, vector<64x256xf32> -> vector<64x256xf32>
    %c0_3 = arith.constant 0 : index
    %c0_4 = arith.constant 0 : index
    %3 = vector.load %arg5[%c0_3, %c0_4] : memref<1x256xf32, #tpu.memory_space<vmem>>, vector<1x256xf32>
    %4 = vector.broadcast %3 : vector<1x256xf32> to vector<64x256xf32>
    %5 = arith.addf %2, %4 : vector<64x256xf32>
    %c0_5 = arith.constant 0 : index
    %c0_6 = arith.constant 0 : index
    %6 = vector.load %arg3[%c0_5, %c0_6] : memref<32x128xbf16, #tpu.memory_space<vmem>>, vector<32x128xbf16>
    %c0_7 = arith.constant 0 : index
    %c0_8 = arith.constant 0 : index
    %7 = vector.load %arg4[%c0_7, %c0_8] : memref<32x128xbf16, #tpu.memory_space<vmem>>, vector<32x128xbf16>
    %cst_9 = arith.constant 0.000000e+00 : f32
    %8 = vector.broadcast %cst_9 : f32 to vector<8x32xf32>
    %cst_10 = arith.constant 0.000000e+00 : f32
    %9 = vector.broadcast %cst_10 : f32 to vector<8x32xf32>
    %cst_11 = arith.constant 0.000000e+00 : f32
    %10 = vector.broadcast %cst_11 : f32 to vector<8x32xf32>
    %cst_12 = arith.constant 0.000000e+00 : f32
    %11 = vector.broadcast %cst_12 : f32 to vector<8x32xf32>
    %12 = arith.truncf %8 : vector<8x32xf32> to vector<8x32xbf16>
    %cst_13 = arith.constant dense<0.000000e+00> : vector<8x128xf32>
    %13 = tpu.matmul %12, %6, %cst_13 {dimension_numbers = #tpu.dot_dimension_numbers<[1], [0], [0], [1], [0, 0, 1, 1], [], []>} : vector<8x32xbf16>, vector<32x128xbf16>, vector<8x128xf32> -> vector<8x128xf32>
    %14 = vector.extract_strided_slice %5 {offsets = [0, 0], sizes = [8, 128], strides = [1, 1]} : vector<64x256xf32> to vector<8x128xf32>
    %15 = arith.addf %13, %14 : vector<8x128xf32>
    %16 = arith.truncf %9 : vector<8x32xf32> to vector<8x32xbf16>
    %cst_14 = arith.constant dense<0.000000e+00> : vector<8x128xf32>
    %17 = tpu.matmul %16, %7, %cst_14 {dimension_numbers = #tpu.dot_dimension_numbers<[1], [0], [0], [1], [0, 0, 1, 1], [], []>} : vector<8x32xbf16>, vector<32x128xbf16>, vector<8x128xf32> -> vector<8x128xf32>
    %18 = vector.extract_strided_slice %5 {offsets = [56, 128], sizes = [8, 128], strides = [1, 1]} : vector<64x256xf32> to vector<8x128xf32>
    %19 = arith.addf %17, %18 : vector<8x128xf32>
    %20 = vector.extract_strided_slice %15 {offsets = [0, 0], sizes = [8, 96], strides = [1, 1]} : vector<8x128xf32> to vector<8x96xf32>
    %21 = arith.negf %20 : vector<8x96xf32>
    %22 = math.exp %21 : vector<8x96xf32>
    %cst_15 = arith.constant 1.000000e+00 : f32
    %23 = vector.broadcast %cst_15 : f32 to vector<8x96xf32>
    %24 = arith.addf %23, %22 : vector<8x96xf32>
    %25 = arith.divf %23, %24 : vector<8x96xf32>
    %26 = vector.extract_strided_slice %19 {offsets = [0, 0], sizes = [8, 96], strides = [1, 1]} : vector<8x128xf32> to vector<8x96xf32>
    %27 = arith.negf %26 : vector<8x96xf32>
    %28 = math.exp %27 : vector<8x96xf32>
    %cst_16 = arith.constant 1.000000e+00 : f32
    %29 = vector.broadcast %cst_16 : f32 to vector<8x96xf32>
    %30 = arith.addf %29, %28 : vector<8x96xf32>
    %31 = arith.divf %29, %30 : vector<8x96xf32>
    %32 = vector.extract_strided_slice %15 {offsets = [0, 96], sizes = [8, 32], strides = [1, 1]} : vector<8x128xf32> to vector<8x32xf32>
    %33 = math.tanh %32 : vector<8x32xf32>
    %34 = vector.extract_strided_slice %19 {offsets = [0, 96], sizes = [8, 32], strides = [1, 1]} : vector<8x128xf32> to vector<8x32xf32>
    %35 = math.tanh %34 : vector<8x32xf32>
    %36 = vector.extract_strided_slice %25 {offsets = [0, 32], sizes = [8, 32], strides = [1, 1]} : vector<8x96xf32> to vector<8x32xf32>
    %37 = arith.mulf %36, %10 : vector<8x32xf32>
    %38 = vector.extract_strided_slice %25 {offsets = [0, 0], sizes = [8, 32], strides = [1, 1]} : vector<8x96xf32> to vector<8x32xf32>
    %39 = arith.mulf %38, %33 : vector<8x32xf32>
    %40 = arith.addf %37, %39 : vector<8x32xf32>
    %41 = vector.extract_strided_slice %31 {offsets = [0, 32], sizes = [8, 32], strides = [1, 1]} : vector<8x96xf32> to vector<8x32xf32>
    %42 = arith.mulf %41, %11 : vector<8x32xf32>
    %43 = vector.extract_strided_slice %31 {offsets = [0, 0], sizes = [8, 32], strides = [1, 1]} : vector<8x96xf32> to vector<8x32xf32>
    %44 = arith.mulf %43, %35 : vector<8x32xf32>
    %45 = arith.addf %42, %44 : vector<8x32xf32>
    %46 = vector.extract_strided_slice %25 {offsets = [0, 64], sizes = [8, 32], strides = [1, 1]} : vector<8x96xf32> to vector<8x32xf32>
    %47 = math.tanh %40 : vector<8x32xf32>
    %48 = arith.mulf %46, %47 : vector<8x32xf32>
    %49 = vector.extract_strided_slice %31 {offsets = [0, 64], sizes = [8, 32], strides = [1, 1]} : vector<8x96xf32> to vector<8x32xf32>
    %50 = math.tanh %45 : vector<8x32xf32>
    %51 = arith.mulf %49, %50 : vector<8x32xf32>
    %c0_17 = arith.constant 0 : index
    %c0_18 = arith.constant 0 : index
    %52 = vector.load %arg14[%c0_17, %c0_18] : memref<64x32xf32, #tpu.memory_space<vmem>>, vector<8x32xf32>
    tpu.vector_store %arg14[%c0_17, %c0_18], %48 {strides = array<i32>} : memref<64x32xf32, #tpu.memory_space<vmem>>, vector<8x32xf32>,
    %c56 = arith.constant 56 : index
    %c0_19 = arith.constant 0 : index
    %53 = vector.load %arg15[%c56, %c0_19] : memref<64x32xf32, #tpu.memory_space<vmem>>, vector<8x32xf32>
    tpu.vector_store %arg15[%c56, %c0_19], %51 {strides = array<i32>} : memref<64x32xf32, #tpu.memory_space<vmem>>, vector<8x32xf32>,
    %54 = arith.truncf %48 : vector<8x32xf32> to vector<8x32xbf16>
    %cst_20 = arith.constant dense<0.000000e+00> : vector<8x128xf32>
    %55 = tpu.matmul %54, %6, %cst_20 {dimension_numbers = #tpu.dot_dimension_numbers<[1], [0], [0], [1], [0, 0, 1, 1], [], []>} : vector<8x32xbf16>, vector<32x128xbf16>, vector<8x128xf32> -> vector<8x128xf32>
    %56 = vector.extract_strided_slice %5 {offsets = [8, 0], sizes = [8, 128], strides = [1, 1]} : vector<64x256xf32> to vector<8x128xf32>
    %57 = arith.addf %55, %56 : vector<8x128xf32>
    %58 = arith.truncf %51 : vector<8x32xf32> to vector<8x32xbf16>
    %cst_21 = arith.constant dense<0.000000e+00> : vector<8x128xf32>
    %59 = tpu.matmul %58, %7, %cst_21 {dimension_numbers = #tpu.dot_dimension_numbers<[1], [0], [0], [1], [0, 0, 1, 1], [], []>} : vector<8x32xbf16>, vector<32x128xbf16>, vector<8x128xf32> -> vector<8x128xf32>
    %60 = vector.extract_strided_slice %5 {offsets = [48, 128], sizes = [8, 128], strides = [1, 1]} : vector<64x256xf32> to vector<8x128xf32>
    %61 = arith.addf %59, %60 : vector<8x128xf32>
    %62 = vector.extract_strided_slice %57 {offsets = [0, 0], sizes = [8, 96], strides = [1, 1]} : vector<8x128xf32> to vector<8x96xf32>
    %63 = arith.negf %62 : vector<8x96xf32>
    %64 = math.exp %63 : vector<8x96xf32>
    %cst_22 = arith.constant 1.000000e+00 : f32
    %65 = vector.broadcast %cst_22 : f32 to vector<8x96xf32>
    %66 = arith.addf %65, %64 : vector<8x96xf32>
    %67 = arith.divf %65, %66 : vector<8x96xf32>
    %68 = vector.extract_strided_slice %61 {offsets = [0, 0], sizes = [8, 96], strides = [1, 1]} : vector<8x128xf32> to vector<8x96xf32>
    %69 = arith.negf %68 : vector<8x96xf32>
    %70 = math.exp %69 : vector<8x96xf32>
    %cst_23 = arith.constant 1.000000e+00 : f32
    %71 = vector.broadcast %cst_23 : f32 to vector<8x96xf32>
    %72 = arith.addf %71, %70 : vector<8x96xf32>
    %73 = arith.divf %71, %72 : vector<8x96xf32>
    %74 = vector.extract_strided_slice %57 {offsets = [0, 96], sizes = [8, 32], strides = [1, 1]} : vector<8x128xf32> to vector<8x32xf32>
    %75 = math.tanh %74 : vector<8x32xf32>
    %76 = vector.extract_strided_slice %61 {offsets = [0, 96], sizes = [8, 32], strides = [1, 1]} : vector<8x128xf32> to vector<8x32xf32>
    %77 = math.tanh %76 : vector<8x32xf32>
    %78 = vector.extract_strided_slice %67 {offsets = [0, 32], sizes = [8, 32], strides = [1, 1]} : vector<8x96xf32> to vector<8x32xf32>
    %79 = arith.mulf %78, %40 : vector<8x32xf32>
    %80 = vector.extract_strided_slice %67 {offsets = [0, 0], sizes = [8, 32], strides = [1, 1]} : vector<8x96xf32> to vector<8x32xf32>
    %81 = arith.mulf %80, %75 : vector<8x32xf32>
    %82 = arith.addf %79, %81 : vector<8x32xf32>
    %83 = vector.extract_strided_slice %73 {offsets = [0, 32], sizes = [8, 32], strides = [1, 1]} : vector<8x96xf32> to vector<8x32xf32>
    %84 = arith.mulf %83, %45 : vector<8x32xf32>
    %85 = vector.extract_strided_slice %73 {offsets = [0, 0], sizes = [8, 32], strides = [1, 1]} : vector<8x96xf32> to vector<8x32xf32>
    %86 = arith.mulf %85, %77 : vector<8x32xf32>
    %87 = arith.addf %84, %86 : vector<8x32xf32>
    %88 = vector.extract_strided_slice %67 {offsets = [0, 64], sizes = [8, 32], strides = [1, 1]} : vector<8x96xf32> to vector<8x32xf32>
    %89 = math.tanh %82 : vector<8x32xf32>
    %90 = arith.mulf %88, %89 : vector<8x32xf32>
    %91 = vector.extract_strided_slice %73 {offsets = [0, 64], sizes = [8, 32], strides = [1, 1]} : vector<8x96xf32> to vector<8x32xf32>
    %92 = math.tanh %87 : vector<8x32xf32>
    %93 = arith.mulf %91, %92 : vector<8x32xf32>
    %c8 = arith.constant 8 : index
    %c0_24 = arith.constant 0 : index
    %94 = vector.load %arg14[%c8, %c0_24] : memref<64x32xf32, #tpu.memory_space<vmem>>, vector<8x32xf32>
    tpu.vector_store %arg14[%c8, %c0_24], %90 {strides = array<i32>} : memref<64x32xf32, #tpu.memory_space<vmem>>, vector<8x32xf32>,
    %c48 = arith.constant 48 : index
    %c0_25 = arith.constant 0 : index
    %95 = vector.load %arg15[%c48, %c0_25] : memref<64x32xf32, #tpu.memory_space<vmem>>, vector<8x32xf32>
    tpu.vector_store %arg15[%c48, %c0_25], %93 {strides = array<i32>} : memref<64x32xf32, #tpu.memory_space<vmem>>, vector<8x32xf32>,
    %96 = arith.truncf %90 : vector<8x32xf32> to vector<8x32xbf16>
    %cst_26 = arith.constant dense<0.000000e+00> : vector<8x128xf32>
    %97 = tpu.matmul %96, %6, %cst_26 {dimension_numbers = #tpu.dot_dimension_numbers<[1], [0], [0], [1], [0, 0, 1, 1], [], []>} : vector<8x32xbf16>, vector<32x128xbf16>, vector<8x128xf32> -> vector<8x128xf32>
    %98 = vector.extract_strided_slice %5 {offsets = [16, 0], sizes = [8, 128], strides = [1, 1]} : vector<64x256xf32> to vector<8x128xf32>
    %99 = arith.addf %97, %98 : vector<8x128xf32>
    %100 = arith.truncf %93 : vector<8x32xf32> to vector<8x32xbf16>
    %cst_27 = arith.constant dense<0.000000e+00> : vector<8x128xf32>
    %101 = tpu.matmul %100, %7, %cst_27 {dimension_numbers = #tpu.dot_dimension_numbers<[1], [0], [0], [1], [0, 0, 1, 1], [], []>} : vector<8x32xbf16>, vector<32x128xbf16>, vector<8x128xf32> -> vector<8x128xf32>
    %102 = vector.extract_strided_slice %5 {offsets = [40, 128], sizes = [8, 128], strides = [1, 1]} : vector<64x256xf32> to vector<8x128xf32>
    %103 = arith.addf %101, %102 : vector<8x128xf32>
    %104 = vector.extract_strided_slice %99 {offsets = [0, 0], sizes = [8, 96], strides = [1, 1]} : vector<8x128xf32> to vector<8x96xf32>
    %105 = arith.negf %104 : vector<8x96xf32>
    %106 = math.exp %105 : vector<8x96xf32>
    %cst_28 = arith.constant 1.000000e+00 : f32
    %107 = vector.broadcast %cst_28 : f32 to vector<8x96xf32>
    %108 = arith.addf %107, %106 : vector<8x96xf32>
    %109 = arith.divf %107, %108 : vector<8x96xf32>
    %110 = vector.extract_strided_slice %103 {offsets = [0, 0], sizes = [8, 96], strides = [1, 1]} : vector<8x128xf32> to vector<8x96xf32>
    %111 = arith.negf %110 : vector<8x96xf32>
    %112 = math.exp %111 : vector<8x96xf32>
    %cst_29 = arith.constant 1.000000e+00 : f32
    %113 = vector.broadcast %cst_29 : f32 to vector<8x96xf32>
    %114 = arith.addf %113, %112 : vector<8x96xf32>
    %115 = arith.divf %113, %114 : vector<8x96xf32>
    %116 = vector.extract_strided_slice %99 {offsets = [0, 96], sizes = [8, 32], strides = [1, 1]} : vector<8x128xf32> to vector<8x32xf32>
    %117 = math.tanh %116 : vector<8x32xf32>
    %118 = vector.extract_strided_slice %103 {offsets = [0, 96], sizes = [8, 32], strides = [1, 1]} : vector<8x128xf32> to vector<8x32xf32>
    %119 = math.tanh %118 : vector<8x32xf32>
    %120 = vector.extract_strided_slice %109 {offsets = [0, 32], sizes = [8, 32], strides = [1, 1]} : vector<8x96xf32> to vector<8x32xf32>
    %121 = arith.mulf %120, %82 : vector<8x32xf32>
    %122 = vector.extract_strided_slice %109 {offsets = [0, 0], sizes = [8, 32], strides = [1, 1]} : vector<8x96xf32> to vector<8x32xf32>
    %123 = arith.mulf %122, %117 : vector<8x32xf32>
    %124 = arith.addf %121, %123 : vector<8x32xf32>
    %125 = vector.extract_strided_slice %115 {offsets = [0, 32], sizes = [8, 32], strides = [1, 1]} : vector<8x96xf32> to vector<8x32xf32>
    %126 = arith.mulf %125, %87 : vector<8x32xf32>
    %127 = vector.extract_strided_slice %115 {offsets = [0, 0], sizes = [8, 32], strides = [1, 1]} : vector<8x96xf32> to vector<8x32xf32>
    %128 = arith.mulf %127, %119 : vector<8x32xf32>
    %129 = arith.addf %126, %128 : vector<8x32xf32>
    %130 = vector.extract_strided_slice %109 {offsets = [0, 64], sizes = [8, 32], strides = [1, 1]} : vector<8x96xf32> to vector<8x32xf32>
    %131 = math.tanh %124 : vector<8x32xf32>
    %132 = arith.mulf %130, %131 : vector<8x32xf32>
    %133 = vector.extract_strided_slice %115 {offsets = [0, 64], sizes = [8, 32], strides = [1, 1]} : vector<8x96xf32> to vector<8x32xf32>
    %134 = math.tanh %129 : vector<8x32xf32>
    %135 = arith.mulf %133, %134 : vector<8x32xf32>
    %c16 = arith.constant 16 : index
    %c0_30 = arith.constant 0 : index
    %136 = vector.load %arg14[%c16, %c0_30] : memref<64x32xf32, #tpu.memory_space<vmem>>, vector<8x32xf32>
    tpu.vector_store %arg14[%c16, %c0_30], %132 {strides = array<i32>} : memref<64x32xf32, #tpu.memory_space<vmem>>, vector<8x32xf32>,
    %c40 = arith.constant 40 : index
    %c0_31 = arith.constant 0 : index
    %137 = vector.load %arg15[%c40, %c0_31] : memref<64x32xf32, #tpu.memory_space<vmem>>, vector<8x32xf32>
    tpu.vector_store %arg15[%c40, %c0_31], %135 {strides = array<i32>} : memref<64x32xf32, #tpu.memory_space<vmem>>, vector<8x32xf32>,
    %138 = arith.truncf %132 : vector<8x32xf32> to vector<8x32xbf16>
    %cst_32 = arith.constant dense<0.000000e+00> : vector<8x128xf32>
    %139 = tpu.matmul %138, %6, %cst_32 {dimension_numbers = #tpu.dot_dimension_numbers<[1], [0], [0], [1], [0, 0, 1, 1], [], []>} : vector<8x32xbf16>, vector<32x128xbf16>, vector<8x128xf32> -> vector<8x128xf32>
    %140 = vector.extract_strided_slice %5 {offsets = [24, 0], sizes = [8, 128], strides = [1, 1]} : vector<64x256xf32> to vector<8x128xf32>
    %141 = arith.addf %139, %140 : vector<8x128xf32>
    %142 = arith.truncf %135 : vector<8x32xf32> to vector<8x32xbf16>
    %cst_33 = arith.constant dense<0.000000e+00> : vector<8x128xf32>
    %143 = tpu.matmul %142, %7, %cst_33 {dimension_numbers = #tpu.dot_dimension_numbers<[1], [0], [0], [1], [0, 0, 1, 1], [], []>} : vector<8x32xbf16>, vector<32x128xbf16>, vector<8x128xf32> -> vector<8x128xf32>
    %144 = vector.extract_strided_slice %5 {offsets = [32, 128], sizes = [8, 128], strides = [1, 1]} : vector<64x256xf32> to vector<8x128xf32>
    %145 = arith.addf %143, %144 : vector<8x128xf32>
    %146 = vector.extract_strided_slice %141 {offsets = [0, 0], sizes = [8, 96], strides = [1, 1]} : vector<8x128xf32> to vector<8x96xf32>
    %147 = arith.negf %146 : vector<8x96xf32>
    %148 = math.exp %147 : vector<8x96xf32>
    %cst_34 = arith.constant 1.000000e+00 : f32
    %149 = vector.broadcast %cst_34 : f32 to vector<8x96xf32>
    %150 = arith.addf %149, %148 : vector<8x96xf32>
    %151 = arith.divf %149, %150 : vector<8x96xf32>
    %152 = vector.extract_strided_slice %145 {offsets = [0, 0], sizes = [8, 96], strides = [1, 1]} : vector<8x128xf32> to vector<8x96xf32>
    %153 = arith.negf %152 : vector<8x96xf32>
    %154 = math.exp %153 : vector<8x96xf32>
    %cst_35 = arith.constant 1.000000e+00 : f32
    %155 = vector.broadcast %cst_35 : f32 to vector<8x96xf32>
    %156 = arith.addf %155, %154 : vector<8x96xf32>
    %157 = arith.divf %155, %156 : vector<8x96xf32>
    %158 = vector.extract_strided_slice %141 {offsets = [0, 96], sizes = [8, 32], strides = [1, 1]} : vector<8x128xf32> to vector<8x32xf32>
    %159 = math.tanh %158 : vector<8x32xf32>
    %160 = vector.extract_strided_slice %145 {offsets = [0, 96], sizes = [8, 32], strides = [1, 1]} : vector<8x128xf32> to vector<8x32xf32>
    %161 = math.tanh %160 : vector<8x32xf32>
    %162 = vector.extract_strided_slice %151 {offsets = [0, 32], sizes = [8, 32], strides = [1, 1]} : vector<8x96xf32> to vector<8x32xf32>
    %163 = arith.mulf %162, %124 : vector<8x32xf32>
    %164 = vector.extract_strided_slice %151 {offsets = [0, 0], sizes = [8, 32], strides = [1, 1]} : vector<8x96xf32> to vector<8x32xf32>
    %165 = arith.mulf %164, %159 : vector<8x32xf32>
    %166 = arith.addf %163, %165 : vector<8x32xf32>
    %167 = vector.extract_strided_slice %157 {offsets = [0, 32], sizes = [8, 32], strides = [1, 1]} : vector<8x96xf32> to vector<8x32xf32>
    %168 = arith.mulf %167, %129 : vector<8x32xf32>
    %169 = vector.extract_strided_slice %157 {offsets = [0, 0], sizes = [8, 32], strides = [1, 1]} : vector<8x96xf32> to vector<8x32xf32>
    %170 = arith.mulf %169, %161 : vector<8x32xf32>
    %171 = arith.addf %168, %170 : vector<8x32xf32>
    %172 = vector.extract_strided_slice %151 {offsets = [0, 64], sizes = [8, 32], strides = [1, 1]} : vector<8x96xf32> to vector<8x32xf32>
    %173 = math.tanh %166 : vector<8x32xf32>
    %174 = arith.mulf %172, %173 : vector<8x32xf32>
    %175 = vector.extract_strided_slice %157 {offsets = [0, 64], sizes = [8, 32], strides = [1, 1]} : vector<8x96xf32> to vector<8x32xf32>
    %176 = math.tanh %171 : vector<8x32xf32>
    %177 = arith.mulf %175, %176 : vector<8x32xf32>
    %c24 = arith.constant 24 : index
    %c0_36 = arith.constant 0 : index
    %178 = vector.load %arg14[%c24, %c0_36] : memref<64x32xf32, #tpu.memory_space<vmem>>, vector<8x32xf32>
    tpu.vector_store %arg14[%c24, %c0_36], %174 {strides = array<i32>} : memref<64x32xf32, #tpu.memory_space<vmem>>, vector<8x32xf32>,
    %c32 = arith.constant 32 : index
    %c0_37 = arith.constant 0 : index
    %179 = vector.load %arg15[%c32, %c0_37] : memref<64x32xf32, #tpu.memory_space<vmem>>, vector<8x32xf32>
    tpu.vector_store %arg15[%c32, %c0_37], %177 {strides = array<i32>} : memref<64x32xf32, #tpu.memory_space<vmem>>, vector<8x32xf32>,
    %180 = arith.truncf %174 : vector<8x32xf32> to vector<8x32xbf16>
    %cst_38 = arith.constant dense<0.000000e+00> : vector<8x128xf32>
    %181 = tpu.matmul %180, %6, %cst_38 {dimension_numbers = #tpu.dot_dimension_numbers<[1], [0], [0], [1], [0, 0, 1, 1], [], []>} : vector<8x32xbf16>, vector<32x128xbf16>, vector<8x128xf32> -> vector<8x128xf32>
    %182 = vector.extract_strided_slice %5 {offsets = [32, 0], sizes = [8, 128], strides = [1, 1]} : vector<64x256xf32> to vector<8x128xf32>
    %183 = arith.addf %181, %182 : vector<8x128xf32>
    %184 = arith.truncf %177 : vector<8x32xf32> to vector<8x32xbf16>
    %cst_39 = arith.constant dense<0.000000e+00> : vector<8x128xf32>
    %185 = tpu.matmul %184, %7, %cst_39 {dimension_numbers = #tpu.dot_dimension_numbers<[1], [0], [0], [1], [0, 0, 1, 1], [], []>} : vector<8x32xbf16>, vector<32x128xbf16>, vector<8x128xf32> -> vector<8x128xf32>
    %186 = vector.extract_strided_slice %5 {offsets = [24, 128], sizes = [8, 128], strides = [1, 1]} : vector<64x256xf32> to vector<8x128xf32>
    %187 = arith.addf %185, %186 : vector<8x128xf32>
    %188 = vector.extract_strided_slice %183 {offsets = [0, 0], sizes = [8, 96], strides = [1, 1]} : vector<8x128xf32> to vector<8x96xf32>
    %189 = arith.negf %188 : vector<8x96xf32>
    %190 = math.exp %189 : vector<8x96xf32>
    %cst_40 = arith.constant 1.000000e+00 : f32
    %191 = vector.broadcast %cst_40 : f32 to vector<8x96xf32>
    %192 = arith.addf %191, %190 : vector<8x96xf32>
    %193 = arith.divf %191, %192 : vector<8x96xf32>
    %194 = vector.extract_strided_slice %187 {offsets = [0, 0], sizes = [8, 96], strides = [1, 1]} : vector<8x128xf32> to vector<8x96xf32>
    %195 = arith.negf %194 : vector<8x96xf32>
    %196 = math.exp %195 : vector<8x96xf32>
    %cst_41 = arith.constant 1.000000e+00 : f32
    %197 = vector.broadcast %cst_41 : f32 to vector<8x96xf32>
    %198 = arith.addf %197, %196 : vector<8x96xf32>
    %199 = arith.divf %197, %198 : vector<8x96xf32>
    %200 = vector.extract_strided_slice %183 {offsets = [0, 96], sizes = [8, 32], strides = [1, 1]} : vector<8x128xf32> to vector<8x32xf32>
    %201 = math.tanh %200 : vector<8x32xf32>
    %202 = vector.extract_strided_slice %187 {offsets = [0, 96], sizes = [8, 32], strides = [1, 1]} : vector<8x128xf32> to vector<8x32xf32>
    %203 = math.tanh %202 : vector<8x32xf32>
    %204 = vector.extract_strided_slice %193 {offsets = [0, 32], sizes = [8, 32], strides = [1, 1]} : vector<8x96xf32> to vector<8x32xf32>
    %205 = arith.mulf %204, %166 : vector<8x32xf32>
    %206 = vector.extract_strided_slice %193 {offsets = [0, 0], sizes = [8, 32], strides = [1, 1]} : vector<8x96xf32> to vector<8x32xf32>
    %207 = arith.mulf %206, %201 : vector<8x32xf32>
    %208 = arith.addf %205, %207 : vector<8x32xf32>
    %209 = vector.extract_strided_slice %199 {offsets = [0, 32], sizes = [8, 32], strides = [1, 1]} : vector<8x96xf32> to vector<8x32xf32>
    %210 = arith.mulf %209, %171 : vector<8x32xf32>
    %211 = vector.extract_strided_slice %199 {offsets = [0, 0], sizes = [8, 32], strides = [1, 1]} : vector<8x96xf32> to vector<8x32xf32>
    %212 = arith.mulf %211, %203 : vector<8x32xf32>
    %213 = arith.addf %210, %212 : vector<8x32xf32>
    %214 = vector.extract_strided_slice %193 {offsets = [0, 64], sizes = [8, 32], strides = [1, 1]} : vector<8x96xf32> to vector<8x32xf32>
    %215 = math.tanh %208 : vector<8x32xf32>
    %216 = arith.mulf %214, %215 : vector<8x32xf32>
    %217 = vector.extract_strided_slice %199 {offsets = [0, 64], sizes = [8, 32], strides = [1, 1]} : vector<8x96xf32> to vector<8x32xf32>
    %218 = math.tanh %213 : vector<8x32xf32>
    %219 = arith.mulf %217, %218 : vector<8x32xf32>
    %c32_42 = arith.constant 32 : index
    %c0_43 = arith.constant 0 : index
    %220 = vector.load %arg14[%c32_42, %c0_43] : memref<64x32xf32, #tpu.memory_space<vmem>>, vector<8x32xf32>
    tpu.vector_store %arg14[%c32_42, %c0_43], %216 {strides = array<i32>} : memref<64x32xf32, #tpu.memory_space<vmem>>, vector<8x32xf32>,
    %c24_44 = arith.constant 24 : index
    %c0_45 = arith.constant 0 : index
    %221 = vector.load %arg15[%c24_44, %c0_45] : memref<64x32xf32, #tpu.memory_space<vmem>>, vector<8x32xf32>
    tpu.vector_store %arg15[%c24_44, %c0_45], %219 {strides = array<i32>} : memref<64x32xf32, #tpu.memory_space<vmem>>, vector<8x32xf32>,
    %222 = arith.truncf %216 : vector<8x32xf32> to vector<8x32xbf16>
    %cst_46 = arith.constant dense<0.000000e+00> : vector<8x128xf32>
    %223 = tpu.matmul %222, %6, %cst_46 {dimension_numbers = #tpu.dot_dimension_numbers<[1], [0], [0], [1], [0, 0, 1, 1], [], []>} : vector<8x32xbf16>, vector<32x128xbf16>, vector<8x128xf32> -> vector<8x128xf32>
    %224 = vector.extract_strided_slice %5 {offsets = [40, 0], sizes = [8, 128], strides = [1, 1]} : vector<64x256xf32> to vector<8x128xf32>
    %225 = arith.addf %223, %224 : vector<8x128xf32>
    %226 = arith.truncf %219 : vector<8x32xf32> to vector<8x32xbf16>
    %cst_47 = arith.constant dense<0.000000e+00> : vector<8x128xf32>
    %227 = tpu.matmul %226, %7, %cst_47 {dimension_numbers = #tpu.dot_dimension_numbers<[1], [0], [0], [1], [0, 0, 1, 1], [], []>} : vector<8x32xbf16>, vector<32x128xbf16>, vector<8x128xf32> -> vector<8x128xf32>
    %228 = vector.extract_strided_slice %5 {offsets = [16, 128], sizes = [8, 128], strides = [1, 1]} : vector<64x256xf32> to vector<8x128xf32>
    %229 = arith.addf %227, %228 : vector<8x128xf32>
    %230 = vector.extract_strided_slice %225 {offsets = [0, 0], sizes = [8, 96], strides = [1, 1]} : vector<8x128xf32> to vector<8x96xf32>
    %231 = arith.negf %230 : vector<8x96xf32>
    %232 = math.exp %231 : vector<8x96xf32>
    %cst_48 = arith.constant 1.000000e+00 : f32
    %233 = vector.broadcast %cst_48 : f32 to vector<8x96xf32>
    %234 = arith.addf %233, %232 : vector<8x96xf32>
    %235 = arith.divf %233, %234 : vector<8x96xf32>
    %236 = vector.extract_strided_slice %229 {offsets = [0, 0], sizes = [8, 96], strides = [1, 1]} : vector<8x128xf32> to vector<8x96xf32>
    %237 = arith.negf %236 : vector<8x96xf32>
    %238 = math.exp %237 : vector<8x96xf32>
    %cst_49 = arith.constant 1.000000e+00 : f32
    %239 = vector.broadcast %cst_49 : f32 to vector<8x96xf32>
    %240 = arith.addf %239, %238 : vector<8x96xf32>
    %241 = arith.divf %239, %240 : vector<8x96xf32>
    %242 = vector.extract_strided_slice %225 {offsets = [0, 96], sizes = [8, 32], strides = [1, 1]} : vector<8x128xf32> to vector<8x32xf32>
    %243 = math.tanh %242 : vector<8x32xf32>
    %244 = vector.extract_strided_slice %229 {offsets = [0, 96], sizes = [8, 32], strides = [1, 1]} : vector<8x128xf32> to vector<8x32xf32>
    %245 = math.tanh %244 : vector<8x32xf32>
    %246 = vector.extract_strided_slice %235 {offsets = [0, 32], sizes = [8, 32], strides = [1, 1]} : vector<8x96xf32> to vector<8x32xf32>
    %247 = arith.mulf %246, %208 : vector<8x32xf32>
    %248 = vector.extract_strided_slice %235 {offsets = [0, 0], sizes = [8, 32], strides = [1, 1]} : vector<8x96xf32> to vector<8x32xf32>
    %249 = arith.mulf %248, %243 : vector<8x32xf32>
    %250 = arith.addf %247, %249 : vector<8x32xf32>
    %251 = vector.extract_strided_slice %241 {offsets = [0, 32], sizes = [8, 32], strides = [1, 1]} : vector<8x96xf32> to vector<8x32xf32>
    %252 = arith.mulf %251, %213 : vector<8x32xf32>
    %253 = vector.extract_strided_slice %241 {offsets = [0, 0], sizes = [8, 32], strides = [1, 1]} : vector<8x96xf32> to vector<8x32xf32>
    %254 = arith.mulf %253, %245 : vector<8x32xf32>
    %255 = arith.addf %252, %254 : vector<8x32xf32>
    %256 = vector.extract_strided_slice %235 {offsets = [0, 64], sizes = [8, 32], strides = [1, 1]} : vector<8x96xf32> to vector<8x32xf32>
    %257 = math.tanh %250 : vector<8x32xf32>
    %258 = arith.mulf %256, %257 : vector<8x32xf32>
    %259 = vector.extract_strided_slice %241 {offsets = [0, 64], sizes = [8, 32], strides = [1, 1]} : vector<8x96xf32> to vector<8x32xf32>
    %260 = math.tanh %255 : vector<8x32xf32>
    %261 = arith.mulf %259, %260 : vector<8x32xf32>
    %c40_50 = arith.constant 40 : index
    %c0_51 = arith.constant 0 : index
    %262 = vector.load %arg14[%c40_50, %c0_51] : memref<64x32xf32, #tpu.memory_space<vmem>>, vector<8x32xf32>
    tpu.vector_store %arg14[%c40_50, %c0_51], %258 {strides = array<i32>} : memref<64x32xf32, #tpu.memory_space<vmem>>, vector<8x32xf32>,
    %c16_52 = arith.constant 16 : index
    %c0_53 = arith.constant 0 : index
    %263 = vector.load %arg15[%c16_52, %c0_53] : memref<64x32xf32, #tpu.memory_space<vmem>>, vector<8x32xf32>
    tpu.vector_store %arg15[%c16_52, %c0_53], %261 {strides = array<i32>} : memref<64x32xf32, #tpu.memory_space<vmem>>, vector<8x32xf32>,
    %264 = arith.truncf %258 : vector<8x32xf32> to vector<8x32xbf16>
    %cst_54 = arith.constant dense<0.000000e+00> : vector<8x128xf32>
    %265 = tpu.matmul %264, %6, %cst_54 {dimension_numbers = #tpu.dot_dimension_numbers<[1], [0], [0], [1], [0, 0, 1, 1], [], []>} : vector<8x32xbf16>, vector<32x128xbf16>, vector<8x128xf32> -> vector<8x128xf32>
    %266 = vector.extract_strided_slice %5 {offsets = [48, 0], sizes = [8, 128], strides = [1, 1]} : vector<64x256xf32> to vector<8x128xf32>
    %267 = arith.addf %265, %266 : vector<8x128xf32>
    %268 = arith.truncf %261 : vector<8x32xf32> to vector<8x32xbf16>
    %cst_55 = arith.constant dense<0.000000e+00> : vector<8x128xf32>
    %269 = tpu.matmul %268, %7, %cst_55 {dimension_numbers = #tpu.dot_dimension_numbers<[1], [0], [0], [1], [0, 0, 1, 1], [], []>} : vector<8x32xbf16>, vector<32x128xbf16>, vector<8x128xf32> -> vector<8x128xf32>
    %270 = vector.extract_strided_slice %5 {offsets = [8, 128], sizes = [8, 128], strides = [1, 1]} : vector<64x256xf32> to vector<8x128xf32>
    %271 = arith.addf %269, %270 : vector<8x128xf32>
    %272 = vector.extract_strided_slice %267 {offsets = [0, 0], sizes = [8, 96], strides = [1, 1]} : vector<8x128xf32> to vector<8x96xf32>
    %273 = arith.negf %272 : vector<8x96xf32>
    %274 = math.exp %273 : vector<8x96xf32>
    %cst_56 = arith.constant 1.000000e+00 : f32
    %275 = vector.broadcast %cst_56 : f32 to vector<8x96xf32>
    %276 = arith.addf %275, %274 : vector<8x96xf32>
    %277 = arith.divf %275, %276 : vector<8x96xf32>
    %278 = vector.extract_strided_slice %271 {offsets = [0, 0], sizes = [8, 96], strides = [1, 1]} : vector<8x128xf32> to vector<8x96xf32>
    %279 = arith.negf %278 : vector<8x96xf32>
    %280 = math.exp %279 : vector<8x96xf32>
    %cst_57 = arith.constant 1.000000e+00 : f32
    %281 = vector.broadcast %cst_57 : f32 to vector<8x96xf32>
    %282 = arith.addf %281, %280 : vector<8x96xf32>
    %283 = arith.divf %281, %282 : vector<8x96xf32>
    %284 = vector.extract_strided_slice %267 {offsets = [0, 96], sizes = [8, 32], strides = [1, 1]} : vector<8x128xf32> to vector<8x32xf32>
    %285 = math.tanh %284 : vector<8x32xf32>
    %286 = vector.extract_strided_slice %271 {offsets = [0, 96], sizes = [8, 32], strides = [1, 1]} : vector<8x128xf32> to vector<8x32xf32>
    %287 = math.tanh %286 : vector<8x32xf32>
    %288 = vector.extract_strided_slice %277 {offsets = [0, 32], sizes = [8, 32], strides = [1, 1]} : vector<8x96xf32> to vector<8x32xf32>
    %289 = arith.mulf %288, %250 : vector<8x32xf32>
    %290 = vector.extract_strided_slice %277 {offsets = [0, 0], sizes = [8, 32], strides = [1, 1]} : vector<8x96xf32> to vector<8x32xf32>
    %291 = arith.mulf %290, %285 : vector<8x32xf32>
    %292 = arith.addf %289, %291 : vector<8x32xf32>
    %293 = vector.extract_strided_slice %283 {offsets = [0, 32], sizes = [8, 32], strides = [1, 1]} : vector<8x96xf32> to vector<8x32xf32>
    %294 = arith.mulf %293, %255 : vector<8x32xf32>
    %295 = vector.extract_strided_slice %283 {offsets = [0, 0], sizes = [8, 32], strides = [1, 1]} : vector<8x96xf32> to vector<8x32xf32>
    %296 = arith.mulf %295, %287 : vector<8x32xf32>
    %297 = arith.addf %294, %296 : vector<8x32xf32>
    %298 = vector.extract_strided_slice %277 {offsets = [0, 64], sizes = [8, 32], strides = [1, 1]} : vector<8x96xf32> to vector<8x32xf32>
    %299 = math.tanh %292 : vector<8x32xf32>
    %300 = arith.mulf %298, %299 : vector<8x32xf32>
    %301 = vector.extract_strided_slice %283 {offsets = [0, 64], sizes = [8, 32], strides = [1, 1]} : vector<8x96xf32> to vector<8x32xf32>
    %302 = math.tanh %297 : vector<8x32xf32>
    %303 = arith.mulf %301, %302 : vector<8x32xf32>
    %c48_58 = arith.constant 48 : index
    %c0_59 = arith.constant 0 : index
    %304 = vector.load %arg14[%c48_58, %c0_59] : memref<64x32xf32, #tpu.memory_space<vmem>>, vector<8x32xf32>
    tpu.vector_store %arg14[%c48_58, %c0_59], %300 {strides = array<i32>} : memref<64x32xf32, #tpu.memory_space<vmem>>, vector<8x32xf32>,
    %c8_60 = arith.constant 8 : index
    %c0_61 = arith.constant 0 : index
    %305 = vector.load %arg15[%c8_60, %c0_61] : memref<64x32xf32, #tpu.memory_space<vmem>>, vector<8x32xf32>
    tpu.vector_store %arg15[%c8_60, %c0_61], %303 {strides = array<i32>} : memref<64x32xf32, #tpu.memory_space<vmem>>, vector<8x32xf32>,
    %306 = arith.truncf %300 : vector<8x32xf32> to vector<8x32xbf16>
    %cst_62 = arith.constant dense<0.000000e+00> : vector<8x128xf32>
    %307 = tpu.matmul %306, %6, %cst_62 {dimension_numbers = #tpu.dot_dimension_numbers<[1], [0], [0], [1], [0, 0, 1, 1], [], []>} : vector<8x32xbf16>, vector<32x128xbf16>, vector<8x128xf32> -> vector<8x128xf32>
    %308 = vector.extract_strided_slice %5 {offsets = [56, 0], sizes = [8, 128], strides = [1, 1]} : vector<64x256xf32> to vector<8x128xf32>
    %309 = arith.addf %307, %308 : vector<8x128xf32>
    %310 = arith.truncf %303 : vector<8x32xf32> to vector<8x32xbf16>
    %cst_63 = arith.constant dense<0.000000e+00> : vector<8x128xf32>
    %311 = tpu.matmul %310, %7, %cst_63 {dimension_numbers = #tpu.dot_dimension_numbers<[1], [0], [0], [1], [0, 0, 1, 1], [], []>} : vector<8x32xbf16>, vector<32x128xbf16>, vector<8x128xf32> -> vector<8x128xf32>
    %312 = vector.extract_strided_slice %5 {offsets = [0, 128], sizes = [8, 128], strides = [1, 1]} : vector<64x256xf32> to vector<8x128xf32>
    %313 = arith.addf %311, %312 : vector<8x128xf32>
    %314 = vector.extract_strided_slice %309 {offsets = [0, 0], sizes = [8, 96], strides = [1, 1]} : vector<8x128xf32> to vector<8x96xf32>
    %315 = arith.negf %314 : vector<8x96xf32>
    %316 = math.exp %315 : vector<8x96xf32>
    %cst_64 = arith.constant 1.000000e+00 : f32
    %317 = vector.broadcast %cst_64 : f32 to vector<8x96xf32>
    %318 = arith.addf %317, %316 : vector<8x96xf32>
    %319 = arith.divf %317, %318 : vector<8x96xf32>
    %320 = vector.extract_strided_slice %313 {offsets = [0, 0], sizes = [8, 96], strides = [1, 1]} : vector<8x128xf32> to vector<8x96xf32>
    %321 = arith.negf %320 : vector<8x96xf32>
    %322 = math.exp %321 : vector<8x96xf32>
    %cst_65 = arith.constant 1.000000e+00 : f32
    %323 = vector.broadcast %cst_65 : f32 to vector<8x96xf32>
    %324 = arith.addf %323, %322 : vector<8x96xf32>
    %325 = arith.divf %323, %324 : vector<8x96xf32>
    %326 = vector.extract_strided_slice %309 {offsets = [0, 96], sizes = [8, 32], strides = [1, 1]} : vector<8x128xf32> to vector<8x32xf32>
    %327 = math.tanh %326 : vector<8x32xf32>
    %328 = vector.extract_strided_slice %313 {offsets = [0, 96], sizes = [8, 32], strides = [1, 1]} : vector<8x128xf32> to vector<8x32xf32>
    %329 = math.tanh %328 : vector<8x32xf32>
    %330 = vector.extract_strided_slice %319 {offsets = [0, 32], sizes = [8, 32], strides = [1, 1]} : vector<8x96xf32> to vector<8x32xf32>
    %331 = arith.mulf %330, %292 : vector<8x32xf32>
    %332 = vector.extract_strided_slice %319 {offsets = [0, 0], sizes = [8, 32], strides = [1, 1]} : vector<8x96xf32> to vector<8x32xf32>
    %333 = arith.mulf %332, %327 : vector<8x32xf32>
    %334 = arith.addf %331, %333 : vector<8x32xf32>
    %335 = vector.extract_strided_slice %325 {offsets = [0, 32], sizes = [8, 32], strides = [1, 1]} : vector<8x96xf32> to vector<8x32xf32>
    %336 = arith.mulf %335, %297 : vector<8x32xf32>
    %337 = vector.extract_strided_slice %325 {offsets = [0, 0], sizes = [8, 32], strides = [1, 1]} : vector<8x96xf32> to vector<8x32xf32>
    %338 = arith.mulf %337, %329 : vector<8x32xf32>
    %339 = arith.addf %336, %338 : vector<8x32xf32>
    %340 = vector.extract_strided_slice %319 {offsets = [0, 64], sizes = [8, 32], strides = [1, 1]} : vector<8x96xf32> to vector<8x32xf32>
    %341 = math.tanh %334 : vector<8x32xf32>
    %342 = arith.mulf %340, %341 : vector<8x32xf32>
    %343 = vector.extract_strided_slice %325 {offsets = [0, 64], sizes = [8, 32], strides = [1, 1]} : vector<8x96xf32> to vector<8x32xf32>
    %344 = math.tanh %339 : vector<8x32xf32>
    %345 = arith.mulf %343, %344 : vector<8x32xf32>
    %c56_66 = arith.constant 56 : index
    %c0_67 = arith.constant 0 : index
    %346 = vector.load %arg14[%c56_66, %c0_67] : memref<64x32xf32, #tpu.memory_space<vmem>>, vector<8x32xf32>
    tpu.vector_store %arg14[%c56_66, %c0_67], %342 {strides = array<i32>} : memref<64x32xf32, #tpu.memory_space<vmem>>, vector<8x32xf32>,
    %c0_68 = arith.constant 0 : index
    %c0_69 = arith.constant 0 : index
    %347 = vector.load %arg15[%c0_68, %c0_69] : memref<64x32xf32, #tpu.memory_space<vmem>>, vector<8x32xf32>
    tpu.vector_store %arg15[%c0_68, %c0_69], %345 {strides = array<i32>} : memref<64x32xf32, #tpu.memory_space<vmem>>, vector<8x32xf32>,
    %c0_70 = arith.constant 0 : index
    %c0_71 = arith.constant 0 : index
    %348 = vector.load %arg14[%c0_70, %c0_71] : memref<64x32xf32, #tpu.memory_space<vmem>>, vector<64x32xf32>
    %349 = arith.truncf %348 : vector<64x32xf32> to vector<64x32xbf16>
    %c0_72 = arith.constant 0 : index
    %c0_73 = arith.constant 0 : index
    %350 = vector.load %arg6[%c0_72, %c0_73] : memref<64x256xbf16, #tpu.memory_space<vmem>>, vector<32x256xbf16>
    %cst_74 = arith.constant dense<0.000000e+00> : vector<64x256xf32>
    %351 = tpu.matmul %349, %350, %cst_74 {dimension_numbers = #tpu.dot_dimension_numbers<[1], [0], [0], [1], [0, 0, 1, 1], [], []>} : vector<64x32xbf16>, vector<32x256xbf16>, vector<64x256xf32> -> vector<64x256xf32>
    %c0_75 = arith.constant 0 : index
    %c0_76 = arith.constant 0 : index
    %352 = vector.load %arg15[%c0_75, %c0_76] : memref<64x32xf32, #tpu.memory_space<vmem>>, vector<64x32xf32>
    %353 = arith.truncf %352 : vector<64x32xf32> to vector<64x32xbf16>
    %c32_77 = arith.constant 32 : index
    %c0_78 = arith.constant 0 : index
    %354 = vector.load %arg6[%c32_77, %c0_78] : memref<64x256xbf16, #tpu.memory_space<vmem>>, vector<32x256xbf16>
    %cst_79 = arith.constant dense<0.000000e+00> : vector<64x256xf32>
    %355 = tpu.matmul %353, %354, %cst_79 {dimension_numbers = #tpu.dot_dimension_numbers<[1], [0], [0], [1], [0, 0, 1, 1], [], []>} : vector<64x32xbf16>, vector<32x256xbf16>, vector<64x256xf32> -> vector<64x256xf32>
    %356 = arith.addf %351, %355 : vector<64x256xf32>
    %c0_80 = arith.constant 0 : index
    %c0_81 = arith.constant 0 : index
    %357 = vector.load %arg9[%c0_80, %c0_81] : memref<1x256xf32, #tpu.memory_space<vmem>>, vector<1x256xf32>
    %358 = vector.broadcast %357 : vector<1x256xf32> to vector<64x256xf32>
    %359 = arith.addf %356, %358 : vector<64x256xf32>
    %c0_82 = arith.constant 0 : index
    %c0_83 = arith.constant 0 : index
    %360 = vector.load %arg7[%c0_82, %c0_83] : memref<32x128xbf16, #tpu.memory_space<vmem>>, vector<32x128xbf16>
    %c0_84 = arith.constant 0 : index
    %c0_85 = arith.constant 0 : index
    %361 = vector.load %arg8[%c0_84, %c0_85] : memref<32x128xbf16, #tpu.memory_space<vmem>>, vector<32x128xbf16>
    %cst_86 = arith.constant 0.000000e+00 : f32
    %362 = vector.broadcast %cst_86 : f32 to vector<8x32xf32>
    %cst_87 = arith.constant 0.000000e+00 : f32
    %363 = vector.broadcast %cst_87 : f32 to vector<8x32xf32>
    %cst_88 = arith.constant 0.000000e+00 : f32
    %364 = vector.broadcast %cst_88 : f32 to vector<8x32xf32>
    %cst_89 = arith.constant 0.000000e+00 : f32
    %365 = vector.broadcast %cst_89 : f32 to vector<8x32xf32>
    %366 = arith.truncf %362 : vector<8x32xf32> to vector<8x32xbf16>
    %cst_90 = arith.constant dense<0.000000e+00> : vector<8x128xf32>
    %367 = tpu.matmul %366, %360, %cst_90 {dimension_numbers = #tpu.dot_dimension_numbers<[1], [0], [0], [1], [0, 0, 1, 1], [], []>} : vector<8x32xbf16>, vector<32x128xbf16>, vector<8x128xf32> -> vector<8x128xf32>
    %368 = vector.extract_strided_slice %359 {offsets = [0, 0], sizes = [8, 128], strides = [1, 1]} : vector<64x256xf32> to vector<8x128xf32>
    %369 = arith.addf %367, %368 : vector<8x128xf32>
    %370 = arith.truncf %363 : vector<8x32xf32> to vector<8x32xbf16>
    %cst_91 = arith.constant dense<0.000000e+00> : vector<8x128xf32>
    %371 = tpu.matmul %370, %361, %cst_91 {dimension_numbers = #tpu.dot_dimension_numbers<[1], [0], [0], [1], [0, 0, 1, 1], [], []>} : vector<8x32xbf16>, vector<32x128xbf16>, vector<8x128xf32> -> vector<8x128xf32>
    %372 = vector.extract_strided_slice %359 {offsets = [56, 128], sizes = [8, 128], strides = [1, 1]} : vector<64x256xf32> to vector<8x128xf32>
    %373 = arith.addf %371, %372 : vector<8x128xf32>
    %374 = vector.extract_strided_slice %369 {offsets = [0, 0], sizes = [8, 96], strides = [1, 1]} : vector<8x128xf32> to vector<8x96xf32>
    %375 = arith.negf %374 : vector<8x96xf32>
    %376 = math.exp %375 : vector<8x96xf32>
    %cst_92 = arith.constant 1.000000e+00 : f32
    %377 = vector.broadcast %cst_92 : f32 to vector<8x96xf32>
    %378 = arith.addf %377, %376 : vector<8x96xf32>
    %379 = arith.divf %377, %378 : vector<8x96xf32>
    %380 = vector.extract_strided_slice %373 {offsets = [0, 0], sizes = [8, 96], strides = [1, 1]} : vector<8x128xf32> to vector<8x96xf32>
    %381 = arith.negf %380 : vector<8x96xf32>
    %382 = math.exp %381 : vector<8x96xf32>
    %cst_93 = arith.constant 1.000000e+00 : f32
    %383 = vector.broadcast %cst_93 : f32 to vector<8x96xf32>
    %384 = arith.addf %383, %382 : vector<8x96xf32>
    %385 = arith.divf %383, %384 : vector<8x96xf32>
    %386 = vector.extract_strided_slice %369 {offsets = [0, 96], sizes = [8, 32], strides = [1, 1]} : vector<8x128xf32> to vector<8x32xf32>
    %387 = math.tanh %386 : vector<8x32xf32>
    %388 = vector.extract_strided_slice %373 {offsets = [0, 96], sizes = [8, 32], strides = [1, 1]} : vector<8x128xf32> to vector<8x32xf32>
    %389 = math.tanh %388 : vector<8x32xf32>
    %390 = vector.extract_strided_slice %379 {offsets = [0, 32], sizes = [8, 32], strides = [1, 1]} : vector<8x96xf32> to vector<8x32xf32>
    %391 = arith.mulf %390, %364 : vector<8x32xf32>
    %392 = vector.extract_strided_slice %379 {offsets = [0, 0], sizes = [8, 32], strides = [1, 1]} : vector<8x96xf32> to vector<8x32xf32>
    %393 = arith.mulf %392, %387 : vector<8x32xf32>
    %394 = arith.addf %391, %393 : vector<8x32xf32>
    %395 = vector.extract_strided_slice %385 {offsets = [0, 32], sizes = [8, 32], strides = [1, 1]} : vector<8x96xf32> to vector<8x32xf32>
    %396 = arith.mulf %395, %365 : vector<8x32xf32>
    %397 = vector.extract_strided_slice %385 {offsets = [0, 0], sizes = [8, 32], strides = [1, 1]} : vector<8x96xf32> to vector<8x32xf32>
    %398 = arith.mulf %397, %389 : vector<8x32xf32>
    %399 = arith.addf %396, %398 : vector<8x32xf32>
    %400 = vector.extract_strided_slice %379 {offsets = [0, 64], sizes = [8, 32], strides = [1, 1]} : vector<8x96xf32> to vector<8x32xf32>
    %401 = math.tanh %394 : vector<8x32xf32>
    %402 = arith.mulf %400, %401 : vector<8x32xf32>
    %403 = vector.extract_strided_slice %385 {offsets = [0, 64], sizes = [8, 32], strides = [1, 1]} : vector<8x96xf32> to vector<8x32xf32>
    %404 = math.tanh %399 : vector<8x32xf32>
    %405 = arith.mulf %403, %404 : vector<8x32xf32>
    %406 = arith.truncf %402 : vector<8x32xf32> to vector<8x32xbf16>
    %cst_94 = arith.constant dense<0.000000e+00> : vector<8x128xf32>
    %407 = tpu.matmul %406, %360, %cst_94 {dimension_numbers = #tpu.dot_dimension_numbers<[1], [0], [0], [1], [0, 0, 1, 1], [], []>} : vector<8x32xbf16>, vector<32x128xbf16>, vector<8x128xf32> -> vector<8x128xf32>
    %408 = vector.extract_strided_slice %359 {offsets = [8, 0], sizes = [8, 128], strides = [1, 1]} : vector<64x256xf32> to vector<8x128xf32>
    %409 = arith.addf %407, %408 : vector<8x128xf32>
    %410 = arith.truncf %405 : vector<8x32xf32> to vector<8x32xbf16>
    %cst_95 = arith.constant dense<0.000000e+00> : vector<8x128xf32>
    %411 = tpu.matmul %410, %361, %cst_95 {dimension_numbers = #tpu.dot_dimension_numbers<[1], [0], [0], [1], [0, 0, 1, 1], [], []>} : vector<8x32xbf16>, vector<32x128xbf16>, vector<8x128xf32> -> vector<8x128xf32>
    %412 = vector.extract_strided_slice %359 {offsets = [48, 128], sizes = [8, 128], strides = [1, 1]} : vector<64x256xf32> to vector<8x128xf32>
    %413 = arith.addf %411, %412 : vector<8x128xf32>
    %414 = vector.extract_strided_slice %409 {offsets = [0, 0], sizes = [8, 96], strides = [1, 1]} : vector<8x128xf32> to vector<8x96xf32>
    %415 = arith.negf %414 : vector<8x96xf32>
    %416 = math.exp %415 : vector<8x96xf32>
    %cst_96 = arith.constant 1.000000e+00 : f32
    %417 = vector.broadcast %cst_96 : f32 to vector<8x96xf32>
    %418 = arith.addf %417, %416 : vector<8x96xf32>
    %419 = arith.divf %417, %418 : vector<8x96xf32>
    %420 = vector.extract_strided_slice %413 {offsets = [0, 0], sizes = [8, 96], strides = [1, 1]} : vector<8x128xf32> to vector<8x96xf32>
    %421 = arith.negf %420 : vector<8x96xf32>
    %422 = math.exp %421 : vector<8x96xf32>
    %cst_97 = arith.constant 1.000000e+00 : f32
    %423 = vector.broadcast %cst_97 : f32 to vector<8x96xf32>
    %424 = arith.addf %423, %422 : vector<8x96xf32>
    %425 = arith.divf %423, %424 : vector<8x96xf32>
    %426 = vector.extract_strided_slice %409 {offsets = [0, 96], sizes = [8, 32], strides = [1, 1]} : vector<8x128xf32> to vector<8x32xf32>
    %427 = math.tanh %426 : vector<8x32xf32>
    %428 = vector.extract_strided_slice %413 {offsets = [0, 96], sizes = [8, 32], strides = [1, 1]} : vector<8x128xf32> to vector<8x32xf32>
    %429 = math.tanh %428 : vector<8x32xf32>
    %430 = vector.extract_strided_slice %419 {offsets = [0, 32], sizes = [8, 32], strides = [1, 1]} : vector<8x96xf32> to vector<8x32xf32>
    %431 = arith.mulf %430, %394 : vector<8x32xf32>
    %432 = vector.extract_strided_slice %419 {offsets = [0, 0], sizes = [8, 32], strides = [1, 1]} : vector<8x96xf32> to vector<8x32xf32>
    %433 = arith.mulf %432, %427 : vector<8x32xf32>
    %434 = arith.addf %431, %433 : vector<8x32xf32>
    %435 = vector.extract_strided_slice %425 {offsets = [0, 32], sizes = [8, 32], strides = [1, 1]} : vector<8x96xf32> to vector<8x32xf32>
    %436 = arith.mulf %435, %399 : vector<8x32xf32>
    %437 = vector.extract_strided_slice %425 {offsets = [0, 0], sizes = [8, 32], strides = [1, 1]} : vector<8x96xf32> to vector<8x32xf32>
    %438 = arith.mulf %437, %429 : vector<8x32xf32>
    %439 = arith.addf %436, %438 : vector<8x32xf32>
    %440 = vector.extract_strided_slice %419 {offsets = [0, 64], sizes = [8, 32], strides = [1, 1]} : vector<8x96xf32> to vector<8x32xf32>
    %441 = math.tanh %434 : vector<8x32xf32>
    %442 = arith.mulf %440, %441 : vector<8x32xf32>
    %443 = vector.extract_strided_slice %425 {offsets = [0, 64], sizes = [8, 32], strides = [1, 1]} : vector<8x96xf32> to vector<8x32xf32>
    %444 = math.tanh %439 : vector<8x32xf32>
    %445 = arith.mulf %443, %444 : vector<8x32xf32>
    %446 = arith.maximumf %402, %442 : vector<8x32xf32>
    %447 = arith.maximumf %405, %445 : vector<8x32xf32>
    %448 = arith.truncf %442 : vector<8x32xf32> to vector<8x32xbf16>
    %cst_98 = arith.constant dense<0.000000e+00> : vector<8x128xf32>
    %449 = tpu.matmul %448, %360, %cst_98 {dimension_numbers = #tpu.dot_dimension_numbers<[1], [0], [0], [1], [0, 0, 1, 1], [], []>} : vector<8x32xbf16>, vector<32x128xbf16>, vector<8x128xf32> -> vector<8x128xf32>
    %450 = vector.extract_strided_slice %359 {offsets = [16, 0], sizes = [8, 128], strides = [1, 1]} : vector<64x256xf32> to vector<8x128xf32>
    %451 = arith.addf %449, %450 : vector<8x128xf32>
    %452 = arith.truncf %445 : vector<8x32xf32> to vector<8x32xbf16>
    %cst_99 = arith.constant dense<0.000000e+00> : vector<8x128xf32>
    %453 = tpu.matmul %452, %361, %cst_99 {dimension_numbers = #tpu.dot_dimension_numbers<[1], [0], [0], [1], [0, 0, 1, 1], [], []>} : vector<8x32xbf16>, vector<32x128xbf16>, vector<8x128xf32> -> vector<8x128xf32>
    %454 = vector.extract_strided_slice %359 {offsets = [40, 128], sizes = [8, 128], strides = [1, 1]} : vector<64x256xf32> to vector<8x128xf32>
    %455 = arith.addf %453, %454 : vector<8x128xf32>
    %456 = vector.extract_strided_slice %451 {offsets = [0, 0], sizes = [8, 96], strides = [1, 1]} : vector<8x128xf32> to vector<8x96xf32>
    %457 = arith.negf %456 : vector<8x96xf32>
    %458 = math.exp %457 : vector<8x96xf32>
    %cst_100 = arith.constant 1.000000e+00 : f32
    %459 = vector.broadcast %cst_100 : f32 to vector<8x96xf32>
    %460 = arith.addf %459, %458 : vector<8x96xf32>
    %461 = arith.divf %459, %460 : vector<8x96xf32>
    %462 = vector.extract_strided_slice %455 {offsets = [0, 0], sizes = [8, 96], strides = [1, 1]} : vector<8x128xf32> to vector<8x96xf32>
    %463 = arith.negf %462 : vector<8x96xf32>
    %464 = math.exp %463 : vector<8x96xf32>
    %cst_101 = arith.constant 1.000000e+00 : f32
    %465 = vector.broadcast %cst_101 : f32 to vector<8x96xf32>
    %466 = arith.addf %465, %464 : vector<8x96xf32>
    %467 = arith.divf %465, %466 : vector<8x96xf32>
    %468 = vector.extract_strided_slice %451 {offsets = [0, 96], sizes = [8, 32], strides = [1, 1]} : vector<8x128xf32> to vector<8x32xf32>
    %469 = math.tanh %468 : vector<8x32xf32>
    %470 = vector.extract_strided_slice %455 {offsets = [0, 96], sizes = [8, 32], strides = [1, 1]} : vector<8x128xf32> to vector<8x32xf32>
    %471 = math.tanh %470 : vector<8x32xf32>
    %472 = vector.extract_strided_slice %461 {offsets = [0, 32], sizes = [8, 32], strides = [1, 1]} : vector<8x96xf32> to vector<8x32xf32>
    %473 = arith.mulf %472, %434 : vector<8x32xf32>
    %474 = vector.extract_strided_slice %461 {offsets = [0, 0], sizes = [8, 32], strides = [1, 1]} : vector<8x96xf32> to vector<8x32xf32>
    %475 = arith.mulf %474, %469 : vector<8x32xf32>
    %476 = arith.addf %473, %475 : vector<8x32xf32>
    %477 = vector.extract_strided_slice %467 {offsets = [0, 32], sizes = [8, 32], strides = [1, 1]} : vector<8x96xf32> to vector<8x32xf32>
    %478 = arith.mulf %477, %439 : vector<8x32xf32>
    %479 = vector.extract_strided_slice %467 {offsets = [0, 0], sizes = [8, 32], strides = [1, 1]} : vector<8x96xf32> to vector<8x32xf32>
    %480 = arith.mulf %479, %471 : vector<8x32xf32>
    %481 = arith.addf %478, %480 : vector<8x32xf32>
    %482 = vector.extract_strided_slice %461 {offsets = [0, 64], sizes = [8, 32], strides = [1, 1]} : vector<8x96xf32> to vector<8x32xf32>
    %483 = math.tanh %476 : vector<8x32xf32>
    %484 = arith.mulf %482, %483 : vector<8x32xf32>
    %485 = vector.extract_strided_slice %467 {offsets = [0, 64], sizes = [8, 32], strides = [1, 1]} : vector<8x96xf32> to vector<8x32xf32>
    %486 = math.tanh %481 : vector<8x32xf32>
    %487 = arith.mulf %485, %486 : vector<8x32xf32>
    %488 = arith.maximumf %446, %484 : vector<8x32xf32>
    %489 = arith.maximumf %447, %487 : vector<8x32xf32>
    %490 = arith.truncf %484 : vector<8x32xf32> to vector<8x32xbf16>
    %cst_102 = arith.constant dense<0.000000e+00> : vector<8x128xf32>
    %491 = tpu.matmul %490, %360, %cst_102 {dimension_numbers = #tpu.dot_dimension_numbers<[1], [0], [0], [1], [0, 0, 1, 1], [], []>} : vector<8x32xbf16>, vector<32x128xbf16>, vector<8x128xf32> -> vector<8x128xf32>
    %492 = vector.extract_strided_slice %359 {offsets = [24, 0], sizes = [8, 128], strides = [1, 1]} : vector<64x256xf32> to vector<8x128xf32>
    %493 = arith.addf %491, %492 : vector<8x128xf32>
    %494 = arith.truncf %487 : vector<8x32xf32> to vector<8x32xbf16>
    %cst_103 = arith.constant dense<0.000000e+00> : vector<8x128xf32>
    %495 = tpu.matmul %494, %361, %cst_103 {dimension_numbers = #tpu.dot_dimension_numbers<[1], [0], [0], [1], [0, 0, 1, 1], [], []>} : vector<8x32xbf16>, vector<32x128xbf16>, vector<8x128xf32> -> vector<8x128xf32>
    %496 = vector.extract_strided_slice %359 {offsets = [32, 128], sizes = [8, 128], strides = [1, 1]} : vector<64x256xf32> to vector<8x128xf32>
    %497 = arith.addf %495, %496 : vector<8x128xf32>
    %498 = vector.extract_strided_slice %493 {offsets = [0, 0], sizes = [8, 96], strides = [1, 1]} : vector<8x128xf32> to vector<8x96xf32>
    %499 = arith.negf %498 : vector<8x96xf32>
    %500 = math.exp %499 : vector<8x96xf32>
    %cst_104 = arith.constant 1.000000e+00 : f32
    %501 = vector.broadcast %cst_104 : f32 to vector<8x96xf32>
    %502 = arith.addf %501, %500 : vector<8x96xf32>
    %503 = arith.divf %501, %502 : vector<8x96xf32>
    %504 = vector.extract_strided_slice %497 {offsets = [0, 0], sizes = [8, 96], strides = [1, 1]} : vector<8x128xf32> to vector<8x96xf32>
    %505 = arith.negf %504 : vector<8x96xf32>
    %506 = math.exp %505 : vector<8x96xf32>
    %cst_105 = arith.constant 1.000000e+00 : f32
    %507 = vector.broadcast %cst_105 : f32 to vector<8x96xf32>
    %508 = arith.addf %507, %506 : vector<8x96xf32>
    %509 = arith.divf %507, %508 : vector<8x96xf32>
    %510 = vector.extract_strided_slice %493 {offsets = [0, 96], sizes = [8, 32], strides = [1, 1]} : vector<8x128xf32> to vector<8x32xf32>
    %511 = math.tanh %510 : vector<8x32xf32>
    %512 = vector.extract_strided_slice %497 {offsets = [0, 96], sizes = [8, 32], strides = [1, 1]} : vector<8x128xf32> to vector<8x32xf32>
    %513 = math.tanh %512 : vector<8x32xf32>
    %514 = vector.extract_strided_slice %503 {offsets = [0, 32], sizes = [8, 32], strides = [1, 1]} : vector<8x96xf32> to vector<8x32xf32>
    %515 = arith.mulf %514, %476 : vector<8x32xf32>
    %516 = vector.extract_strided_slice %503 {offsets = [0, 0], sizes = [8, 32], strides = [1, 1]} : vector<8x96xf32> to vector<8x32xf32>
    %517 = arith.mulf %516, %511 : vector<8x32xf32>
    %518 = arith.addf %515, %517 : vector<8x32xf32>
    %519 = vector.extract_strided_slice %509 {offsets = [0, 32], sizes = [8, 32], strides = [1, 1]} : vector<8x96xf32> to vector<8x32xf32>
    %520 = arith.mulf %519, %481 : vector<8x32xf32>
    %521 = vector.extract_strided_slice %509 {offsets = [0, 0], sizes = [8, 32], strides = [1, 1]} : vector<8x96xf32> to vector<8x32xf32>
    %522 = arith.mulf %521, %513 : vector<8x32xf32>
    %523 = arith.addf %520, %522 : vector<8x32xf32>
    %524 = vector.extract_strided_slice %503 {offsets = [0, 64], sizes = [8, 32], strides = [1, 1]} : vector<8x96xf32> to vector<8x32xf32>
    %525 = math.tanh %518 : vector<8x32xf32>
    %526 = arith.mulf %524, %525 : vector<8x32xf32>
    %527 = vector.extract_strided_slice %509 {offsets = [0, 64], sizes = [8, 32], strides = [1, 1]} : vector<8x96xf32> to vector<8x32xf32>
    %528 = math.tanh %523 : vector<8x32xf32>
    %529 = arith.mulf %527, %528 : vector<8x32xf32>
    %530 = arith.maximumf %488, %526 : vector<8x32xf32>
    %531 = arith.maximumf %489, %529 : vector<8x32xf32>
    %532 = arith.truncf %526 : vector<8x32xf32> to vector<8x32xbf16>
    %cst_106 = arith.constant dense<0.000000e+00> : vector<8x128xf32>
    %533 = tpu.matmul %532, %360, %cst_106 {dimension_numbers = #tpu.dot_dimension_numbers<[1], [0], [0], [1], [0, 0, 1, 1], [], []>} : vector<8x32xbf16>, vector<32x128xbf16>, vector<8x128xf32> -> vector<8x128xf32>
    %534 = vector.extract_strided_slice %359 {offsets = [32, 0], sizes = [8, 128], strides = [1, 1]} : vector<64x256xf32> to vector<8x128xf32>
    %535 = arith.addf %533, %534 : vector<8x128xf32>
    %536 = arith.truncf %529 : vector<8x32xf32> to vector<8x32xbf16>
    %cst_107 = arith.constant dense<0.000000e+00> : vector<8x128xf32>
    %537 = tpu.matmul %536, %361, %cst_107 {dimension_numbers = #tpu.dot_dimension_numbers<[1], [0], [0], [1], [0, 0, 1, 1], [], []>} : vector<8x32xbf16>, vector<32x128xbf16>, vector<8x128xf32> -> vector<8x128xf32>
    %538 = vector.extract_strided_slice %359 {offsets = [24, 128], sizes = [8, 128], strides = [1, 1]} : vector<64x256xf32> to vector<8x128xf32>
    %539 = arith.addf %537, %538 : vector<8x128xf32>
    %540 = vector.extract_strided_slice %535 {offsets = [0, 0], sizes = [8, 96], strides = [1, 1]} : vector<8x128xf32> to vector<8x96xf32>
    %541 = arith.negf %540 : vector<8x96xf32>
    %542 = math.exp %541 : vector<8x96xf32>
    %cst_108 = arith.constant 1.000000e+00 : f32
    %543 = vector.broadcast %cst_108 : f32 to vector<8x96xf32>
    %544 = arith.addf %543, %542 : vector<8x96xf32>
    %545 = arith.divf %543, %544 : vector<8x96xf32>
    %546 = vector.extract_strided_slice %539 {offsets = [0, 0], sizes = [8, 96], strides = [1, 1]} : vector<8x128xf32> to vector<8x96xf32>
    %547 = arith.negf %546 : vector<8x96xf32>
    %548 = math.exp %547 : vector<8x96xf32>
    %cst_109 = arith.constant 1.000000e+00 : f32
    %549 = vector.broadcast %cst_109 : f32 to vector<8x96xf32>
    %550 = arith.addf %549, %548 : vector<8x96xf32>
    %551 = arith.divf %549, %550 : vector<8x96xf32>
    %552 = vector.extract_strided_slice %535 {offsets = [0, 96], sizes = [8, 32], strides = [1, 1]} : vector<8x128xf32> to vector<8x32xf32>
    %553 = math.tanh %552 : vector<8x32xf32>
    %554 = vector.extract_strided_slice %539 {offsets = [0, 96], sizes = [8, 32], strides = [1, 1]} : vector<8x128xf32> to vector<8x32xf32>
    %555 = math.tanh %554 : vector<8x32xf32>
    %556 = vector.extract_strided_slice %545 {offsets = [0, 32], sizes = [8, 32], strides = [1, 1]} : vector<8x96xf32> to vector<8x32xf32>
    %557 = arith.mulf %556, %518 : vector<8x32xf32>
    %558 = vector.extract_strided_slice %545 {offsets = [0, 0], sizes = [8, 32], strides = [1, 1]} : vector<8x96xf32> to vector<8x32xf32>
    %559 = arith.mulf %558, %553 : vector<8x32xf32>
    %560 = arith.addf %557, %559 : vector<8x32xf32>
    %561 = vector.extract_strided_slice %551 {offsets = [0, 32], sizes = [8, 32], strides = [1, 1]} : vector<8x96xf32> to vector<8x32xf32>
    %562 = arith.mulf %561, %523 : vector<8x32xf32>
    %563 = vector.extract_strided_slice %551 {offsets = [0, 0], sizes = [8, 32], strides = [1, 1]} : vector<8x96xf32> to vector<8x32xf32>
    %564 = arith.mulf %563, %555 : vector<8x32xf32>
    %565 = arith.addf %562, %564 : vector<8x32xf32>
    %566 = vector.extract_strided_slice %545 {offsets = [0, 64], sizes = [8, 32], strides = [1, 1]} : vector<8x96xf32> to vector<8x32xf32>
    %567 = math.tanh %560 : vector<8x32xf32>
    %568 = arith.mulf %566, %567 : vector<8x32xf32>
    %569 = vector.extract_strided_slice %551 {offsets = [0, 64], sizes = [8, 32], strides = [1, 1]} : vector<8x96xf32> to vector<8x32xf32>
    %570 = math.tanh %565 : vector<8x32xf32>
    %571 = arith.mulf %569, %570 : vector<8x32xf32>
    %572 = arith.maximumf %530, %568 : vector<8x32xf32>
    %573 = arith.maximumf %531, %571 : vector<8x32xf32>
    %574 = arith.truncf %568 : vector<8x32xf32> to vector<8x32xbf16>
    %cst_110 = arith.constant dense<0.000000e+00> : vector<8x128xf32>
    %575 = tpu.matmul %574, %360, %cst_110 {dimension_numbers = #tpu.dot_dimension_numbers<[1], [0], [0], [1], [0, 0, 1, 1], [], []>} : vector<8x32xbf16>, vector<32x128xbf16>, vector<8x128xf32> -> vector<8x128xf32>
    %576 = vector.extract_strided_slice %359 {offsets = [40, 0], sizes = [8, 128], strides = [1, 1]} : vector<64x256xf32> to vector<8x128xf32>
    %577 = arith.addf %575, %576 : vector<8x128xf32>
    %578 = arith.truncf %571 : vector<8x32xf32> to vector<8x32xbf16>
    %cst_111 = arith.constant dense<0.000000e+00> : vector<8x128xf32>
    %579 = tpu.matmul %578, %361, %cst_111 {dimension_numbers = #tpu.dot_dimension_numbers<[1], [0], [0], [1], [0, 0, 1, 1], [], []>} : vector<8x32xbf16>, vector<32x128xbf16>, vector<8x128xf32> -> vector<8x128xf32>
    %580 = vector.extract_strided_slice %359 {offsets = [16, 128], sizes = [8, 128], strides = [1, 1]} : vector<64x256xf32> to vector<8x128xf32>
    %581 = arith.addf %579, %580 : vector<8x128xf32>
    %582 = vector.extract_strided_slice %577 {offsets = [0, 0], sizes = [8, 96], strides = [1, 1]} : vector<8x128xf32> to vector<8x96xf32>
    %583 = arith.negf %582 : vector<8x96xf32>
    %584 = math.exp %583 : vector<8x96xf32>
    %cst_112 = arith.constant 1.000000e+00 : f32
    %585 = vector.broadcast %cst_112 : f32 to vector<8x96xf32>
    %586 = arith.addf %585, %584 : vector<8x96xf32>
    %587 = arith.divf %585, %586 : vector<8x96xf32>
    %588 = vector.extract_strided_slice %581 {offsets = [0, 0], sizes = [8, 96], strides = [1, 1]} : vector<8x128xf32> to vector<8x96xf32>
    %589 = arith.negf %588 : vector<8x96xf32>
    %590 = math.exp %589 : vector<8x96xf32>
    %cst_113 = arith.constant 1.000000e+00 : f32
    %591 = vector.broadcast %cst_113 : f32 to vector<8x96xf32>
    %592 = arith.addf %591, %590 : vector<8x96xf32>
    %593 = arith.divf %591, %592 : vector<8x96xf32>
    %594 = vector.extract_strided_slice %577 {offsets = [0, 96], sizes = [8, 32], strides = [1, 1]} : vector<8x128xf32> to vector<8x32xf32>
    %595 = math.tanh %594 : vector<8x32xf32>
    %596 = vector.extract_strided_slice %581 {offsets = [0, 96], sizes = [8, 32], strides = [1, 1]} : vector<8x128xf32> to vector<8x32xf32>
    %597 = math.tanh %596 : vector<8x32xf32>
    %598 = vector.extract_strided_slice %587 {offsets = [0, 32], sizes = [8, 32], strides = [1, 1]} : vector<8x96xf32> to vector<8x32xf32>
    %599 = arith.mulf %598, %560 : vector<8x32xf32>
    %600 = vector.extract_strided_slice %587 {offsets = [0, 0], sizes = [8, 32], strides = [1, 1]} : vector<8x96xf32> to vector<8x32xf32>
    %601 = arith.mulf %600, %595 : vector<8x32xf32>
    %602 = arith.addf %599, %601 : vector<8x32xf32>
    %603 = vector.extract_strided_slice %593 {offsets = [0, 32], sizes = [8, 32], strides = [1, 1]} : vector<8x96xf32> to vector<8x32xf32>
    %604 = arith.mulf %603, %565 : vector<8x32xf32>
    %605 = vector.extract_strided_slice %593 {offsets = [0, 0], sizes = [8, 32], strides = [1, 1]} : vector<8x96xf32> to vector<8x32xf32>
    %606 = arith.mulf %605, %597 : vector<8x32xf32>
    %607 = arith.addf %604, %606 : vector<8x32xf32>
    %608 = vector.extract_strided_slice %587 {offsets = [0, 64], sizes = [8, 32], strides = [1, 1]} : vector<8x96xf32> to vector<8x32xf32>
    %609 = math.tanh %602 : vector<8x32xf32>
    %610 = arith.mulf %608, %609 : vector<8x32xf32>
    %611 = vector.extract_strided_slice %593 {offsets = [0, 64], sizes = [8, 32], strides = [1, 1]} : vector<8x96xf32> to vector<8x32xf32>
    %612 = math.tanh %607 : vector<8x32xf32>
    %613 = arith.mulf %611, %612 : vector<8x32xf32>
    %614 = arith.maximumf %572, %610 : vector<8x32xf32>
    %615 = arith.maximumf %573, %613 : vector<8x32xf32>
    %616 = arith.truncf %610 : vector<8x32xf32> to vector<8x32xbf16>
    %cst_114 = arith.constant dense<0.000000e+00> : vector<8x128xf32>
    %617 = tpu.matmul %616, %360, %cst_114 {dimension_numbers = #tpu.dot_dimension_numbers<[1], [0], [0], [1], [0, 0, 1, 1], [], []>} : vector<8x32xbf16>, vector<32x128xbf16>, vector<8x128xf32> -> vector<8x128xf32>
    %618 = vector.extract_strided_slice %359 {offsets = [48, 0], sizes = [8, 128], strides = [1, 1]} : vector<64x256xf32> to vector<8x128xf32>
    %619 = arith.addf %617, %618 : vector<8x128xf32>
    %620 = arith.truncf %613 : vector<8x32xf32> to vector<8x32xbf16>
    %cst_115 = arith.constant dense<0.000000e+00> : vector<8x128xf32>
    %621 = tpu.matmul %620, %361, %cst_115 {dimension_numbers = #tpu.dot_dimension_numbers<[1], [0], [0], [1], [0, 0, 1, 1], [], []>} : vector<8x32xbf16>, vector<32x128xbf16>, vector<8x128xf32> -> vector<8x128xf32>
    %622 = vector.extract_strided_slice %359 {offsets = [8, 128], sizes = [8, 128], strides = [1, 1]} : vector<64x256xf32> to vector<8x128xf32>
    %623 = arith.addf %621, %622 : vector<8x128xf32>
    %624 = vector.extract_strided_slice %619 {offsets = [0, 0], sizes = [8, 96], strides = [1, 1]} : vector<8x128xf32> to vector<8x96xf32>
    %625 = arith.negf %624 : vector<8x96xf32>
    %626 = math.exp %625 : vector<8x96xf32>
    %cst_116 = arith.constant 1.000000e+00 : f32
    %627 = vector.broadcast %cst_116 : f32 to vector<8x96xf32>
    %628 = arith.addf %627, %626 : vector<8x96xf32>
    %629 = arith.divf %627, %628 : vector<8x96xf32>
    %630 = vector.extract_strided_slice %623 {offsets = [0, 0], sizes = [8, 96], strides = [1, 1]} : vector<8x128xf32> to vector<8x96xf32>
    %631 = arith.negf %630 : vector<8x96xf32>
    %632 = math.exp %631 : vector<8x96xf32>
    %cst_117 = arith.constant 1.000000e+00 : f32
    %633 = vector.broadcast %cst_117 : f32 to vector<8x96xf32>
    %634 = arith.addf %633, %632 : vector<8x96xf32>
    %635 = arith.divf %633, %634 : vector<8x96xf32>
    %636 = vector.extract_strided_slice %619 {offsets = [0, 96], sizes = [8, 32], strides = [1, 1]} : vector<8x128xf32> to vector<8x32xf32>
    %637 = math.tanh %636 : vector<8x32xf32>
    %638 = vector.extract_strided_slice %623 {offsets = [0, 96], sizes = [8, 32], strides = [1, 1]} : vector<8x128xf32> to vector<8x32xf32>
    %639 = math.tanh %638 : vector<8x32xf32>
    %640 = vector.extract_strided_slice %629 {offsets = [0, 32], sizes = [8, 32], strides = [1, 1]} : vector<8x96xf32> to vector<8x32xf32>
    %641 = arith.mulf %640, %602 : vector<8x32xf32>
    %642 = vector.extract_strided_slice %629 {offsets = [0, 0], sizes = [8, 32], strides = [1, 1]} : vector<8x96xf32> to vector<8x32xf32>
    %643 = arith.mulf %642, %637 : vector<8x32xf32>
    %644 = arith.addf %641, %643 : vector<8x32xf32>
    %645 = vector.extract_strided_slice %635 {offsets = [0, 32], sizes = [8, 32], strides = [1, 1]} : vector<8x96xf32> to vector<8x32xf32>
    %646 = arith.mulf %645, %607 : vector<8x32xf32>
    %647 = vector.extract_strided_slice %635 {offsets = [0, 0], sizes = [8, 32], strides = [1, 1]} : vector<8x96xf32> to vector<8x32xf32>
    %648 = arith.mulf %647, %639 : vector<8x32xf32>
    %649 = arith.addf %646, %648 : vector<8x32xf32>
    %650 = vector.extract_strided_slice %629 {offsets = [0, 64], sizes = [8, 32], strides = [1, 1]} : vector<8x96xf32> to vector<8x32xf32>
    %651 = math.tanh %644 : vector<8x32xf32>
    %652 = arith.mulf %650, %651 : vector<8x32xf32>
    %653 = vector.extract_strided_slice %635 {offsets = [0, 64], sizes = [8, 32], strides = [1, 1]} : vector<8x96xf32> to vector<8x32xf32>
    %654 = math.tanh %649 : vector<8x32xf32>
    %655 = arith.mulf %653, %654 : vector<8x32xf32>
    %656 = arith.maximumf %614, %652 : vector<8x32xf32>
    %657 = arith.maximumf %615, %655 : vector<8x32xf32>
    %658 = arith.truncf %652 : vector<8x32xf32> to vector<8x32xbf16>
    %cst_118 = arith.constant dense<0.000000e+00> : vector<8x128xf32>
    %659 = tpu.matmul %658, %360, %cst_118 {dimension_numbers = #tpu.dot_dimension_numbers<[1], [0], [0], [1], [0, 0, 1, 1], [], []>} : vector<8x32xbf16>, vector<32x128xbf16>, vector<8x128xf32> -> vector<8x128xf32>
    %660 = vector.extract_strided_slice %359 {offsets = [56, 0], sizes = [8, 128], strides = [1, 1]} : vector<64x256xf32> to vector<8x128xf32>
    %661 = arith.addf %659, %660 : vector<8x128xf32>
    %662 = arith.truncf %655 : vector<8x32xf32> to vector<8x32xbf16>
    %cst_119 = arith.constant dense<0.000000e+00> : vector<8x128xf32>
    %663 = tpu.matmul %662, %361, %cst_119 {dimension_numbers = #tpu.dot_dimension_numbers<[1], [0], [0], [1], [0, 0, 1, 1], [], []>} : vector<8x32xbf16>, vector<32x128xbf16>, vector<8x128xf32> -> vector<8x128xf32>
    %664 = vector.extract_strided_slice %359 {offsets = [0, 128], sizes = [8, 128], strides = [1, 1]} : vector<64x256xf32> to vector<8x128xf32>
    %665 = arith.addf %663, %664 : vector<8x128xf32>
    %666 = vector.extract_strided_slice %661 {offsets = [0, 0], sizes = [8, 96], strides = [1, 1]} : vector<8x128xf32> to vector<8x96xf32>
    %667 = arith.negf %666 : vector<8x96xf32>
    %668 = math.exp %667 : vector<8x96xf32>
    %cst_120 = arith.constant 1.000000e+00 : f32
    %669 = vector.broadcast %cst_120 : f32 to vector<8x96xf32>
    %670 = arith.addf %669, %668 : vector<8x96xf32>
    %671 = arith.divf %669, %670 : vector<8x96xf32>
    %672 = vector.extract_strided_slice %665 {offsets = [0, 0], sizes = [8, 96], strides = [1, 1]} : vector<8x128xf32> to vector<8x96xf32>
    %673 = arith.negf %672 : vector<8x96xf32>
    %674 = math.exp %673 : vector<8x96xf32>
    %cst_121 = arith.constant 1.000000e+00 : f32
    %675 = vector.broadcast %cst_121 : f32 to vector<8x96xf32>
    %676 = arith.addf %675, %674 : vector<8x96xf32>
    %677 = arith.divf %675, %676 : vector<8x96xf32>
    %678 = vector.extract_strided_slice %661 {offsets = [0, 96], sizes = [8, 32], strides = [1, 1]} : vector<8x128xf32> to vector<8x32xf32>
    %679 = math.tanh %678 : vector<8x32xf32>
    %680 = vector.extract_strided_slice %665 {offsets = [0, 96], sizes = [8, 32], strides = [1, 1]} : vector<8x128xf32> to vector<8x32xf32>
    %681 = math.tanh %680 : vector<8x32xf32>
    %682 = vector.extract_strided_slice %671 {offsets = [0, 32], sizes = [8, 32], strides = [1, 1]} : vector<8x96xf32> to vector<8x32xf32>
    %683 = arith.mulf %682, %644 : vector<8x32xf32>
    %684 = vector.extract_strided_slice %671 {offsets = [0, 0], sizes = [8, 32], strides = [1, 1]} : vector<8x96xf32> to vector<8x32xf32>
    %685 = arith.mulf %684, %679 : vector<8x32xf32>
    %686 = arith.addf %683, %685 : vector<8x32xf32>
    %687 = vector.extract_strided_slice %677 {offsets = [0, 32], sizes = [8, 32], strides = [1, 1]} : vector<8x96xf32> to vector<8x32xf32>
    %688 = arith.mulf %687, %649 : vector<8x32xf32>
    %689 = vector.extract_strided_slice %677 {offsets = [0, 0], sizes = [8, 32], strides = [1, 1]} : vector<8x96xf32> to vector<8x32xf32>
    %690 = arith.mulf %689, %681 : vector<8x32xf32>
    %691 = arith.addf %688, %690 : vector<8x32xf32>
    %692 = vector.extract_strided_slice %671 {offsets = [0, 64], sizes = [8, 32], strides = [1, 1]} : vector<8x96xf32> to vector<8x32xf32>
    %693 = math.tanh %686 : vector<8x32xf32>
    %694 = arith.mulf %692, %693 : vector<8x32xf32>
    %695 = vector.extract_strided_slice %677 {offsets = [0, 64], sizes = [8, 32], strides = [1, 1]} : vector<8x96xf32> to vector<8x32xf32>
    %696 = math.tanh %691 : vector<8x32xf32>
    %697 = arith.mulf %695, %696 : vector<8x32xf32>
    %698 = arith.maximumf %656, %694 : vector<8x32xf32>
    %699 = arith.maximumf %657, %697 : vector<8x32xf32>
    %700 = arith.truncf %698 : vector<8x32xf32> to vector<8x32xbf16>
    %c0_122 = arith.constant 0 : index
    %c0_123 = arith.constant 0 : index
    %701 = vector.load %arg10[%c0_122, %c0_123] : memref<32x4xbf16, #tpu.memory_space<vmem>>, vector<32x4xbf16>
    %cst_124 = arith.constant dense<0.000000e+00> : vector<8x4xf32>
    %702 = tpu.matmul %700, %701, %cst_124 {dimension_numbers = #tpu.dot_dimension_numbers<[1], [0], [0], [1], [0, 0, 1, 1], [], []>} : vector<8x32xbf16>, vector<32x4xbf16>, vector<8x4xf32> -> vector<8x4xf32>
    %703 = arith.truncf %699 : vector<8x32xf32> to vector<8x32xbf16>
    %c0_125 = arith.constant 0 : index
    %c0_126 = arith.constant 0 : index
    %704 = vector.load %arg11[%c0_125, %c0_126] : memref<32x4xbf16, #tpu.memory_space<vmem>>, vector<32x4xbf16>
    %cst_127 = arith.constant dense<0.000000e+00> : vector<8x4xf32>
    %705 = tpu.matmul %703, %704, %cst_127 {dimension_numbers = #tpu.dot_dimension_numbers<[1], [0], [0], [1], [0, 0, 1, 1], [], []>} : vector<8x32xbf16>, vector<32x4xbf16>, vector<8x4xf32> -> vector<8x4xf32>
    %706 = arith.addf %702, %705 : vector<8x4xf32>
    %c0_128 = arith.constant 0 : index
    %c0_129 = arith.constant 0 : index
    %707 = vector.load %arg12[%c0_128, %c0_129] : memref<1x4xf32, #tpu.memory_space<vmem>>, vector<1x4xf32>
    %708 = vector.broadcast %707 : vector<1x4xf32> to vector<8x4xf32>
    %709 = arith.addf %706, %708 : vector<8x4xf32>
    %c0_130 = arith.constant 0 : index
    %c0_131 = arith.constant 0 : index
    %710 = vector.load %arg13[%c0_130, %c0_131] : memref<8x4xf32, #tpu.memory_space<vmem>>, vector<8x4xf32>
    tpu.vector_store %arg13[%c0_130, %c0_131], %709 {strides = array<i32>} : memref<8x4xf32, #tpu.memory_space<vmem>>, vector<8x4xf32>,
    return
  }
  func.func @transform_0(%arg0: i32) -> (i32, i32) {
    %c0_i32 = arith.constant 0 : i32
    %c0_i32_0 = arith.constant 0 : i32
    return %arg0, %c0_i32 : i32, i32
  }
  func.func @transform_1(%arg0: i32) -> (i32, i32) {
    %c0_i32 = arith.constant 0 : i32
    %c0_i32_0 = arith.constant 0 : i32
    %c0_i32_1 = arith.constant 0 : i32
    return %c0_i32, %c0_i32_0 : i32, i32
  }
  func.func @transform_2(%arg0: i32) -> (i32, i32) {
    %c0_i32 = arith.constant 0 : i32
    %c0_i32_0 = arith.constant 0 : i32
    %c0_i32_1 = arith.constant 0 : i32
    return %c0_i32, %c0_i32_0 : i32, i32
  }
  func.func @transform_3(%arg0: i32) -> (i32, i32) {
    %c0_i32 = arith.constant 0 : i32
    %c0_i32_0 = arith.constant 0 : i32
    %c0_i32_1 = arith.constant 0 : i32
    return %c0_i32, %c0_i32_0 : i32, i32
  }
  func.func @transform_4(%arg0: i32) -> (i32, i32) {
    %c0_i32 = arith.constant 0 : i32
    %c0_i32_0 = arith.constant 0 : i32
    %c0_i32_1 = arith.constant 0 : i32
    return %c0_i32, %c0_i32_0 : i32, i32
  }
  func.func @transform_5(%arg0: i32) -> (i32, i32) {
    %c0_i32 = arith.constant 0 : i32
    %c0_i32_0 = arith.constant 0 : i32
    %c0_i32_1 = arith.constant 0 : i32
    return %c0_i32, %c0_i32_0 : i32, i32
  }
  func.func @transform_6(%arg0: i32) -> (i32, i32) {
    %c0_i32 = arith.constant 0 : i32
    %c0_i32_0 = arith.constant 0 : i32
    %c0_i32_1 = arith.constant 0 : i32
    return %c0_i32, %c0_i32_0 : i32, i32
  }
  func.func @transform_7(%arg0: i32) -> (i32, i32) {
    %c0_i32 = arith.constant 0 : i32
    %c0_i32_0 = arith.constant 0 : i32
    %c0_i32_1 = arith.constant 0 : i32
    return %c0_i32, %c0_i32_0 : i32, i32
  }
  func.func @transform_8(%arg0: i32) -> (i32, i32) {
    %c0_i32 = arith.constant 0 : i32
    %c0_i32_0 = arith.constant 0 : i32
    %c0_i32_1 = arith.constant 0 : i32
    return %c0_i32, %c0_i32_0 : i32, i32
  }
  func.func @transform_9(%arg0: i32) -> (i32, i32) {
    %c0_i32 = arith.constant 0 : i32
    %c0_i32_0 = arith.constant 0 : i32
    %c0_i32_1 = arith.constant 0 : i32
    return %c0_i32, %c0_i32_0 : i32, i32
  }
  func.func @transform_10(%arg0: i32) -> (i32, i32) {
    %c0_i32 = arith.constant 0 : i32
    %c0_i32_0 = arith.constant 0 : i32
    %c0_i32_1 = arith.constant 0 : i32
    return %c0_i32, %c0_i32_0 : i32, i32
  }
  func.func @transform_11(%arg0: i32) -> (i32, i32) {
    %c0_i32 = arith.constant 0 : i32
    %c0_i32_0 = arith.constant 0 : i32
    %c0_i32_1 = arith.constant 0 : i32
    return %c0_i32, %c0_i32_0 : i32, i32
  }
  func.func @transform_12(%arg0: i32) -> (i32, i32) {
    %c0_i32 = arith.constant 0 : i32
    %c0_i32_0 = arith.constant 0 : i32
    return %arg0, %c0_i32 : i32, i32
  }
}

</mosaic_0001>

<bundles_post_ra>
// kernel: stacked_birnn_forward.1
= control target key start
LH: loop header
LB: loop body
LE: loop exit
PB: predicated region body
PF: predicated region fallthrough
CT: control target
= control target key end

     0   :  { %v3783_v0 = vmov 0.0   ;;  %v3784_v2 = vmov 0   ;;  %vm3785_vm0 = vmmov 0   ;;  %vm94_vm1 = vcmask 130048   ;;  %s4715_s1 = inlined_call_operand.vmem [shape: bf16[16,256], index: 1, kind: input, shape index: {}]   ;;  %s4716_s2 = inlined_call_operand.vmem [shape: bf16[32,128], index: 2, kind: input, shape index: {}]   ;;  %s4717_s0 = inlined_call_operand.vmem [shape: bf16[64,16], index: 0, kind: input, shape index: {}]   ;;  %s4718_s3 = inlined_call_operand.vmem [shape: bf16[32,128], index: 3, kind: input, shape index: {}]   ;;  %s4719_s4 = inlined_call_operand.vmem [shape: f32[1,256], index: 4, kind: input, shape index: {}]   ;;  %s4720_s5 = inlined_call_operand.vmem [shape: bf16[64,256], index: 5, kind: input, shape index: {}]   ;;  %s4721_s6 = inlined_call_operand.vmem [shape: bf16[32,128], index: 6, kind: input, shape index: {}]   ;;  %s4722_s7 = inlined_call_operand.vmem [shape: bf16[32,128], index: 7, kind: input, shape index: {}]   ;;  %s4723_s8 = inlined_call_operand.vmem [shape: f32[1,256], index: 8, kind: input, shape index: {}]   ;;  %s4724_s9 = inlined_call_operand.vmem [shape: bf16[32,4], index: 9, kind: input, shape index: {}]   ;;  %s4725_s10 = inlined_call_operand.vmem [shape: bf16[32,4], index: 10, kind: input, shape index: {}]   ;;  %s4726_s11 = inlined_call_operand.vmem [shape: f32[1,4], index: 11, kind: input, shape index: {}]   ;;  %s4727_s12 = inlined_call_operand.vmem [shape: f32[8,4], index: 12, kind: output, shape index: {}]  }
   0x1   :  { %3199 = vmatprep.subr.bf16.mxu1 %v3783_v0  ;;  %v3492_v1 = vld [vmem:[%s4715_s1 + $0x4] ss:$8 sps:$4 sm:$0xff]   ;;  %139 = vmatprep.mubr.bf16.mxu0 %v3784_v2  ;;  %v3495_v4 = vld [vmem:[%s4715_s1] ss:$8 sps:$4 sm:$0xff]   ;;  %v3499_v10 = vld [vmem:[%s4717_s0 + $0x10] sm:$0xff]   ;;  %v54_v12 = vlaneseq  ;;  %vm200_vm2 = vcmask 261120  }
   0x2   :  { %v3861_v3 = vld [vmem:[%s4716_s2] sm:$0xff]   ;;  %3203 = vmatprep.mubr.msk.bf16.mxu1 %vm3785_vm0, %v3783_v0  ;;  %107 = vmatprep.subr.bf16.mxu0 %v3492_v1  ;;  %v3876_v6 = vld [vmem:[%s4716_s2 + $0x8] sm:$0xff]   ;;  %v3502_v11 = vld [vmem:[%s4717_s0 + $0x18] sm:$0xff]   ;;  %vm2990_vm3 = vcmask 31744  }
   0x3   :  { %3200 = vmatpush3.bf16.msra.mxu1 %v3861_v3  ;;  %v3496_v5 = vld [vmem:[%s4717_s0] sm:$0xff]   ;;  %108 = vmatpush1.bf16.msra.mxu0 %v3495_v4  ;;  %v3498_v8 = vld [vmem:[%s4717_s0 + $0x8] sm:$0xff]   ;;  %v3927_v13 = vshrl.u32 %v54_v12, 7  ;;  %s3786_s0 = smov 32  }
   0x4   :  { %3201 = vmatprep.subr.bf16.mxu1 %v3783_v0  ;;  %3231 = vmatprep.subr.bf16.mxu0 %v3783_v0  ;;  %v3884_v7 = vld [vmem:[%s4718_s3] sm:$0xff]   ;;  %v3898_v9 = vld [vmem:[%s4718_s3 + $0x8] sm:$0xff]  }
   0x5   :  { %v56_v14 = vsub.s32 0, %v3927_v13  ;;  %v52_v15 = vld [vmem:[%s4719_s4] sm:$0x3]  ;;  %v60_v16 = vsub.s32 1, %v3927_v13  ;;  %s3787_s4 = smov 64  }
   0x6   :  { %3002 = vmatmul.mubr.msk.bf16.vlgmr.msra.gmra.mrb[0].mxu0 %vm94_vm1, %v3496_v5 }
   0x7   :  { %3202 = vmatpush3.bf16.msra.mxu1 %v3876_v6  ;;  %149 = vmatprep.mubr.bf16.mxu0 %v3784_v2  ;;  %v57_v17 = vrot.slane %v52_v15, %v56_v14  ;;  %v61_v18 = vrot.slane %v52_v15, %v60_v16 }
   0x8   :  { %3207 = vmatprep.subr.bf16.mxu1 %v3783_v0  ;;  %3232 = vmatpush3.bf16.msra.mxu0 %v3861_v3 }
   0x9   :  { %3233 = vmatprep.subr.bf16.mxu0 %v3783_v0 }
   0xa   :  { %3204 = vmatmul.mubr.bf16.vlgmr.msra.gmra.mrb[0].mxu1 %v3784_v2 }
   0xb   :  { %3208 = vmatpush3.bf16.msra.mxu1 %v3884_v7  ;;  %3211 = vmatprep.mubr.msk.bf16.mxu1 %vm3785_vm0, %v3783_v0 }
   0xc   :  { %3209 = vmatprep.subr.bf16.mxu1 %v3783_v0  ;;  %3234 = vmatpush3.bf16.msra.mxu0 %v3876_v6 }
   0xd   :  { %3247 = vmatprep.subr.bf16.mxu0 %v3783_v0 }
   0xe   :  { %3003 = vmatmul.mubr.msk.bf16.gmra.mrb[4].mxu0 %vm94_vm1, %v3498_v8 }
   0xf   :  { %3210 = vmatpush3.bf16.msra.mxu1 %v3898_v9  ;;  %159 = vmatprep.mubr.bf16.mxu0 %v3784_v2 }
  0x10   :  { %3215 = vmatprep.subr.bf16.mxu1 %v3783_v0 }
  0x12   :  { %3212 = vmatmul.mubr.bf16.vlgmr.msra.gmra.mrb[4].mxu1 %v3784_v2 }
  0x13   :  { %3216 = vmatpush3.bf16.msra.mxu1 %v3861_v3  ;;  %3219 = vmatprep.mubr.msk.bf16.mxu1 %vm3785_vm0, %v3783_v0 }
  0x14   :  { %3217 = vmatprep.subr.bf16.mxu1 %v3783_v0 }
  0x16   :  { %3004 = vmatmul.mubr.msk.bf16.gmra.mrb[8].mxu0 %vm94_vm1, %v3499_v10 }
  0x17   :  { %3218 = vmatpush3.bf16.msra.mxu1 %v3876_v6  ;;  %169 = vmatprep.mubr.bf16.mxu0 %v3784_v2 }
  0x18   :  { %3223 = vmatprep.subr.bf16.mxu1 %v3783_v0 }
  0x1e   :  { %3005 = vmatmul.mubr.msk.bf16.gmra.mrb[12].mxu0 %vm94_vm1, %v3502_v11 }
  0x1f   :  { %3235 = vmatprep.mubr.msk.bf16.mxu0 %vm3785_vm0, %v3783_v0 }
  0xd9   :  { %v141_v19 = vpop.f32.mrb[0].mxu0 }
  0xda   :  { %v142_v20 = vadd.f32 %v141_v19, %v57_v17  ;;  %v143_v21 = vpop.f32.mrb[1].mxu0 }
  0xdb   :  { %v3938_v22 = vadd.f32 %v143_v21, %v61_v18  ;;  %v145_v23 = vpop.f32.mrb[2].mxu0 }
  0xdc   :  { %v3940_v24 = vadd.f32 %v145_v23, %v57_v17  ;;  %v147_v25 = vpop.f32.mrb[3].mxu0 }
  0xdd   :  { %v238_v26 = vpop.f32.mrb[0].mxu1  ;;  %v3942_v27 = vadd.f32 %v147_v25, %v61_v18 }
  0xde   :  { %v239_v28 = vadd.f32 %v238_v26, %v142_v20  ;;  %v3205_v29 = vpop.f32.mrb[1].mxu1 }
  0xdf   :  { %v241_v30 = vpop.f32.mrb[2].mxu1 }
  0xe0   :  { %3523 = vtanh.f32 %v239_v28  ;;  %v3206_v31 = vpop.f32.mrb[3].mxu1  ;;  %v3010_v63 = vmul.f32 -1.442695, %v239_v28 }
  0xe1   :  { %v151_v32 = vpop.f32.mrb[4].mxu0 }
  0xe2   :  { %v3944_v33 = vadd.f32 %v151_v32, %v57_v17  ;;  %v153_v34 = vpop.f32.mrb[5].mxu0 }
  0xe3   :  { %v3946_v35 = vadd.f32 %v153_v34, %v61_v18  ;;  %v155_v36 = vpop.f32.mrb[6].mxu0 }
  0xe4   :  { %v3948_v37 = vadd.f32 %v155_v36, %v57_v17  ;;  %v157_v38 = vpop.f32.mrb[7].mxu0 }
  0xe5   :  { %v290_v39 = vpop.f32.mrb[4].mxu1  ;;  %v3950_v40 = vadd.f32 %v157_v38, %v61_v18 }
  0xe6   :  { %v3213_v41 = vpop.f32.mrb[5].mxu1 }
  0xe7   :  { %v293_v42 = vpop.f32.mrb[6].mxu1 }
  0xe8   :  { %v3214_v43 = vpop.f32.mrb[7].mxu1 }
  0xe9   :  { %v161_v45 = vpop.f32.mrb[8].mxu0 }
  0xea   :  { %v3524_v44 = vpop.eup %3523  ;;  %v3952_v46 = vadd.f32 %v161_v45, %v57_v17  ;;  %v163_v47 = vpop.f32.mrb[9].mxu0 }
  0xeb   :  { %312 = vrot.lane.b32.xlu0 %v3524_v44, %s3786_s0  ;;  %v3955_v48 = vadd.f32 %v163_v47, %v61_v18  ;;  %v165_v49 = vpop.f32.mrb[10].mxu0 }
  0xec   :  { %v3957_v50 = vadd.f32 %v165_v49, %v57_v17  ;;  %v167_v51 = vpop.f32.mrb[11].mxu0 }
  0xed   :  { %v3959_v52 = vadd.f32 %v167_v51, %v61_v18 }
  0xf1   :  { %v171_v53 = vpop.f32.mrb[12].mxu0 }
  0xf2   :  { %v3961_v54 = vadd.f32 %v171_v53, %v57_v17  ;;  %v173_v55 = vpop.f32.mrb[13].mxu0 }
  0xf3   :  { %v3963_v56 = vadd.f32 %v173_v55, %v61_v18  ;;  %v175_v57 = vpop.f32.mrb[14].mxu0 }
  0xf4   :  { %v3965_v58 = vadd.f32 %v175_v57, %v57_v17  ;;  %v177_v59 = vpop.f32.mrb[15].mxu0 }
  0xf5   :  { %v178_v60 = vadd.f32 %v177_v59, %v61_v18 }
  0xf7   :  { %v291_v61 = vadd.f32 %v290_v39, %v178_v60 }
  0xf9   :  { %3525 = vtanh.f32 %v291_v61  ;;  %v3011_v5 = vmul.f32 -1.442695, %v291_v61 }
  0xfa   :  { %3527 = vpow2.f32 %v3010_v63 }
 0x103   :  { %v3526_v62 = vpop.eup %3525 }
 0x104   :  { %323 = vrot.lane.b32.xlu0 %v3526_v62, %s3786_s0  ;;  %v3528_v1 = vpop.eup %3527 }
 0x105   :  { %v299_v4 = vadd.f32 1.0, %v3528_v1 }
 0x107   :  { %3529 = vrcp.f32 %v299_v4 }
 0x108   :  { %3531 = vpow2.f32 %v3011_v5 }
 0x111   :  { %v3530_v8 = vpop.eup %3529 }
 0x112   :  { %v3532_v12 = vpop.eup %3531  ;;  %v310_v20 = vmul.f32 0.0, %v3530_v8 }
 0x113   :  { %v305_v15 = vadd.f32 1.0, %v3532_v12 }
 0x115   :  { %3533 = vrcp.f32 %v305_v15 }
 0x11f   :  { %v3534_v17 = vpop.eup %3533 }
 0x120   :  { %v321_v26 = vmul.f32 0.0, %v3534_v17 }
 0x15d   :  { %v313_v10 = vpop.permute.xlu0 %312 }
 0x15e   :  { %v315_v11 = vmul.f32 %v3530_v8, %v313_v10 }
 0x160   :  { %317 = vrot.lane.b32.xlu1 %v315_v11, %s3786_s0 }
 0x176   :  { %v324_v18 = vpop.permute.xlu0 %323 }
 0x177   :  { %v326_v19 = vmul.f32 %v3534_v17, %v324_v18 }
 0x179   :  { %328 = vrot.lane.b32.xlu1 %v326_v19, %s3786_s0 }
 0x1d2   :  { %v318_v21 = vpop.permute.xlu1 %317 }
 0x1d3   :  { %v3970_v23 = vadd.f32 %v318_v21, %v310_v20 }
 0x1d5   :  { %3535 = vtanh.f32 %v3970_v23 }
 0x1df   :  { %v3536_v25 = vpop.eup %3535 }
 0x1e0   :  { %334 = vrot.lane.b32.xlu0 %v3536_v25, %s3786_s0 }
 0x1eb   :  { %v329_v28 = vpop.permute.xlu1 %328 }
 0x1ec   :  { %v3974_v29 = vadd.f32 %v329_v28, %v321_v26 }
 0x1ee   :  { %3537 = vtanh.f32 %v3974_v29 }
 0x1f8   :  { %v3538_v30 = vpop.eup %3537 }
 0x1f9   :  { %340 = vrot.lane.b32.xlu1 %v3538_v30, %s3786_s0 }
 0x252   :  { %v335_v31 = vpop.permute.xlu0 %334 }
 0x253   :  { %v3978_v32 = vmul.f32 %v3530_v8, %v335_v31 }
 0x255   :  { %v354_v34 = vpack.c.bf16 %v3978_v32, %v3978_v32 }
 0x257   :  { %356 = vrot.lane.b32.xlu0 %v354_v34, %s3787_s4 }
 0x26b   :  { %v341_v36 = vpop.permute.xlu1 %340 }
 0x26c   :  { %v3983_v38 = vmul.f32 %v3534_v17, %v341_v36 }
 0x26e   :  { %v401_v39 = vpack.c.bf16 %v3983_v38, %v3983_v38 }
 0x270   :  { %403 = vrot.lane.b32.xlu1 %v401_v39, %s3787_s4 }
 0x2c9   :  { %v357_v41 = vpop.permute.xlu0 %356 }
 0x2ca   :  { %3220 = vmatmul.mubr.msk.bf16.vlgmr.msra.gmra.mrb[8].mxu1 %vm200_vm2, %v357_v41 }
 0x2cb   :  { %3224 = vmatpush3.bf16.msra.mxu1 %v3884_v7  ;;  %3227 = vmatprep.mubr.msk.bf16.mxu1 %vm3785_vm0, %v3783_v0 }
 0x2cc   :  { %3225 = vmatprep.subr.bf16.mxu1 %v3783_v0 }
 0x2cf   :  { %3226 = vmatpush3.bf16.msra.mxu1 %v3898_v9 }
 0x2d0   :  { %3239 = vmatprep.subr.bf16.mxu1 %v3783_v0 }
 0x2e2   :  { %v404_v42 = vpop.permute.xlu1 %403 }
 0x2e3   :  { %3228 = vmatmul.mubr.msk.bf16.vlgmr.msra.gmra.mrb[12].mxu1 %vm200_vm2, %v404_v42 }
 0x2e4   :  { %3240 = vmatpush3.bf16.msra.mxu1 %v3884_v7  ;;  %3243 = vmatprep.mubr.msk.bf16.mxu1 %vm3785_vm0, %v3783_v0 }
 0x2e5   :  { %3241 = vmatprep.subr.bf16.mxu1 %v3783_v0 }
 0x2e8   :  { %3242 = vmatpush3.bf16.msra.mxu1 %v3898_v9 }
 0x2e9   :  { %3255 = vmatprep.subr.bf16.mxu1 %v3783_v0 }
 0x39d   :  { %v395_v43 = vpop.f32.mrb[8].mxu1 }
 0x39e   :  { %v396_v44 = vadd.f32 %v395_v43, %v3940_v24  ;;  %v3221_v45 = vpop.f32.mrb[9].mxu1 }
 0x39f   :  { %v398_v47 = vpop.f32.mrb[10].mxu1 }
 0x3a0   :  { %3539 = vtanh.f32 %v396_v44  ;;  %v3222_v49 = vpop.f32.mrb[11].mxu1  ;;  %v3014_v62 = vmul.f32 -1.442695, %v396_v44 }
 0x3aa   :  { %v3540_v51 = vpop.eup %3539 }
 0x3ab   :  { %464 = vrot.lane.b32.xlu1 %v3540_v51, %s3786_s0 }
 0x3b6   :  { %v442_v53 = vpop.f32.mrb[12].mxu1 }
 0x3b7   :  { %v443_v55 = vadd.f32 %v442_v53, %v3963_v56  ;;  %v3229_v57 = vpop.f32.mrb[13].mxu1 }
 0x3b8   :  { %v445_v59 = vpop.f32.mrb[14].mxu1 }
 0x3b9   :  { %3541 = vtanh.f32 %v443_v55  ;;  %v3230_v60 = vpop.f32.mrb[15].mxu1  ;;  %v3015_v1 = vmul.f32 -1.442695, %v443_v55 }
 0x3ba   :  { %3543 = vpow2.f32 %v3014_v62 }
 0x3c3   :  { %v3542_v61 = vpop.eup %3541 }
 0x3c4   :  { %475 = vrot.lane.b32.xlu0 %v3542_v61, %s3786_s0  ;;  %v3544_v24 = vpop.eup %3543 }
 0x3c5   :  { %v451_v63 = vadd.f32 1.0, %v3544_v24 }
 0x3c7   :  { %3545 = vrcp.f32 %v451_v63 }
 0x3c8   :  { %3547 = vpow2.f32 %v3015_v1 }
 0x3d1   :  { %v3546_v4 = vpop.eup %3545 }
 0x3d2   :  { %v3548_v56 = vpop.eup %3547  ;;  %v462_v17 = vmul.f32 %v3546_v4, %v3970_v23 }
 0x3d3   :  { %v457_v10 = vadd.f32 1.0, %v3548_v56 }
 0x3d5   :  { %3549 = vrcp.f32 %v457_v10 }
 0x3df   :  { %v3550_v11 = vpop.eup %3549 }
 0x3e0   :  { %v473_v21 = vmul.f32 %v3550_v11, %v3974_v29 }
 0x41d   :  { %v465_v5 = vpop.permute.xlu1 %464 }
 0x41e   :  { %v467_v8 = vmul.f32 %v3546_v4, %v465_v5 }
 0x420   :  { %469 = vrot.lane.b32.xlu1 %v467_v8, %s3786_s0 }
 0x436   :  { %v476_v12 = vpop.permute.xlu0 %475 }
 0x437   :  { %v478_v15 = vmul.f32 %v3550_v11, %v476_v12 }
 0x439   :  { %480 = vrot.lane.b32.xlu0 %v478_v15, %s3786_s0 }
 0x492   :  { %v470_v18 = vpop.permute.xlu1 %469 }
 0x493   :  { %v4009_v19 = vadd.f32 %v470_v18, %v462_v17 }
 0x495   :  { %3551 = vtanh.f32 %v4009_v19 }
 0x49f   :  { %v3552_v20 = vpop.eup %3551 }
 0x4a0   :  { %486 = vrot.lane.b32.xlu1 %v3552_v20, %s3786_s0 }
 0x4ab   :  { %v481_v25 = vpop.permute.xlu0 %480 }
 0x4ac   :  { %v4014_v26 = vadd.f32 %v481_v25, %v473_v21 }
 0x4ae   :  { %3553 = vtanh.f32 %v4014_v26 }
 0x4b8   :  { %v3554_v28 = vpop.eup %3553 }
 0x4b9   :  { %492 = vrot.lane.b32.xlu0 %v3554_v28, %s3786_s0 }
 0x512   :  { %v487_v30 = vpop.permute.xlu1 %486 }
 0x513   :  { %v4018_v23 = vmul.f32 %v3546_v4, %v487_v30 }
 0x515   :  { %v506_v31 = vpack.c.bf16 %v4018_v23, %v4018_v23 }
 0x517   :  { %508 = vrot.lane.b32.xlu1 %v506_v31, %s3787_s4 }
 0x52b   :  { %v493_v34 = vpop.permute.xlu0 %492 }
 0x52c   :  { %v4023_v36 = vmul.f32 %v3550_v11, %v493_v34 }
 0x52e   :  { %v553_v29 = vpack.c.bf16 %v4023_v36, %v4023_v36 }
 0x530   :  { %555 = vrot.lane.b32.xlu0 %v553_v29, %s3787_s4 }
 0x589   :  { %v509_v39 = vpop.permute.xlu1 %508 }
 0x58a   :  { %3236 = vmatmul.mubr.msk.bf16.vlgmr.msra.gmra.mrb[16].mxu0 %vm200_vm2, %v509_v39 }
 0x58b   :  { %3248 = vmatpush3.bf16.msra.mxu0 %v3861_v3  ;;  %3251 = vmatprep.mubr.msk.bf16.mxu0 %vm3785_vm0, %v3783_v0 }
 0x58c   :  { %3249 = vmatprep.subr.bf16.mxu0 %v3783_v0 }
 0x58f   :  { %3250 = vmatpush3.bf16.msra.mxu0 %v3876_v6 }
 0x590   :  { %3263 = vmatprep.subr.bf16.mxu0 %v3783_v0 }
 0x5a2   :  { %v556_v41 = vpop.permute.xlu0 %555 }
 0x5a3   :  { %3244 = vmatmul.mubr.msk.bf16.vlgmr.msra.gmra.mrb[16].mxu1 %vm200_vm2, %v556_v41 }
 0x5a4   :  { %3256 = vmatpush3.bf16.msra.mxu1 %v3884_v7  ;;  %3259 = vmatprep.mubr.msk.bf16.mxu1 %vm3785_vm0, %v3783_v0 }
 0x5a5   :  { %3257 = vmatprep.subr.bf16.mxu1 %v3783_v0 }
 0x5a8   :  { %3258 = vmatpush3.bf16.msra.mxu1 %v3898_v9 }
 0x5a9   :  { %3271 = vmatprep.subr.bf16.mxu1 %v3783_v0 }
 0x65d   :  { %v547_v42 = vpop.f32.mrb[16].mxu0 }
 0x65e   :  { %v548_v43 = vadd.f32 %v547_v42, %v3944_v33  ;;  %v3237_v44 = vpop.f32.mrb[17].mxu0 }
 0x65f   :  { %v550_v45 = vpop.f32.mrb[18].mxu0 }
 0x660   :  { %3555 = vtanh.f32 %v548_v43  ;;  %v3238_v47 = vpop.f32.mrb[19].mxu0  ;;  %v3018_v61 = vmul.f32 -1.442695, %v548_v43 }
 0x66a   :  { %v3556_v49 = vpop.eup %3555 }
 0x66b   :  { %616 = vrot.lane.b32.xlu1 %v3556_v49, %s3786_s0 }
 0x676   :  { %v594_v51 = vpop.f32.mrb[16].mxu1 }
 0x677   :  { %v595_v53 = vadd.f32 %v594_v51, %v3959_v52  ;;  %v3245_v55 = vpop.f32.mrb[17].mxu1 }
 0x678   :  { %v597_v57 = vpop.f32.mrb[18].mxu1 }
 0x679   :  { %3557 = vtanh.f32 %v595_v53  ;;  %v3246_v59 = vpop.f32.mrb[19].mxu1  ;;  %v3019_v24 = vmul.f32 -1.442695, %v595_v53 }
 0x67a   :  { %3559 = vpow2.f32 %v3018_v61 }
 0x683   :  { %v3558_v60 = vpop.eup %3557 }
 0x684   :  { %627 = vrot.lane.b32.xlu0 %v3558_v60, %s3786_s0  ;;  %v3560_v33 = vpop.eup %3559 }
 0x685   :  { %v603_v62 = vadd.f32 1.0, %v3560_v33 }
 0x687   :  { %3561 = vrcp.f32 %v603_v62 }
 0x688   :  { %3563 = vpow2.f32 %v3019_v24 }
 0x691   :  { %v3562_v63 = vpop.eup %3561 }
 0x692   :  { %v3564_v52 = vpop.eup %3563  ;;  %v614_v11 = vmul.f32 %v3562_v63, %v4009_v19 }
 0x693   :  { %v609_v5 = vadd.f32 1.0, %v3564_v52 }
 0x695   :  { %3565 = vrcp.f32 %v609_v5 }
 0x69f   :  { %v3566_v8 = vpop.eup %3565 }
 0x6a0   :  { %v625_v18 = vmul.f32 %v3566_v8, %v4014_v26 }
 0x6dd   :  { %v617_v1 = vpop.permute.xlu1 %616 }
 0x6de   :  { %v619_v4 = vmul.f32 %v3562_v63, %v617_v1 }
 0x6e0   :  { %621 = vrot.lane.b32.xlu1 %v619_v4, %s3786_s0 }
 0x6f6   :  { %v628_v56 = vpop.permute.xlu0 %627 }
 0x6f7   :  { %v630_v10 = vmul.f32 %v3566_v8, %v628_v56 }
 0x6f9   :  { %632 = vrot.lane.b32.xlu0 %v630_v10, %s3786_s0 }
 0x752   :  { %v622_v12 = vpop.permute.xlu1 %621 }
 0x753   :  { %v4049_v15 = vadd.f32 %v622_v12, %v614_v11 }
 0x755   :  { %3567 = vtanh.f32 %v4049_v15 }
 0x75f   :  { %v3568_v17 = vpop.eup %3567 }
 0x760   :  { %638 = vrot.lane.b32.xlu1 %v3568_v17, %s3786_s0 }
 0x76b   :  { %v633_v20 = vpop.permute.xlu0 %632 }
 0x76c   :  { %v4054_v21 = vadd.f32 %v633_v20, %v625_v18 }
 0x76e   :  { %3569 = vtanh.f32 %v4054_v21 }
 0x778   :  { %v3570_v25 = vpop.eup %3569 }
 0x779   :  { %644 = vrot.lane.b32.xlu0 %v3570_v25, %s3786_s0 }
 0x7d2   :  { %v639_v28 = vpop.permute.xlu1 %638 }
 0x7d3   :  { %v4058_v19 = vmul.f32 %v3562_v63, %v639_v28 }
 0x7d5   :  { %v658_v30 = vpack.c.bf16 %v4058_v19, %v4058_v19 }
 0x7d7   :  { %660 = vrot.lane.b32.xlu1 %v658_v30, %s3787_s4 }
 0x7eb   :  { %v645_v31 = vpop.permute.xlu0 %644 }
 0x7ec   :  { %v4063_v34 = vmul.f32 %v3566_v8, %v645_v31 }
 0x7ee   :  { %v705_v26 = vpack.c.bf16 %v4063_v34, %v4063_v34 }
 0x7f0   :  { %707 = vrot.lane.b32.xlu0 %v705_v26, %s3787_s4 }
 0x849   :  { %v661_v29 = vpop.permute.xlu1 %660 }
 0x84a   :  { %3252 = vmatmul.mubr.msk.bf16.vlgmr.msra.gmra.mrb[20].mxu0 %vm200_vm2, %v661_v29 }
 0x84b   :  { %3264 = vmatpush3.bf16.msra.mxu0 %v3861_v3  ;;  %3267 = vmatprep.mubr.msk.bf16.mxu0 %vm3785_vm0, %v3783_v0 }
 0x84c   :  { %3265 = vmatprep.subr.bf16.mxu0 %v3783_v0 }
 0x84f   :  { %3266 = vmatpush3.bf16.msra.mxu0 %v3876_v6 }
 0x850   :  { %3279 = vmatprep.subr.bf16.mxu0 %v3783_v0 }
 0x862   :  { %v708_v39 = vpop.permute.xlu0 %707 }
 0x863   :  { %3260 = vmatmul.mubr.msk.bf16.vlgmr.msra.gmra.mrb[20].mxu1 %vm200_vm2, %v708_v39 }
 0x864   :  { %3272 = vmatpush3.bf16.msra.mxu1 %v3884_v7  ;;  %3275 = vmatprep.mubr.msk.bf16.mxu1 %vm3785_vm0, %v3783_v0 }
 0x865   :  { %3273 = vmatprep.subr.bf16.mxu1 %v3783_v0 }
 0x868   :  { %3274 = vmatpush3.bf16.msra.mxu1 %v3898_v9 }
 0x869   :  { %3287 = vmatprep.subr.bf16.mxu1 %v3783_v0 }
 0x91d   :  { %v699_v41 = vpop.f32.mrb[20].mxu0 }
 0x91e   :  { %v700_v42 = vadd.f32 %v699_v41, %v3948_v37  ;;  %v3253_v43 = vpop.f32.mrb[21].mxu0 }
 0x91f   :  { %v702_v44 = vpop.f32.mrb[22].mxu0 }
 0x920   :  { %3571 = vtanh.f32 %v700_v42  ;;  %v3254_v45 = vpop.f32.mrb[23].mxu0  ;;  %v3022_v60 = vmul.f32 -1.442695, %v700_v42 }
 0x92a   :  { %v3572_v47 = vpop.eup %3571 }
 0x92b   :  { %768 = vrot.lane.b32.xlu1 %v3572_v47, %s3786_s0 }
 0x936   :  { %v746_v49 = vpop.f32.mrb[20].mxu1 }
 0x937   :  { %v747_v51 = vadd.f32 %v746_v49, %v3955_v48  ;;  %v3261_v53 = vpop.f32.mrb[21].mxu1 }
 0x938   :  { %v749_v55 = vpop.f32.mrb[22].mxu1 }
 0x939   :  { %3573 = vtanh.f32 %v747_v51  ;;  %v3262_v57 = vpop.f32.mrb[23].mxu1  ;;  %v3023_v33 = vmul.f32 -1.442695, %v747_v51 }
 0x93a   :  { %3575 = vpow2.f32 %v3022_v60 }
 0x943   :  { %v3574_v59 = vpop.eup %3573 }
 0x944   :  { %779 = vrot.lane.b32.xlu0 %v3574_v59, %s3786_s0  ;;  %v3576_v37 = vpop.eup %3575 }
 0x945   :  { %v755_v61 = vadd.f32 1.0, %v3576_v37 }
 0x947   :  { %3577 = vrcp.f32 %v755_v61 }
 0x948   :  { %3579 = vpow2.f32 %v3023_v33 }
 0x951   :  { %v3578_v62 = vpop.eup %3577 }
 0x952   :  { %v3580_v48 = vpop.eup %3579  ;;  %v766_v8 = vmul.f32 %v3578_v62, %v4049_v15 }
 0x953   :  { %v761_v1 = vadd.f32 1.0, %v3580_v48 }
 0x955   :  { %3581 = vrcp.f32 %v761_v1 }
 0x95f   :  { %v3582_v4 = vpop.eup %3581 }
 0x960   :  { %v777_v12 = vmul.f32 %v3582_v4, %v4054_v21 }
 0x99d   :  { %v769_v24 = vpop.permute.xlu1 %768 }
 0x99e   :  { %v771_v63 = vmul.f32 %v3578_v62, %v769_v24 }
 0x9a0   :  { %773 = vrot.lane.b32.xlu1 %v771_v63, %s3786_s0 }
 0x9b6   :  { %v780_v52 = vpop.permute.xlu0 %779 }
 0x9b7   :  { %v782_v5 = vmul.f32 %v3582_v4, %v780_v52 }
 0x9b9   :  { %784 = vrot.lane.b32.xlu0 %v782_v5, %s3786_s0 }
 0xa12   :  { %v774_v56 = vpop.permute.xlu1 %773 }
 0xa13   :  { %v4089_v10 = vadd.f32 %v774_v56, %v766_v8 }
 0xa15   :  { %3583 = vtanh.f32 %v4089_v10 }
 0xa1f   :  { %v3584_v11 = vpop.eup %3583 }
 0xa20   :  { %790 = vrot.lane.b32.xlu1 %v3584_v11, %s3786_s0 }
 0xa2b   :  { %v785_v17 = vpop.permute.xlu0 %784 }
 0xa2c   :  { %v4094_v18 = vadd.f32 %v785_v17, %v777_v12 }
 0xa2e   :  { %3585 = vtanh.f32 %v4094_v18 }
 0xa38   :  { %v3586_v20 = vpop.eup %3585 }
 0xa39   :  { %796 = vrot.lane.b32.xlu0 %v3586_v20, %s3786_s0 }
 0xa92   :  { %v791_v25 = vpop.permute.xlu1 %790 }
 0xa93   :  { %v4098_v15 = vmul.f32 %v3578_v62, %v791_v25 }
 0xa95   :  { %v810_v28 = vpack.c.bf16 %v4098_v15, %v4098_v15 }
 0xa97   :  { %812 = vrot.lane.b32.xlu1 %v810_v28, %s3787_s4 }
 0xaab   :  { %v797_v30 = vpop.permute.xlu0 %796 }
 0xaac   :  { %v4103_v31 = vmul.f32 %v3582_v4, %v797_v30 }
 0xaae   :  { %v857_v21 = vpack.c.bf16 %v4103_v31, %v4103_v31 }
 0xab0   :  { %859 = vrot.lane.b32.xlu0 %v857_v21, %s3787_s4 }
 0xb09   :  { %v813_v26 = vpop.permute.xlu1 %812 }
 0xb0a   :  { %3268 = vmatmul.mubr.msk.bf16.vlgmr.msra.gmra.mrb[24].mxu0 %vm200_vm2, %v813_v26 }
 0xb0b   :  { %3280 = vmatpush3.bf16.msra.mxu0 %v3861_v3  ;;  %3283 = vmatprep.mubr.msk.bf16.mxu0 %vm3785_vm0, %v3783_v0 }
 0xb0c   :  { %3281 = vmatprep.subr.bf16.mxu0 %v3783_v0 }
 0xb0f   :  { %3282 = vmatpush3.bf16.msra.mxu0 %v3876_v6 }
 0xb10   :  { %3295 = vmatprep.subr.bf16.mxu0 %v3783_v0 }
 0xb22   :  { %v860_v29 = vpop.permute.xlu0 %859 }
 0xb23   :  { %3276 = vmatmul.mubr.msk.bf16.vlgmr.msra.gmra.mrb[24].mxu1 %vm200_vm2, %v860_v29 }
 0xb24   :  { %3288 = vmatpush3.bf16.msra.mxu1 %v3884_v7  ;;  %3291 = vmatprep.mubr.msk.bf16.mxu1 %vm3785_vm0, %v3783_v0 }
 0xb25   :  { %3289 = vmatprep.subr.bf16.mxu1 %v3783_v0 }
 0xb28   :  { %3290 = vmatpush3.bf16.msra.mxu1 %v3898_v9 }
 0xb29   :  { %3303 = vmatprep.subr.bf16.mxu1 %v3783_v0 }
 0xbdd   :  { %v851_v39 = vpop.f32.mrb[24].mxu0 }
 0xbde   :  { %v852_v41 = vadd.f32 %v851_v39, %v3952_v46  ;;  %v3269_v42 = vpop.f32.mrb[25].mxu0 }
 0xbdf   :  { %v854_v43 = vpop.f32.mrb[26].mxu0 }
 0xbe0   :  { %3587 = vtanh.f32 %v852_v41  ;;  %v3270_v44 = vpop.f32.mrb[27].mxu0  ;;  %v3026_v59 = vmul.f32 -1.442695, %v852_v41 }
 0xbea   :  { %v3588_v45 = vpop.eup %3587 }
 0xbeb   :  { %920 = vrot.lane.b32.xlu1 %v3588_v45, %s3786_s0 }
 0xbf6   :  { %v898_v47 = vpop.f32.mrb[24].mxu1 }
 0xbf7   :  { %v899_v49 = vadd.f32 %v898_v47, %v3950_v40  ;;  %v3277_v51 = vpop.f32.mrb[25].mxu1 }
 0xbf8   :  { %v901_v53 = vpop.f32.mrb[26].mxu1 }
 0xbf9   :  { %3589 = vtanh.f32 %v899_v49  ;;  %v3278_v55 = vpop.f32.mrb[27].mxu1  ;;  %v3027_v37 = vmul.f32 -1.442695, %v899_v49 }
 0xbfa   :  { %3591 = vpow2.f32 %v3026_v59 }
 0xc03   :  { %v3590_v57 = vpop.eup %3589 }
 0xc04   :  { %931 = vrot.lane.b32.xlu0 %v3590_v57, %s3786_s0  ;;  %v3592_v46 = vpop.eup %3591 }
 0xc05   :  { %v907_v60 = vadd.f32 1.0, %v3592_v46 }
 0xc07   :  { %3593 = vrcp.f32 %v907_v60 }
 0xc08   :  { %3595 = vpow2.f32 %v3027_v37 }
 0xc11   :  { %v3594_v61 = vpop.eup %3593 }
 0xc12   :  { %v3596_v40 = vpop.eup %3595  ;;  %v918_v4 = vmul.f32 %v3594_v61, %v4089_v10 }
 0xc13   :  { %v913_v24 = vadd.f32 1.0, %v3596_v40 }
 0xc15   :  { %3597 = vrcp.f32 %v913_v24 }
 0xc1f   :  { %v3598_v63 = vpop.eup %3597 }
 0xc20   :  { %v929_v56 = vmul.f32 %v3598_v63, %v4094_v18 }
 0xc5d   :  { %v921_v33 = vpop.permute.xlu1 %920 }
 0xc5e   :  { %v923_v62 = vmul.f32 %v3594_v61, %v921_v33 }
 0xc60   :  { %925 = vrot.lane.b32.xlu1 %v923_v62, %s3786_s0 }
 0xc76   :  { %v932_v48 = vpop.permute.xlu0 %931 }
 0xc77   :  { %v934_v1 = vmul.f32 %v3598_v63, %v932_v48 }
 0xc79   :  { %936 = vrot.lane.b32.xlu0 %v934_v1, %s3786_s0 }
 0xcd2   :  { %v926_v52 = vpop.permute.xlu1 %925 }
 0xcd3   :  { %v4129_v5 = vadd.f32 %v926_v52, %v918_v4 }
 0xcd5   :  { %3599 = vtanh.f32 %v4129_v5 }
 0xcdf   :  { %v3600_v8 = vpop.eup %3599 }
 0xce0   :  { %942 = vrot.lane.b32.xlu1 %v3600_v8, %s3786_s0 }
 0xceb   :  { %v937_v11 = vpop.permute.xlu0 %936 }
 0xcec   :  { %v4134_v12 = vadd.f32 %v937_v11, %v929_v56 }
 0xcee   :  { %3601 = vtanh.f32 %v4134_v12 }
 0xcf8   :  { %v3602_v17 = vpop.eup %3601 }
 0xcf9   :  { %948 = vrot.lane.b32.xlu0 %v3602_v17, %s3786_s0 }
 0xd52   :  { %v943_v20 = vpop.permute.xlu1 %942 }
 0xd53   :  { %v4138_v10 = vmul.f32 %v3594_v61, %v943_v20 }
 0xd55   :  { %v962_v25 = vpack.c.bf16 %v4138_v10, %v4138_v10 }
 0xd57   :  { %964 = vrot.lane.b32.xlu1 %v962_v25, %s3787_s4 }
 0xd6b   :  { %v949_v28 = vpop.permute.xlu0 %948 }
 0xd6c   :  { %v4143_v30 = vmul.f32 %v3598_v63, %v949_v28 }
 0xd6e   :  { %v1009_v18 = vpack.c.bf16 %v4143_v30, %v4143_v30 }
 0xd70   :  { %1011 = vrot.lane.b32.xlu0 %v1009_v18, %s3787_s4 }
 0xdc9   :  { %v965_v21 = vpop.permute.xlu1 %964 }
 0xdca   :  { %3284 = vmatmul.mubr.msk.bf16.vlgmr.msra.gmra.mrb[28].mxu0 %vm200_vm2, %v965_v21 }
 0xdcb   :  { %3296 = vmatpush3.bf16.msra.mxu0 %v3861_v3  ;;  %3299 = vmatprep.mubr.msk.bf16.mxu0 %vm3785_vm0, %v3783_v0 }
 0xdcc   :  { %3297 = vmatprep.subr.bf16.mxu0 %v3783_v0 }
 0xdcf   :  { %3298 = vmatpush3.bf16.msra.mxu0 %v3876_v6 }
 0xdd0   :  { %3311 = vmatprep.subr.bf16.mxu0 %v3783_v0 }
 0xde2   :  { %v1012_v26 = vpop.permute.xlu0 %1011 }
 0xde3   :  { %3292 = vmatmul.mubr.msk.bf16.vlgmr.msra.gmra.mrb[28].mxu1 %vm200_vm2, %v1012_v26 }
 0xde4   :  { %3304 = vmatpush3.bf16.msra.mxu1 %v3884_v7  ;;  %3307 = vmatprep.mubr.msk.bf16.mxu1 %vm3785_vm0, %v3783_v0 }
 0xde5   :  { %3305 = vmatprep.subr.bf16.mxu1 %v3783_v0 }
 0xde8   :  { %3306 = vmatpush3.bf16.msra.mxu1 %v3898_v9 }
 0xde9   :  { %3319 = vmatprep.subr.bf16.mxu1 %v3783_v0 }
 0xe9d   :  { %v1003_v29 = vpop.f32.mrb[28].mxu0 }
 0xe9e   :  { %v1004_v39 = vadd.f32 %v1003_v29, %v3957_v50  ;;  %v3285_v41 = vpop.f32.mrb[29].mxu0 }
 0xe9f   :  { %v1006_v42 = vpop.f32.mrb[30].mxu0 }
 0xea0   :  { %3603 = vtanh.f32 %v1004_v39  ;;  %v3286_v43 = vpop.f32.mrb[31].mxu0  ;;  %v3030_v57 = vmul.f32 -1.442695, %v1004_v39 }
 0xeaa   :  { %v3604_v44 = vpop.eup %3603 }
 0xeab   :  { %1072 = vrot.lane.b32.xlu1 %v3604_v44, %s3786_s0 }
 0xeb6   :  { %v1050_v45 = vpop.f32.mrb[28].mxu1 }
 0xeb7   :  { %v1051_v47 = vadd.f32 %v1050_v45, %v3946_v35  ;;  %v3293_v49 = vpop.f32.mrb[29].mxu1 }
 0xeb8   :  { %v1053_v51 = vpop.f32.mrb[30].mxu1 }
 0xeb9   :  { %3605 = vtanh.f32 %v1051_v47  ;;  %v3294_v53 = vpop.f32.mrb[31].mxu1  ;;  %v3031_v46 = vmul.f32 -1.442695, %v1051_v47 }
 0xeba   :  { %3607 = vpow2.f32 %v3030_v57 }
 0xec3   :  { %v3606_v55 = vpop.eup %3605 }
 0xec4   :  { %1083 = vrot.lane.b32.xlu0 %v3606_v55, %s3786_s0  ;;  %v3608_v50 = vpop.eup %3607 }
 0xec5   :  { %v1059_v59 = vadd.f32 1.0, %v3608_v50 }
 0xec7   :  { %3609 = vrcp.f32 %v1059_v59 }
 0xec8   :  { %3611 = vpow2.f32 %v3031_v46 }
 0xed1   :  { %v3610_v60 = vpop.eup %3609 }
 0xed2   :  { %v3612_v35 = vpop.eup %3611  ;;  %v1070_v63 = vmul.f32 %v3610_v60, %v4129_v5 }
 0xed3   :  { %v1065_v33 = vadd.f32 1.0, %v3612_v35 }
 0xed5   :  { %3613 = vrcp.f32 %v1065_v33 }
 0xedf   :  { %v3614_v62 = vpop.eup %3613 }
 0xee0   :  { %v1081_v52 = vmul.f32 %v3614_v62, %v4134_v12 }
 0xf1d   :  { %v1073_v37 = vpop.permute.xlu1 %1072 }
 0xf1e   :  { %v1075_v61 = vmul.f32 %v3610_v60, %v1073_v37 }
 0xf20   :  { %1077 = vrot.lane.b32.xlu1 %v1075_v61, %s3786_s0 }
 0xf36   :  { %v1084_v40 = vpop.permute.xlu0 %1083 }
 0xf37   :  { %v1086_v24 = vmul.f32 %v3614_v62, %v1084_v40 }
 0xf39   :  { %1088 = vrot.lane.b32.xlu0 %v1086_v24, %s3786_s0 }
 0xf92   :  { %v1078_v48 = vpop.permute.xlu1 %1077 }
 0xf93   :  { %v4169_v1 = vadd.f32 %v1078_v48, %v1070_v63 }
 0xf95   :  { %3615 = vtanh.f32 %v4169_v1 }
 0xf9f   :  { %v3616_v4 = vpop.eup %3615 }
 0xfa0   :  { %1094 = vrot.lane.b32.xlu1 %v3616_v4, %s3786_s0 }
 0xfab   :  { %v1089_v8 = vpop.permute.xlu0 %1088 }
 0xfac   :  { %v4174_v56 = vadd.f32 %v1089_v8, %v1081_v52 }
 0xfae   :  { %3617 = vtanh.f32 %v4174_v56 }
 0xfb8   :  { %v3618_v11 = vpop.eup %3617 }
 0xfb9   :  { %1100 = vrot.lane.b32.xlu0 %v3618_v11, %s3786_s0 }
0x1012   :  { %v1095_v17 = vpop.permute.xlu1 %1094 }
0x1013   :  { %v4178_v5 = vmul.f32 %v3610_v60, %v1095_v17 }
0x1015   :  { %v1114_v20 = vpack.c.bf16 %v4178_v5, %v4178_v5 }
0x1017   :  { %1116 = vrot.lane.b32.xlu1 %v1114_v20, %s3787_s4 }
0x102b   :  { %v1101_v25 = vpop.permute.xlu0 %1100 }
0x102c   :  { %v4183_v28 = vmul.f32 %v3614_v62, %v1101_v25 }
0x102e   :  { %v1161_v12 = vpack.c.bf16 %v4183_v28, %v4183_v28 }
0x1030   :  { %1163 = vrot.lane.b32.xlu0 %v1161_v12, %s3787_s4 }
0x1089   :  { %v1117_v18 = vpop.permute.xlu1 %1116 }
0x108a   :  { %3300 = vmatmul.mubr.msk.bf16.vlgmr.msra.gmra.mrb[32].mxu0 %vm200_vm2, %v1117_v18 }
0x108b   :  { %3312 = vmatpush3.bf16.msra.mxu0 %v3861_v3  ;;  %3315 = vmatprep.mubr.msk.bf16.mxu0 %vm3785_vm0, %v3783_v0 }
0x108c   :  { %3313 = vmatprep.subr.bf16.mxu0 %v3783_v0 }
0x108f   :  { %3314 = vmatpush3.bf16.msra.mxu0 %v3876_v6 }
0x10a2   :  { %v1164_v21 = vpop.permute.xlu0 %1163 }
0x10a3   :  { %3308 = vmatmul.mubr.msk.bf16.vlgmr.msra.gmra.mrb[32].mxu1 %vm200_vm2, %v1164_v21 }
0x10a4   :  { %3320 = vmatpush3.bf16.msra.mxu1 %v3884_v7  ;;  %3323 = vmatprep.mubr.msk.bf16.mxu1 %vm3785_vm0, %v3783_v0 }
0x10a5   :  { %3321 = vmatprep.subr.bf16.mxu1 %v3783_v0 }
0x10a8   :  { %3322 = vmatpush3.bf16.msra.mxu1 %v3898_v9 }
0x10a9   :  { %3327 = vmatprep.subr.bf16.mxu1 %v3783_v0 }
0x115d   :  { %v1155_v3 = vpop.f32.mrb[32].mxu0 }
0x115e   :  { %v1156_v26 = vadd.f32 %v1155_v3, %v3961_v54  ;;  %v3301_v29 = vpop.f32.mrb[33].mxu0 }
0x115f   :  { %v1158_v39 = vpop.f32.mrb[34].mxu0 }
0x1160   :  { %3619 = vtanh.f32 %v1156_v26  ;;  %v3302_v6 = vpop.f32.mrb[35].mxu0  ;;  %v3034_v47 = vmul.f32 -1.442695, %v1156_v26 }
0x116a   :  { %v3620_v41 = vpop.eup %3619 }
0x116b   :  { %1224 = vrot.lane.b32.xlu1 %v3620_v41, %s3786_s0 }
0x1176   :  { %v1202_v7 = vpop.f32.mrb[32].mxu1 }
0x1177   :  { %v1203_v42 = vadd.f32 %v1202_v7, %v3942_v27  ;;  %v3309_v43 = vpop.f32.mrb[33].mxu1 }
0x1178   :  { %v1205_v44 = vpop.f32.mrb[34].mxu1 }
0x1179   :  { %3621 = vtanh.f32 %v1203_v42  ;;  %v3310_v45 = vpop.f32.mrb[35].mxu1  ;;  %v3035_v51 = vmul.f32 -1.442695, %v1203_v42 }
0x117a   :  { %3623 = vpow2.f32 %v3034_v47 }
0x1183   :  { %v3622_v9 = vpop.eup %3621 }
0x1184   :  { %1235 = vrot.lane.b32.xlu0 %v3622_v9, %s3786_s0  ;;  %v3624_v54 = vpop.eup %3623 }
0x1185   :  { %v1211_v49 = vadd.f32 1.0, %v3624_v54 }
0x1187   :  { %3625 = vrcp.f32 %v1211_v49 }
0x1188   :  { %3627 = vpow2.f32 %v3035_v51 }
0x1191   :  { %v3626_v53 = vpop.eup %3625 }
0x1192   :  { %v3628_v27 = vpop.eup %3627  ;;  %v1222_v37 = vmul.f32 %v3626_v53, %v4169_v1 }
0x1193   :  { %v1217_v50 = vadd.f32 1.0, %v3628_v27 }
0x1195   :  { %3629 = vrcp.f32 %v1217_v50 }
0x119f   :  { %v3630_v59 = vpop.eup %3629 }
0x11a0   :  { %v1233_v62 = vmul.f32 %v3630_v59, %v4174_v56 }
0x11dd   :  { %v1225_v55 = vpop.permute.xlu1 %1224 }
0x11de   :  { %v1227_v57 = vmul.f32 %v3626_v53, %v1225_v55 }
0x11e0   :  { %1229 = vrot.lane.b32.xlu1 %v1227_v57, %s3786_s0 }
0x11f6   :  { %v1236_v46 = vpop.permute.xlu0 %1235 }
0x11f7   :  { %v1238_v60 = vmul.f32 %v3630_v59, %v1236_v46 }
0x11f9   :  { %1240 = vrot.lane.b32.xlu0 %v1238_v60, %s3786_s0 }
0x1252   :  { %v1230_v61 = vpop.permute.xlu1 %1229 }
0x1253   :  { %v1232_v35 = vadd.f32 %v1230_v61, %v1222_v37 }
0x1255   :  { %3631 = vtanh.f32 %v1232_v35 }
0x125f   :  { %v3632_v33 = vpop.eup %3631 }
0x1260   :  { %1246 = vrot.lane.b32.xlu1 %v3632_v33, %s3786_s0 }
0x126b   :  { %v1241_v40 = vpop.permute.xlu0 %1240 }
0x126c   :  { %v1243_v24 = vadd.f32 %v1241_v40, %v1233_v62 }
0x126e   :  { %3633 = vtanh.f32 %v1243_v24 }
0x1278   :  { %v3634_v63 = vpop.eup %3633 }
0x1279   :  { %1252 = vrot.lane.b32.xlu0 %v3634_v63, %s3786_s0 }
0x12d2   :  { %v1247_v48 = vpop.permute.xlu1 %1246 }
0x12d3   :  { %v4211_v4 = vmul.f32 %v3626_v53, %v1247_v48 }
0x12d5   :  { %v1266_v1 = vpack.c.bf16 %v4211_v4, %v4211_v4 }
0x12d7   :  { %1268 = vrot.lane.b32.xlu1 %v1266_v1, %s3787_s4 }
0x12eb   :  { %v1253_v52 = vpop.permute.xlu0 %1252 }
0x12ec   :  { %v1255_v8 = vmul.f32 %v3630_v59, %v1253_v52 }
0x12ee   :  { %v1313_v11 = vpack.c.bf16 %v1255_v8, %v1255_v8 }
0x12f0   :  { %1315 = vrot.lane.b32.xlu0 %v1313_v11, %s3787_s4  ;;  %v3509_v11 = vld [vmem:[%s4720_s5] ss:$8 sps:$4 sm:$0xff]  }
0x1349   :  { %v1269_v56 = vpop.permute.xlu1 %1268 }
0x134a   :  { %3316 = vmatmul.mubr.msk.bf16.vlgmr.msra.gmra.mrb[36].mxu0 %vm200_vm2, %v1269_v56 }
0x134b   :  { %1514 = vmatprep.mubr.bf16.mxu0 %v3784_v2 }
0x1362   :  { %v1316_v17 = vpop.permute.xlu0 %1315 }
0x1363   :  { %3324 = vmatmul.mubr.msk.bf16.vlgmr.msra.gmra.mrb[36].mxu1 %vm200_vm2, %v1316_v17 }
0x1364   :  { %3331 = vmatprep.mubr.msk.bf16.mxu1 %vm3785_vm0, %v3783_v0 }
0x141d   :  { %v1307_v20 = vpop.f32.mrb[36].mxu0 }
0x141e   :  { %v1308_v25 = vadd.f32 %v1307_v20, %v3965_v58  ;;  %v3317_v12 = vpop.f32.mrb[37].mxu0 }
0x141f   :  { %v1310_v18 = vpop.f32.mrb[38].mxu0 }
0x1420   :  { %3635 = vtanh.f32 %v1308_v25  ;;  %v3318_v21 = vpop.f32.mrb[39].mxu0  ;;  %v3038_v42 = vmul.f32 -1.442695, %v1308_v25  ;;  %v3514_v25 = vld [vmem:[%s4720_s5 + $0x14] ss:$8 sps:$4 sm:$0xff]  }
0x1421   :  { %v3512_v18 = vld [vmem:[%s4720_s5 + $0x10] ss:$8 sps:$4 sm:$0xff]  }
0x142a   :  { %v3636_v3 = vpop.eup %3635 }
0x142b   :  { %1376 = vrot.lane.b32.xlu1 %v3636_v3, %s3786_s0 }
0x1436   :  { %v1354_v26 = vpop.f32.mrb[36].mxu1 }
0x1437   :  { %v1355_v29 = vadd.f32 %v1354_v26, %v3938_v22  ;;  %v3325_v39 = vpop.f32.mrb[37].mxu1 }
0x1438   :  { %v1357_v6 = vpop.f32.mrb[38].mxu1 }
0x1439   :  { %3637 = vtanh.f32 %v1355_v29  ;;  %v3326_v41 = vpop.f32.mrb[39].mxu1  ;;  %v3039_v44 = vmul.f32 -1.442695, %v1355_v29 }
0x143a   :  { %3639 = vpow2.f32 %v3038_v42 }
0x1443   :  { %v3638_v7 = vpop.eup %3637 }
0x1444   :  { %1387 = vrot.lane.b32.xlu0 %v3638_v7, %s3786_s0  ;;  %v3640_v58 = vpop.eup %3639 }
0x1445   :  { %v1363_v43 = vadd.f32 1.0, %v3640_v58 }
0x1447   :  { %3641 = vrcp.f32 %v1363_v43 }
0x1448   :  { %3643 = vpow2.f32 %v3039_v44 }
0x1451   :  { %v4226_v45 = vpop.eup %3641 }
0x1452   :  { %v3644_v22 = vpop.eup %3643  ;;  %v1374_v55 = vmul.f32 %v4226_v45, %v1232_v35 }
0x1453   :  { %v1369_v54 = vadd.f32 1.0, %v3644_v22 }
0x1455   :  { %3645 = vrcp.f32 %v1369_v54 }
0x145f   :  { %v3646_v49 = vpop.eup %3645 }
0x1460   :  { %v1385_v59 = vmul.f32 %v3646_v49, %v1243_v24 }
0x149d   :  { %v1377_v9 = vpop.permute.xlu1 %1376 }
0x149e   :  { %v1379_v47 = vmul.f32 %v4226_v45, %v1377_v9 }
0x14a0   :  { %1381 = vrot.lane.b32.xlu1 %v1379_v47, %s3786_s0 }
0x14b6   :  { %v1388_v51 = vpop.permute.xlu0 %1387 }
0x14b7   :  { %v1390_v53 = vmul.f32 %v3646_v49, %v1388_v51 }
0x14b9   :  { %1392 = vrot.lane.b32.xlu0 %v1390_v53, %s3786_s0 }
0x1512   :  { %v1382_v57 = vpop.permute.xlu1 %1381 }
0x1513   :  { %v1384_v27 = vadd.f32 %v1382_v57, %v1374_v55 }
0x1515   :  { %3647 = vtanh.f32 %v1384_v27 }
0x151f   :  { %v3648_v50 = vpop.eup %3647 }
0x1520   :  { %1398 = vrot.lane.b32.xlu1 %v3648_v50, %s3786_s0 }
0x152b   :  { %v1393_v46 = vpop.permute.xlu0 %1392 }
0x152c   :  { %v1395_v60 = vadd.f32 %v1393_v46, %v1385_v59 }
0x152e   :  { %3649 = vtanh.f32 %v1395_v60 }
0x1538   :  { %v3650_v37 = vpop.eup %3649 }
0x1539   :  { %1404 = vrot.lane.b32.xlu0 %v3650_v37, %s3786_s0 }
0x153d   :  { %1262 = vrot.lane.b32.xlu0 %v1255_v8, %s3787_s4 }
0x1541   :  { %958 = vrot.lane.b32.xlu0 %v4143_v30, %s3787_s4  ;;  %v3503_v30 = vld [vmem:[%s4720_s5 + $0x20] ss:$8 sps:$4 sm:$0xff]  }
0x1545   :  { %654 = vrot.lane.b32.xlu0 %v4063_v34, %s3787_s4  ;;  %v3511_v34 = vld [vmem:[%s4720_s5 + $0x4] ss:$8 sps:$4 sm:$0xff]  }
0x1549   :  { %350 = vrot.lane.b32.xlu0 %v3983_v38, %s3787_s4  ;;  %v3505_v38 = vld [vmem:[%s4720_s5 + $0x24] ss:$8 sps:$4 sm:$0xff]  }
0x154a   :  { %1482 = vmatprep.subr.bf16.mxu0 %v3505_v38 }
0x154b   :  { %1483 = vmatpush1.bf16.msra.mxu0 %v3503_v30 }
0x154d   :  { %345 = vrot.lane.b32.xlu0 %v3978_v32, %s3787_s4  ;;  %v3506_v32 = vld [vmem:[%s4720_s5 + $0x30] ss:$8 sps:$4 sm:$0xff]  }
0x1551   :  { %649 = vrot.lane.b32.xlu0 %v4058_v19, %s3787_s4  ;;  %v3508_v19 = vld [vmem:[%s4720_s5 + $0x34] ss:$8 sps:$4 sm:$0xff]  }
0x1552   :  { %1484 = vmatprep.subr.bf16.mxu0 %v3508_v19 }
0x1553   :  { %1485 = vmatpush1.bf16.msra.mxu0 %v3506_v32 }
0x1554   :  { %1587 = vmatprep.subr.bf16.mxu0 %v3511_v34 }
0x1555   :  { %953 = vrot.lane.b32.xlu0 %v4138_v10, %s3787_s4 }
0x1559   :  { %1257 = vrot.lane.b32.xlu0 %v4211_v4, %s3787_s4  ;;  %v4313_v4 = vld [vmem:[%s4722_s7 + $0x8] sm:$0xff]  }
0x15ab   :  { %v1405_v10 = vpop.permute.xlu0 %1404 }
0x15ac   :  { %v1407_v61 = vmul.f32 %v3646_v49, %v1405_v10 }
0x15ae   :  { %1414 = vrot.lane.b32.xlu1 %v1407_v61, %s3787_s4 }
0x15af   :  { %v1263_v35 = vpop.permute.xlu0 %1262 }
0x15b0   :  { %1265 = vst.msk [vmem:[#allocation3 + $0x8] sm:$0xff] %vm200_vm2, %v1263_v35 }
0x15b2   :  { %1110 = vrot.lane.b32.xlu1 %v4183_v28, %s3787_s4 }
0x15b3   :  { %v959_v33 = vpop.permute.xlu0 %958 }
0x15b4   :  { %961 = vst.msk [vmem:[#allocation3 + $0x18] sm:$0xff] %vm200_vm2, %v959_v33 }
0x15b6   :  { %806 = vrot.lane.b32.xlu1 %v4103_v31, %s3787_s4  ;;  %v4284_v31 = vld [vmem:[%s4721_s6] sm:$0xff]  }
0x15b7   :  { %v655_v62 = vpop.permute.xlu0 %654  ;;  %3328 = vmatpush3.bf16.msra.mxu1 %v4284_v31  ;;  %v1435_v17 = vld [vmem:[#allocation3 + $0x8] sm:$0xff] }
0x15b8   :  { %657 = vst.msk [vmem:[#allocation3 + $0x28] sm:$0xff] %vm200_vm2, %v655_v62  ;;  %3329 = vmatprep.subr.bf16.mxu1 %v3783_v0 }
0x15ba   :  { %502 = vrot.lane.b32.xlu1 %v4023_v36, %s3787_s4  ;;  %v1399_v36 = vpop.permute.xlu1 %1398 }
0x15bb   :  { %v351_v40 = vpop.permute.xlu0 %350  ;;  %v1401_v63 = vmul.f32 %v4226_v45, %v1399_v36  ;;  %v1437_v26 = vld [vmem:[#allocation3 + $0x18] sm:$0xff] }
0x15bc   :  { %353 = vst.msk [vmem:[#allocation3 + $0x38] sm:$0xff] %vm200_vm2, %v351_v40 }
0x15be   :  { %497 = vrot.lane.b32.xlu1 %v4018_v23, %s3787_s4  ;;  %v4292_v23 = vld [vmem:[%s4721_s6 + $0x8] sm:$0xff]  }
0x15bf   :  { %v346_v24 = vpop.permute.xlu0 %345  ;;  %3330 = vmatpush3.bf16.msra.mxu1 %v4292_v23  ;;  %v1439_v7 = vld [vmem:[#allocation3 + $0x28] sm:$0xff] }
0x15c0   :  { %348 = vst.msk [vmem:[#allocation2] sm:$0xff] %vm200_vm2, %v346_v24  ;;  %3335 = vmatprep.subr.bf16.mxu1 %v3783_v0 }
0x15c2   :  { %801 = vrot.lane.b32.xlu1 %v4098_v15, %s3787_s4  ;;  %3332 = vmatmul.mubr.bf16.vlgmr.msra.gmra.mrb[40].mxu1 %v3784_v2 }
0x15c3   :  { %v650_v28 = vpop.permute.xlu0 %649  ;;  %3339 = vmatprep.mubr.msk.bf16.mxu1 %vm3785_vm0, %v3783_v0  ;;  %v1441_v44 = vld [vmem:[#allocation3 + $0x38] sm:$0xff] }
0x15c4   :  { %652 = vst.msk [vmem:[#allocation2 + $0x10] sm:$0xff] %vm200_vm2, %v650_v28 }
0x15c6   :  { %1105 = vrot.lane.b32.xlu1 %v4178_v5, %s3787_s4  ;;  %v4307_v5 = vld [vmem:[%s4722_s7] sm:$0xff]  }
0x15c7   :  { %v954_v15 = vpop.permute.xlu0 %953  ;;  %3336 = vmatpush3.bf16.msra.mxu1 %v4307_v5  ;;  %v1418_v47 = vld [vmem:[#allocation2] sm:$0xff] }
0x15c8   :  { %956 = vst.msk [vmem:[#allocation2 + $0x20] sm:$0xff] %vm200_vm2, %v954_v15  ;;  %3337 = vmatprep.subr.bf16.mxu1 %v3783_v0 }
0x15ca   :  { %1409 = vrot.lane.b32.xlu1 %v1401_v63, %s3787_s4 }
0x15cb   :  { %v1258_v48 = vpop.permute.xlu0 %1257  ;;  %3338 = vmatpush3.bf16.msra.mxu1 %v4313_v4  ;;  %v1420_v49 = vld [vmem:[#allocation2 + $0x10] sm:$0xff] }
0x15cc   :  { %1260 = vst.msk [vmem:[#allocation2 + $0x30] sm:$0xff] %vm200_vm2, %v1258_v48  ;;  %3343 = vmatprep.subr.bf16.mxu1 %v3783_v0 }
0x15ce   :  { %3340 = vmatmul.mubr.bf16.vlgmr.msra.gmra.mrb[44].mxu1 %v3784_v2 }
0x15cf   :  { %3344 = vmatpush3.bf16.msra.mxu1 %v4284_v31  ;;  %3347 = vmatprep.mubr.msk.bf16.mxu1 %vm3785_vm0, %v3783_v0  ;;  %v1422_v55 = vld [vmem:[#allocation2 + $0x20] sm:$0xff] }
0x15d0   :  { %3345 = vmatprep.subr.bf16.mxu1 %v3783_v0 }
0x15d3   :  { %3346 = vmatpush3.bf16.msra.mxu1 %v4292_v23  ;;  %v1424_v50 = vld [vmem:[#allocation2 + $0x30] sm:$0xff] }
0x15d4   :  { %3351 = vmatprep.subr.bf16.mxu1 %v3783_v0 }
0x1620   :  { %v1415_v1 = vpop.permute.xlu1 %1414 }
0x1621   :  { %1417 = vst.msk [vmem:[#allocation3] sm:$0xff] %vm200_vm2, %v1415_v1 }
0x1624   :  { %v1111_v52 = vpop.permute.xlu1 %1110 }
0x1625   :  { %1113 = vst.msk [vmem:[#allocation3 + $0x10] sm:$0xff] %vm200_vm2, %v1111_v52 }
0x1628   :  { %v807_v8 = vpop.permute.xlu1 %806  ;;  %v1434_v56 = vld [vmem:[#allocation3] sm:$0xff] }
0x1629   :  { %809 = vst.msk [vmem:[#allocation3 + $0x20] sm:$0xff] %vm200_vm2, %v807_v8  ;;  %v1442_v20 = vpack.c.bf16 %v1435_v17, %v1434_v56 }
0x162b   :  { %3044 = vmatmul.mubr.msk.bf16.vlgmr.msra.gmra.mrb[40].mxu0 %vm200_vm2, %v1442_v20 }
0x162c   :  { %1588 = vmatpush1.bf16.msra.mxu0 %v3509_v11  ;;  %v503_v12 = vpop.permute.xlu1 %502  ;;  %1524 = vmatprep.mubr.bf16.mxu0 %v3784_v2  ;;  %v1436_v21 = vld [vmem:[#allocation3 + $0x10] sm:$0xff] }
0x162d   :  { %505 = vst.msk [vmem:[#allocation3 + $0x30] sm:$0xff] %vm200_vm2, %v503_v12  ;;  %1589 = vmatprep.subr.bf16.mxu0 %v3514_v25  ;;  %v1443_v29 = vpack.c.bf16 %v1437_v26, %v1436_v21 }
0x1630   :  { %v498_v3 = vpop.permute.xlu1 %497  ;;  %1590 = vmatpush1.bf16.msra.mxu0 %v3512_v18  ;;  %v1438_v6 = vld [vmem:[#allocation3 + $0x20] sm:$0xff] }
0x1631   :  { %500 = vst.msk [vmem:[#allocation2 + $0x8] sm:$0xff] %vm200_vm2, %v498_v3  ;;  %3391 = vmatprep.subr.bf16.mxu0 %v3783_v0  ;;  %v1444_v42 = vpack.c.bf16 %v1439_v7, %v1438_v6 }
0x1633   :  { %3045 = vmatmul.mubr.msk.bf16.gmra.mrb[44].mxu0 %vm200_vm2, %v1443_v29 }
0x1634   :  { %v802_v39 = vpop.permute.xlu1 %801  ;;  %1534 = vmatprep.mubr.bf16.mxu0 %v3784_v2  ;;  %v1440_v43 = vld [vmem:[#allocation3 + $0x30] sm:$0xff] }
0x1635   :  { %804 = vst.msk [vmem:[#allocation2 + $0x18] sm:$0xff] %vm200_vm2, %v802_v39  ;;  %v1445_v45 = vpack.c.bf16 %v1441_v44, %v1440_v43 }
0x1638   :  { %v1106_v41 = vpop.permute.xlu1 %1105  ;;  %v1419_v9 = vld [vmem:[#allocation2 + $0x8] sm:$0xff] }
0x1639   :  { %1108 = vst.msk [vmem:[#allocation2 + $0x28] sm:$0xff] %vm200_vm2, %v1106_v41  ;;  %v1426_v22 = vpack.c.bf16 %v1419_v9, %v1418_v47 }
0x163b   :  { %3046 = vmatmul.mubr.msk.bf16.gmra.mrb[48].mxu0 %vm200_vm2, %v1444_v42 }
0x163c   :  { %v1410_v58 = vpop.permute.xlu1 %1409  ;;  %1544 = vmatprep.mubr.bf16.mxu0 %v3784_v2  ;;  %v1421_v54 = vld [vmem:[#allocation2 + $0x18] sm:$0xff] }
0x163d   :  { %1412 = vst.msk [vmem:[#allocation2 + $0x38] sm:$0xff] %vm200_vm2, %v1410_v58  ;;  %v1427_v51 = vpack.c.bf16 %v1421_v54, %v1420_v49 }
0x1640   :  { %v1423_v53 = vld [vmem:[#allocation2 + $0x28] sm:$0xff] }
0x1641   :  { %v1428_v57 = vpack.c.bf16 %v1423_v53, %v1422_v55 }
0x1643   :  { %3047 = vmatmul.mubr.msk.bf16.gmra.mrb[52].mxu0 %vm200_vm2, %v1445_v45 }
0x1644   :  { %1619 = vmatprep.mubr.bf16.mxu0 %v3784_v2  ;;  %v1425_v27 = vld [vmem:[#allocation2 + $0x38] sm:$0xff] }
0x1645   :  { %v1429_v59 = vpack.c.bf16 %v1425_v27, %v1424_v50 }
0x164b   :  { %3052 = vmatmul.mubr.msk.bf16.vlgmr.msra.gmra.mrb[40].mxu0 %vm200_vm2, %v1426_v22 }
0x164c   :  { %1629 = vmatprep.mubr.bf16.mxu0 %v3784_v2  ;;  %3392 = vmatpush3.bf16.msra.mxu0 %v4284_v31 }
0x164d   :  { %3393 = vmatprep.subr.bf16.mxu0 %v3783_v0 }
0x1650   :  { %3394 = vmatpush3.bf16.msra.mxu0 %v4292_v23 }
0x1651   :  { %3407 = vmatprep.subr.bf16.mxu0 %v3783_v0 }
0x1653   :  { %3053 = vmatmul.mubr.msk.bf16.gmra.mrb[44].mxu0 %vm200_vm2, %v1427_v51 }
0x1654   :  { %1639 = vmatprep.mubr.bf16.mxu0 %v3784_v2 }
0x165b   :  { %3054 = vmatmul.mubr.msk.bf16.gmra.mrb[48].mxu0 %vm200_vm2, %v1428_v57 }
0x165c   :  { %1649 = vmatprep.mubr.bf16.mxu0 %v3784_v2  ;;  %v1660_v2 = vld [vmem:[%s4723_s8] sm:$0x3] }
0x165d   :  { %v1665_v10 = vrot.slane %v1660_v2, %v56_v14  ;;  %v1669_v61 = vrot.slane %v1660_v2, %v60_v16 }
0x1663   :  { %3055 = vmatmul.mubr.msk.bf16.gmra.mrb[52].mxu0 %vm200_vm2, %v1429_v59 }
0x1664   :  { %3395 = vmatprep.mubr.msk.bf16.mxu0 %vm3785_vm0, %v3783_v0 }
0x1695   :  { %v1742_v46 = vpop.f32.mrb[40].mxu1 }
0x1696   :  { %v3333_v60 = vpop.f32.mrb[41].mxu1 }
0x1697   :  { %v1745_v37 = vpop.f32.mrb[42].mxu1 }
0x1698   :  { %v3334_v30 = vpop.f32.mrb[43].mxu1 }
0x16a1   :  { %v1794_v38 = vpop.f32.mrb[44].mxu1 }
0x16a2   :  { %v3341_v32 = vpop.f32.mrb[45].mxu1 }
0x16a3   :  { %v1797_v19 = vpop.f32.mrb[46].mxu1 }
0x16a4   :  { %v3342_v34 = vpop.f32.mrb[47].mxu1 }
0x171e   :  { %v1621_v35 = vpop.f32.mrb[40].mxu0 }
0x171f   :  { %v1672_v33 = vadd.f32 %v1665_v10, %v1621_v35  ;;  %v1623_v62 = vpop.f32.mrb[41].mxu0 }
0x1720   :  { %v4371_v40 = vadd.f32 %v1669_v61, %v1623_v62  ;;  %v1625_v24 = vpop.f32.mrb[42].mxu0 }
0x1721   :  { %v4373_v28 = vadd.f32 %v1665_v10, %v1625_v24  ;;  %v1743_v36 = vadd.f32 %v1742_v46, %v1672_v33  ;;  %v1627_v15 = vpop.f32.mrb[43].mxu0 }
0x1722   :  { %v4375_v63 = vadd.f32 %v1669_v61, %v1627_v15 }
0x1723   :  { %3651 = vtanh.f32 %v1743_v36  ;;  %v3060_v9 = vmul.f32 -1.442695, %v1743_v36 }
0x1726   :  { %v1631_v48 = vpop.f32.mrb[44].mxu0 }
0x1727   :  { %v4377_v1 = vadd.f32 %v1665_v10, %v1631_v48  ;;  %v1633_v14 = vpop.f32.mrb[45].mxu0 }
0x1728   :  { %v4379_v52 = vadd.f32 %v1669_v61, %v1633_v14  ;;  %v1635_v13 = vpop.f32.mrb[46].mxu0 }
0x1729   :  { %v4381_v16 = vadd.f32 %v1665_v10, %v1635_v13  ;;  %v1637_v8 = vpop.f32.mrb[47].mxu0 }
0x172a   :  { %v4383_v11 = vadd.f32 %v1669_v61, %v1637_v8 }
0x172d   :  { %v3652_v56 = vpop.eup %3651 }
0x172e   :  { %v1641_v17 = vpop.f32.mrb[48].mxu0  ;;  %1816 = vrot.lane.b32.xlu0 %v3652_v56, %s3786_s0 }
0x172f   :  { %v4386_v20 = vadd.f32 %v1665_v10, %v1641_v17  ;;  %v1643_v25 = vpop.f32.mrb[49].mxu0 }
0x1730   :  { %v4388_v12 = vadd.f32 %v1669_v61, %v1643_v25  ;;  %v1645_v18 = vpop.f32.mrb[50].mxu0 }
0x1731   :  { %v4390_v21 = vadd.f32 %v1665_v10, %v1645_v18  ;;  %v1647_v3 = vpop.f32.mrb[51].mxu0 }
0x1732   :  { %v4392_v26 = vadd.f32 %v1669_v61, %v1647_v3 }
0x1736   :  { %v1651_v29 = vpop.f32.mrb[52].mxu0 }
0x1737   :  { %v4394_v39 = vadd.f32 %v1665_v10, %v1651_v29  ;;  %v1653_v6 = vpop.f32.mrb[53].mxu0 }
0x1738   :  { %v4396_v41 = vadd.f32 %v1669_v61, %v1653_v6  ;;  %v1655_v7 = vpop.f32.mrb[54].mxu0 }
0x1739   :  { %v4398_v42 = vadd.f32 %v1665_v10, %v1655_v7  ;;  %v1657_v58 = vpop.f32.mrb[55].mxu0 }
0x173a   :  { %v1687_v43 = vadd.f32 %v1669_v61, %v1657_v58 }
0x173c   :  { %v1795_v44 = vadd.f32 %v1794_v38, %v1687_v43 }
0x173e   :  { %3653 = vtanh.f32 %v1795_v44  ;;  %v3061_v54 = vmul.f32 -1.442695, %v1795_v44 }
0x173f   :  { %3655 = vpow2.f32 %v3060_v9 }
0x1748   :  { %v3654_v45 = vpop.eup %3653 }
0x1749   :  { %1827 = vrot.lane.b32.xlu1 %v3654_v45, %s3786_s0  ;;  %v3656_v47 = vpop.eup %3655 }
0x174a   :  { %v1803_v22 = vadd.f32 1.0, %v3656_v47 }
0x174c   :  { %3657 = vrcp.f32 %v1803_v22 }
0x174d   :  { %3659 = vpow2.f32 %v3061_v54 }
0x1756   :  { %v3658_v49 = vpop.eup %3657 }
0x1757   :  { %v3660_v55 = vpop.eup %3659  ;;  %v1814_v46 = vmul.f32 0.0, %v3658_v49 }
0x1758   :  { %v1809_v57 = vadd.f32 1.0, %v3660_v55 }
0x175a   :  { %3661 = vrcp.f32 %v1809_v57 }
0x1764   :  { %v3662_v27 = vpop.eup %3661 }
0x1765   :  { %v1825_v38 = vmul.f32 0.0, %v3662_v27 }
0x17a0   :  { %v1817_v51 = vpop.permute.xlu0 %1816 }
0x17a1   :  { %v1819_v53 = vmul.f32 %v3658_v49, %v1817_v51 }
0x17a3   :  { %1821 = vrot.lane.b32.xlu0 %v1819_v53, %s3786_s0 }
0x17bb   :  { %v1828_v50 = vpop.permute.xlu1 %1827 }
0x17bc   :  { %v1830_v59 = vmul.f32 %v3662_v27, %v1828_v50 }
0x17be   :  { %1832 = vrot.lane.b32.xlu1 %v1830_v59, %s3786_s0 }
0x1815   :  { %v1822_v60 = vpop.permute.xlu0 %1821 }
0x1816   :  { %v4403_v37 = vadd.f32 %v1822_v60, %v1814_v46 }
0x1818   :  { %3663 = vtanh.f32 %v4403_v37 }
0x1822   :  { %v3664_v30 = vpop.eup %3663 }
0x1823   :  { %1838 = vrot.lane.b32.xlu0 %v3664_v30, %s3786_s0 }
0x1830   :  { %v1833_v32 = vpop.permute.xlu1 %1832 }
0x1831   :  { %v4407_v19 = vadd.f32 %v1833_v32, %v1825_v38 }
0x1833   :  { %3665 = vtanh.f32 %v4407_v19 }
0x183d   :  { %v3666_v34 = vpop.eup %3665 }
0x183e   :  { %1844 = vrot.lane.b32.xlu1 %v3666_v34, %s3786_s0 }
0x1895   :  { %v1839_v2 = vpop.permute.xlu0 %1838 }
0x1896   :  { %v4411_v10 = vmul.f32 %v3658_v49, %v1839_v2 }
0x1898   :  { %v1848_v61 = vpack.c.bf16 %v4411_v10, %v4411_v10 }
0x189a   :  { %1850 = vrot.lane.b32.xlu0 %v1848_v61, %s3787_s4 }
0x18b0   :  { %v1845_v35 = vpop.permute.xlu1 %1844 }
0x18b1   :  { %v4416_v33 = vmul.f32 %v3662_v27, %v1845_v35 }
0x18b3   :  { %v1895_v62 = vpack.c.bf16 %v4416_v33, %v4416_v33 }
0x18b5   :  { %1897 = vrot.lane.b32.xlu1 %v1895_v62, %s3787_s4 }
0x190c   :  { %v1851_v24 = vpop.permute.xlu0 %1850 }
0x190d   :  { %3348 = vmatmul.mubr.msk.bf16.vlgmr.msra.gmra.mrb[48].mxu1 %vm200_vm2, %v1851_v24 }
0x190e   :  { %3352 = vmatpush3.bf16.msra.mxu1 %v4307_v5  ;;  %3355 = vmatprep.mubr.msk.bf16.mxu1 %vm3785_vm0, %v3783_v0 }
0x190f   :  { %3353 = vmatprep.subr.bf16.mxu1 %v3783_v0 }
0x1912   :  { %3354 = vmatpush3.bf16.msra.mxu1 %v4313_v4 }
0x1913   :  { %3359 = vmatprep.subr.bf16.mxu1 %v3783_v0 }
0x1927   :  { %v1898_v36 = vpop.permute.xlu1 %1897 }
0x1928   :  { %3356 = vmatmul.mubr.msk.bf16.vlgmr.msra.gmra.mrb[52].mxu1 %vm200_vm2, %v1898_v36 }
0x1929   :  { %3360 = vmatpush3.bf16.msra.mxu1 %v4284_v31  ;;  %3363 = vmatprep.mubr.msk.bf16.mxu1 %vm3785_vm0, %v3783_v0 }
0x192a   :  { %3361 = vmatprep.subr.bf16.mxu1 %v3783_v0 }
0x192d   :  { %3362 = vmatpush3.bf16.msra.mxu1 %v4292_v23 }
0x192e   :  { %3367 = vmatprep.subr.bf16.mxu1 %v3783_v0 }
0x19e0   :  { %v1889_v15 = vpop.f32.mrb[48].mxu1 }
0x19e1   :  { %v1890_v48 = vadd.f32 %v1889_v15, %v4373_v28  ;;  %v3349_v14 = vpop.f32.mrb[49].mxu1 }
0x19e2   :  { %v1892_v13 = vpop.f32.mrb[50].mxu1 }
0x19e3   :  { %3667 = vtanh.f32 %v1890_v48  ;;  %v3350_v8 = vpop.f32.mrb[51].mxu1  ;;  %v3064_v7 = vmul.f32 -1.442695, %v1890_v48 }
0x19ed   :  { %v3668_v56 = vpop.eup %3667 }
0x19ee   :  { %1958 = vrot.lane.b32.xlu0 %v3668_v56, %s3786_s0 }
0x19fb   :  { %v1936_v17 = vpop.f32.mrb[52].mxu1 }
0x19fc   :  { %v1937_v25 = vadd.f32 %v1936_v17, %v4396_v41  ;;  %v3357_v18 = vpop.f32.mrb[53].mxu1 }
0x19fd   :  { %v1939_v3 = vpop.f32.mrb[54].mxu1 }
0x19fe   :  { %3669 = vtanh.f32 %v1937_v25  ;;  %v3358_v29 = vpop.f32.mrb[55].mxu1  ;;  %v3065_v43 = vmul.f32 -1.442695, %v1937_v25 }
0x19ff   :  { %3671 = vpow2.f32 %v3064_v7 }
0x1a08   :  { %v3670_v6 = vpop.eup %3669 }
0x1a09   :  { %1969 = vrot.lane.b32.xlu1 %v3670_v6, %s3786_s0  ;;  %v3672_v28 = vpop.eup %3671 }
0x1a0a   :  { %v1945_v58 = vadd.f32 1.0, %v3672_v28 }
0x1a0c   :  { %3673 = vrcp.f32 %v1945_v58 }
0x1a0d   :  { %3675 = vpow2.f32 %v3065_v43 }
0x1a16   :  { %v3674_v44 = vpop.eup %3673 }
0x1a17   :  { %v3676_v41 = vpop.eup %3675  ;;  %v1956_v51 = vmul.f32 %v3674_v44, %v4403_v37 }
0x1a18   :  { %v1951_v47 = vadd.f32 1.0, %v3676_v41 }
0x1a1a   :  { %3677 = vrcp.f32 %v1951_v47 }
0x1a24   :  { %v3678_v22 = vpop.eup %3677 }
0x1a25   :  { %v1967_v27 = vmul.f32 %v3678_v22, %v4407_v19 }
0x1a60   :  { %v1959_v45 = vpop.permute.xlu0 %1958 }
0x1a61   :  { %v1961_v9 = vmul.f32 %v3674_v44, %v1959_v45 }
0x1a63   :  { %1963 = vrot.lane.b32.xlu0 %v1961_v9, %s3786_s0 }
0x1a7b   :  { %v1970_v54 = vpop.permute.xlu1 %1969 }
0x1a7c   :  { %v1972_v49 = vmul.f32 %v3678_v22, %v1970_v54 }
0x1a7e   :  { %1974 = vrot.lane.b32.xlu1 %v1972_v49, %s3786_s0 }
0x1ad5   :  { %v1964_v53 = vpop.permute.xlu0 %1963 }
0x1ad6   :  { %v4442_v55 = vadd.f32 %v1964_v53, %v1956_v51 }
0x1ad8   :  { %3679 = vtanh.f32 %v4442_v55 }
0x1ae2   :  { %v3680_v57 = vpop.eup %3679 }
0x1ae3   :  { %1980 = vrot.lane.b32.xlu0 %v3680_v57, %s3786_s0 }
0x1af0   :  { %v1975_v50 = vpop.permute.xlu1 %1974 }
0x1af1   :  { %v4447_v59 = vadd.f32 %v1975_v50, %v1967_v27 }
0x1af3   :  { %3681 = vtanh.f32 %v4447_v59 }
0x1afd   :  { %v3682_v46 = vpop.eup %3681 }
0x1afe   :  { %1986 = vrot.lane.b32.xlu1 %v3682_v46, %s3786_s0 }
0x1b55   :  { %v1981_v60 = vpop.permute.xlu0 %1980 }
0x1b56   :  { %v4451_v37 = vmul.f32 %v3674_v44, %v1981_v60 }
0x1b58   :  { %v1992_v30 = vpack.c.bf16 %v4451_v37, %v4451_v37 }
0x1b5a   :  { %1994 = vrot.lane.b32.xlu0 %v1992_v30, %s3787_s4 }
0x1b70   :  { %v1987_v38 = vpop.permute.xlu1 %1986 }
0x1b71   :  { %v4456_v32 = vmul.f32 %v3678_v22, %v1987_v38 }
0x1b73   :  { %v2039_v19 = vpack.c.bf16 %v4456_v32, %v4456_v32 }
0x1b75   :  { %2041 = vrot.lane.b32.xlu1 %v2039_v19, %s3787_s4 }
0x1bcc   :  { %v1995_v34 = vpop.permute.xlu0 %1994 }
0x1bcd   :  { %3364 = vmatmul.mubr.msk.bf16.vlgmr.msra.gmra.mrb[56].mxu1 %vm200_vm2, %v1995_v34 }
0x1bce   :  { %3368 = vmatpush3.bf16.msra.mxu1 %v4307_v5  ;;  %3371 = vmatprep.mubr.msk.bf16.mxu1 %vm3785_vm0, %v3783_v0 }
0x1bcf   :  { %3369 = vmatprep.subr.bf16.mxu1 %v3783_v0 }
0x1bd2   :  { %3370 = vmatpush3.bf16.msra.mxu1 %v4313_v4 }
0x1bd3   :  { %3375 = vmatprep.subr.bf16.mxu1 %v3783_v0 }
0x1be7   :  { %v2042_v2 = vpop.permute.xlu1 %2041 }
0x1be8   :  { %3372 = vmatmul.mubr.msk.bf16.vlgmr.msra.gmra.mrb[60].mxu1 %vm200_vm2, %v2042_v2 }
0x1be9   :  { %3376 = vmatpush3.bf16.msra.mxu1 %v4284_v31  ;;  %3379 = vmatprep.mubr.msk.bf16.mxu1 %vm3785_vm0, %v3783_v0 }
0x1bea   :  { %3377 = vmatprep.subr.bf16.mxu1 %v3783_v0 }
0x1bed   :  { %3378 = vmatpush3.bf16.msra.mxu1 %v4292_v23 }
0x1bee   :  { %3383 = vmatprep.subr.bf16.mxu1 %v3783_v0 }
0x1ca0   :  { %v2033_v61 = vpop.f32.mrb[56].mxu1 }
0x1ca1   :  { %v2034_v35 = vadd.f32 %v2033_v61, %v4377_v1  ;;  %v3365_v62 = vpop.f32.mrb[57].mxu1 }
0x1ca2   :  { %v2036_v24 = vpop.f32.mrb[58].mxu1 }
0x1ca3   :  { %3683 = vtanh.f32 %v2034_v35  ;;  %v3366_v36 = vpop.f32.mrb[59].mxu1  ;;  %v3068_v25 = vmul.f32 -1.442695, %v2034_v35 }
0x1cad   :  { %v3684_v15 = vpop.eup %3683 }
0x1cae   :  { %2102 = vrot.lane.b32.xlu0 %v3684_v15, %s3786_s0 }
0x1cbb   :  { %v2080_v48 = vpop.f32.mrb[60].mxu1 }
0x1cbc   :  { %v2081_v14 = vadd.f32 %v2080_v48, %v4392_v26  ;;  %v3373_v13 = vpop.f32.mrb[61].mxu1 }
0x1cbd   :  { %v2083_v8 = vpop.f32.mrb[62].mxu1 }
0x1cbe   :  { %3685 = vtanh.f32 %v2081_v14  ;;  %v3374_v56 = vpop.f32.mrb[63].mxu1  ;;  %v3069_v3 = vmul.f32 -1.442695, %v2081_v14 }
0x1cbf   :  { %3687 = vpow2.f32 %v3068_v25 }
0x1cc8   :  { %v3686_v17 = vpop.eup %3685 }
0x1cc9   :  { %2113 = vrot.lane.b32.xlu1 %v3686_v17, %s3786_s0  ;;  %v3688_v1 = vpop.eup %3687 }
0x1cca   :  { %v2089_v18 = vadd.f32 1.0, %v3688_v1 }
0x1ccc   :  { %3689 = vrcp.f32 %v2089_v18 }
0x1ccd   :  { %3691 = vpow2.f32 %v3069_v3 }
0x1cd6   :  { %v3690_v29 = vpop.eup %3689 }
0x1cd7   :  { %v3692_v26 = vpop.eup %3691  ;;  %v2100_v45 = vmul.f32 %v3690_v29, %v4442_v55  ;;  %v1990_v55 = vmax.f32 %v4411_v10, %v4451_v37 }
0x1cd8   :  { %v2095_v28 = vadd.f32 1.0, %v3692_v26 }
0x1cda   :  { %3693 = vrcp.f32 %v2095_v28 }
0x1ce4   :  { %v3694_v58 = vpop.eup %3693 }
0x1ce5   :  { %v2111_v22 = vmul.f32 %v3694_v58, %v4447_v59  ;;  %v1991_v59 = vmax.f32 %v4416_v33, %v4456_v32 }
0x1d20   :  { %v2103_v6 = vpop.permute.xlu0 %2102 }
0x1d21   :  { %v2105_v7 = vmul.f32 %v3690_v29, %v2103_v6 }
0x1d23   :  { %2107 = vrot.lane.b32.xlu0 %v2105_v7, %s3786_s0 }
0x1d3b   :  { %v2114_v43 = vpop.permute.xlu1 %2113 }
0x1d3c   :  { %v2116_v44 = vmul.f32 %v3694_v58, %v2114_v43 }
0x1d3e   :  { %2118 = vrot.lane.b32.xlu1 %v2116_v44, %s3786_s0 }
0x1d95   :  { %v2108_v9 = vpop.permute.xlu0 %2107 }
0x1d96   :  { %v4482_v41 = vadd.f32 %v2108_v9, %v2100_v45 }
0x1d98   :  { %3695 = vtanh.f32 %v4482_v41 }
0x1da2   :  { %v3696_v47 = vpop.eup %3695 }
0x1da3   :  { %2124 = vrot.lane.b32.xlu0 %v3696_v47, %s3786_s0 }
0x1db0   :  { %v2119_v54 = vpop.permute.xlu1 %2118 }
0x1db1   :  { %v4487_v49 = vadd.f32 %v2119_v54, %v2111_v22 }
0x1db3   :  { %3697 = vtanh.f32 %v4487_v49 }
0x1dbd   :  { %v3698_v51 = vpop.eup %3697 }
0x1dbe   :  { %2130 = vrot.lane.b32.xlu1 %v3698_v51, %s3786_s0 }
0x1e15   :  { %v2125_v53 = vpop.permute.xlu0 %2124 }
0x1e16   :  { %v2127_v57 = vmul.f32 %v3690_v29, %v2125_v53 }
0x1e18   :  { %v4493_v27 = vmax.f32 %v1990_v55, %v2127_v57  ;;  %v2136_v50 = vpack.c.bf16 %v2127_v57, %v2127_v57 }
0x1e1a   :  { %2138 = vrot.lane.b32.xlu0 %v2136_v50, %s3787_s4 }
0x1e30   :  { %v2131_v46 = vpop.permute.xlu1 %2130 }
0x1e31   :  { %v2133_v60 = vmul.f32 %v3694_v58, %v2131_v46 }
0x1e33   :  { %v4498_v30 = vmax.f32 %v1991_v59, %v2133_v60  ;;  %v2183_v38 = vpack.c.bf16 %v2133_v60, %v2133_v60 }
0x1e35   :  { %2185 = vrot.lane.b32.xlu1 %v2183_v38, %s3787_s4 }
0x1e8c   :  { %v2139_v19 = vpop.permute.xlu0 %2138 }
0x1e8d   :  { %3380 = vmatmul.mubr.msk.bf16.vlgmr.msra.gmra.mrb[64].mxu1 %vm200_vm2, %v2139_v19 }
0x1e8e   :  { %3384 = vmatpush3.bf16.msra.mxu1 %v4307_v5  ;;  %3387 = vmatprep.mubr.msk.bf16.mxu1 %vm3785_vm0, %v3783_v0 }
0x1e8f   :  { %3385 = vmatprep.subr.bf16.mxu1 %v3783_v0 }
0x1e92   :  { %3386 = vmatpush3.bf16.msra.mxu1 %v4313_v4 }
0x1e93   :  { %3399 = vmatprep.subr.bf16.mxu1 %v3783_v0 }
0x1ea7   :  { %v2186_v10 = vpop.permute.xlu1 %2185 }
0x1ea8   :  { %3388 = vmatmul.mubr.msk.bf16.vlgmr.msra.gmra.mrb[68].mxu1 %vm200_vm2, %v2186_v10 }
0x1ea9   :  { %3400 = vmatpush3.bf16.msra.mxu1 %v4307_v5  ;;  %3403 = vmatprep.mubr.msk.bf16.mxu1 %vm3785_vm0, %v3783_v0 }
0x1eaa   :  { %3401 = vmatprep.subr.bf16.mxu1 %v3783_v0 }
0x1ead   :  { %3402 = vmatpush3.bf16.msra.mxu1 %v4313_v4 }
0x1eae   :  { %3415 = vmatprep.subr.bf16.mxu1 %v3783_v0 }
0x1f60   :  { %v2177_v33 = vpop.f32.mrb[64].mxu1 }
0x1f61   :  { %v2178_v37 = vadd.f32 %v2177_v33, %v4381_v16  ;;  %v3381_v32 = vpop.f32.mrb[65].mxu1 }
0x1f62   :  { %v2180_v34 = vpop.f32.mrb[66].mxu1 }
0x1f63   :  { %3699 = vtanh.f32 %v2178_v37  ;;  %v3382_v2 = vpop.f32.mrb[67].mxu1  ;;  %v3072_v14 = vmul.f32 -1.442695, %v2178_v37 }
0x1f6d   :  { %v3700_v61 = vpop.eup %3699 }
0x1f6e   :  { %2246 = vrot.lane.b32.xlu0 %v3700_v61, %s3786_s0 }
0x1f7b   :  { %v2224_v35 = vpop.f32.mrb[68].mxu1 }
0x1f7c   :  { %v2225_v62 = vadd.f32 %v2224_v35, %v4388_v12  ;;  %v3389_v24 = vpop.f32.mrb[69].mxu1 }
0x1f7d   :  { %v2227_v36 = vpop.f32.mrb[70].mxu1 }
0x1f7e   :  { %3701 = vtanh.f32 %v2225_v62  ;;  %v3390_v15 = vpop.f32.mrb[71].mxu1  ;;  %v3073_v8 = vmul.f32 -1.442695, %v2225_v62 }
0x1f7f   :  { %3703 = vpow2.f32 %v3072_v14 }
0x1f88   :  { %v3702_v48 = vpop.eup %3701 }
0x1f89   :  { %2257 = vrot.lane.b32.xlu1 %v3702_v48, %s3786_s0  ;;  %v3704_v16 = vpop.eup %3703 }
0x1f8a   :  { %v2233_v13 = vadd.f32 1.0, %v3704_v16 }
0x1f8c   :  { %3705 = vrcp.f32 %v2233_v13 }
0x1f8d   :  { %3707 = vpow2.f32 %v3073_v8 }
0x1f96   :  { %v3706_v56 = vpop.eup %3705 }
0x1f97   :  { %v3708_v12 = vpop.eup %3707  ;;  %v2244_v6 = vmul.f32 %v3706_v56, %v4482_v41 }
0x1f98   :  { %v2239_v1 = vadd.f32 1.0, %v3708_v12 }
0x1f9a   :  { %3709 = vrcp.f32 %v2239_v1 }
0x1fa4   :  { %v3710_v18 = vpop.eup %3709 }
0x1fa5   :  { %v2255_v58 = vmul.f32 %v3710_v18, %v4487_v49 }
0x1fe0   :  { %v2247_v17 = vpop.permute.xlu0 %2246 }
0x1fe1   :  { %v2249_v25 = vmul.f32 %v3706_v56, %v2247_v17 }
0x1fe3   :  { %2251 = vrot.lane.b32.xlu0 %v2249_v25, %s3786_s0 }
0x1ffb   :  { %v2258_v3 = vpop.permute.xlu1 %2257 }
0x1ffc   :  { %v2260_v29 = vmul.f32 %v3710_v18, %v2258_v3 }
0x1ffe   :  { %2262 = vrot.lane.b32.xlu1 %v2260_v29, %s3786_s0 }
0x2055   :  { %v2252_v7 = vpop.permute.xlu0 %2251 }
0x2056   :  { %v4522_v26 = vadd.f32 %v2252_v7, %v2244_v6 }
0x2058   :  { %3711 = vtanh.f32 %v4522_v26 }
0x2062   :  { %v3712_v28 = vpop.eup %3711 }
0x2063   :  { %2268 = vrot.lane.b32.xlu0 %v3712_v28, %s3786_s0 }
0x2070   :  { %v2263_v43 = vpop.permute.xlu1 %2262 }
0x2071   :  { %v4527_v44 = vadd.f32 %v2263_v43, %v2255_v58 }
0x2073   :  { %3713 = vtanh.f32 %v4527_v44 }
0x207d   :  { %v3714_v45 = vpop.eup %3713 }
0x207e   :  { %2274 = vrot.lane.b32.xlu1 %v3714_v45, %s3786_s0 }
0x20d5   :  { %v2269_v9 = vpop.permute.xlu0 %2268 }
0x20d6   :  { %v4531_v41 = vmul.f32 %v3706_v56, %v2269_v9 }
0x20d8   :  { %v2278_v47 = vmax.f32 %v4493_v27, %v4531_v41  ;;  %v2280_v22 = vpack.c.bf16 %v4531_v41, %v4531_v41 }
0x20da   :  { %2282 = vrot.lane.b32.xlu0 %v2280_v22, %s3787_s4 }
0x20f0   :  { %v2275_v54 = vpop.permute.xlu1 %2274 }
0x20f1   :  { %v4538_v49 = vmul.f32 %v3710_v18, %v2275_v54 }
0x20f3   :  { %v2279_v51 = vmax.f32 %v4498_v30, %v4538_v49  ;;  %v2327_v53 = vpack.c.bf16 %v4538_v49, %v4538_v49 }
0x20f5   :  { %2329 = vrot.lane.b32.xlu1 %v2327_v53, %s3787_s4 }
0x214c   :  { %v2283_v55 = vpop.permute.xlu0 %2282 }
0x214d   :  { %3396 = vmatmul.mubr.msk.bf16.vlgmr.msra.gmra.mrb[56].mxu0 %vm200_vm2, %v2283_v55 }
0x214e   :  { %3408 = vmatpush3.bf16.msra.mxu0 %v4284_v31  ;;  %3411 = vmatprep.mubr.msk.bf16.mxu0 %vm3785_vm0, %v3783_v0 }
0x214f   :  { %3409 = vmatprep.subr.bf16.mxu0 %v3783_v0 }
0x2152   :  { %3410 = vmatpush3.bf16.msra.mxu0 %v4292_v23 }
0x2153   :  { %3423 = vmatprep.subr.bf16.mxu0 %v3783_v0 }
0x2167   :  { %v2330_v57 = vpop.permute.xlu1 %2329 }
0x2168   :  { %3404 = vmatmul.mubr.msk.bf16.vlgmr.msra.gmra.mrb[72].mxu1 %vm200_vm2, %v2330_v57 }
0x2169   :  { %3416 = vmatpush3.bf16.msra.mxu1 %v4307_v5  ;;  %3419 = vmatprep.mubr.msk.bf16.mxu1 %vm3785_vm0, %v3783_v0 }
0x216a   :  { %3417 = vmatprep.subr.bf16.mxu1 %v3783_v0 }
0x216d   :  { %3418 = vmatpush3.bf16.msra.mxu1 %v4313_v4 }
0x216e   :  { %3431 = vmatprep.subr.bf16.mxu1 %v3783_v0 }
0x2220   :  { %v2321_v50 = vpop.f32.mrb[56].mxu0 }
0x2221   :  { %v2322_v46 = vadd.f32 %v2321_v50, %v4386_v20  ;;  %v3397_v59 = vpop.f32.mrb[57].mxu0 }
0x2222   :  { %v2324_v60 = vpop.f32.mrb[58].mxu0 }
0x2223   :  { %3715 = vtanh.f32 %v2322_v46  ;;  %v3398_v38 = vpop.f32.mrb[59].mxu0  ;;  %v3076_v61 = vmul.f32 -1.442695, %v2322_v46 }
0x222d   :  { %v3716_v19 = vpop.eup %3715 }
0x222e   :  { %2390 = vrot.lane.b32.xlu0 %v3716_v19, %s3786_s0 }
0x223b   :  { %v2368_v10 = vpop.f32.mrb[72].mxu1 }
0x223c   :  { %v2369_v33 = vadd.f32 %v2368_v10, %v4383_v11  ;;  %v3405_v37 = vpop.f32.mrb[73].mxu1 }
0x223d   :  { %v2371_v32 = vpop.f32.mrb[74].mxu1 }
0x223e   :  { %3717 = vtanh.f32 %v2369_v33  ;;  %v3406_v34 = vpop.f32.mrb[75].mxu1  ;;  %v3077_v62 = vmul.f32 -1.442695, %v2369_v33 }
0x223f   :  { %3719 = vpow2.f32 %v3076_v61 }
0x2248   :  { %v3718_v2 = vpop.eup %3717 }
0x2249   :  { %2401 = vrot.lane.b32.xlu1 %v3718_v2, %s3786_s0  ;;  %v3720_v20 = vpop.eup %3719 }
0x224a   :  { %v2377_v35 = vadd.f32 1.0, %v3720_v20 }
0x224c   :  { %3721 = vrcp.f32 %v2377_v35 }
0x224d   :  { %3723 = vpow2.f32 %v3077_v62 }
0x2256   :  { %v3722_v24 = vpop.eup %3721 }
0x2257   :  { %v3724_v11 = vpop.eup %3723  ;;  %v2388_v8 = vmul.f32 %v3722_v24, %v4522_v26 }
0x2258   :  { %v2383_v48 = vadd.f32 1.0, %v3724_v11 }
0x225a   :  { %3725 = vrcp.f32 %v2383_v48 }
0x2264   :  { %v3726_v14 = vpop.eup %3725 }
0x2265   :  { %v2399_v12 = vmul.f32 %v3726_v14, %v4527_v44 }
0x22a0   :  { %v2391_v36 = vpop.permute.xlu0 %2390 }
0x22a1   :  { %v2393_v15 = vmul.f32 %v3722_v24, %v2391_v36 }
0x22a3   :  { %2395 = vrot.lane.b32.xlu0 %v2393_v15, %s3786_s0 }
0x22bb   :  { %v2402_v16 = vpop.permute.xlu1 %2401 }
0x22bc   :  { %v2404_v13 = vmul.f32 %v3726_v14, %v2402_v16 }
0x22be   :  { %2406 = vrot.lane.b32.xlu1 %v2404_v13, %s3786_s0 }
0x2315   :  { %v2396_v56 = vpop.permute.xlu0 %2395 }
0x2316   :  { %v4566_v17 = vadd.f32 %v2396_v56, %v2388_v8  ;;  %v3779_v8 = vld [vmem:[%s4721_s6] sm:$0xff]   ;;  %v3780_v56 = vld [vmem:[%s4721_s6 + $0x8] sm:$0xff]  }
0x2318   :  { %3727 = vtanh.f32 %v4566_v17 }
0x2322   :  { %v3728_v25 = vpop.eup %3727 }
0x2323   :  { %2412 = vrot.lane.b32.xlu0 %v3728_v25, %s3786_s0  ;;  %v3781_v25 = vld [vmem:[%s4722_s7] sm:$0xff]  }
0x2330   :  { %v2407_v1 = vpop.permute.xlu1 %2406 }
0x2331   :  { %v4571_v18 = vadd.f32 %v2407_v1, %v2399_v12  ;;  %v3782_v12 = vld [vmem:[%s4722_s7 + $0x8] sm:$0xff]  }
0x2333   :  { %3729 = vtanh.f32 %v4571_v18 }
0x233d   :  { %v3730_v3 = vpop.eup %3729 }
0x233e   :  { %2418 = vrot.lane.b32.xlu1 %v3730_v3, %s3786_s0 }
0x2395   :  { %v2413_v29 = vpop.permute.xlu0 %2412 }
0x2396   :  { %v2415_v6 = vmul.f32 %v3722_v24, %v2413_v29 }
0x2398   :  { %v4578_v7 = vmax.f32 %v2278_v47, %v2415_v6  ;;  %v2424_v26 = vpack.c.bf16 %v2415_v6, %v2415_v6 }
0x239a   :  { %2426 = vrot.lane.b32.xlu0 %v2424_v26, %s3787_s4 }
0x23b0   :  { %v2419_v28 = vpop.permute.xlu1 %2418 }
0x23b1   :  { %v2421_v58 = vmul.f32 %v3726_v14, %v2419_v28 }
0x23b3   :  { %v4584_v43 = vmax.f32 %v2279_v51, %v2421_v58  ;;  %v2471_v44 = vpack.c.bf16 %v2421_v58, %v2421_v58 }
0x23b5   :  { %2473 = vrot.lane.b32.xlu1 %v2471_v44, %s3787_s4 }
0x240c   :  { %v2427_v45 = vpop.permute.xlu0 %2426 }
0x240d   :  { %3412 = vmatmul.mubr.msk.bf16.vlgmr.msra.gmra.mrb[60].mxu0 %vm200_vm2, %v2427_v45 }
0x240e   :  { %3424 = vmatpush3.bf16.msra.mxu0 %v4284_v31  ;;  %3427 = vmatprep.mubr.msk.bf16.mxu0 %vm3785_vm0, %v3783_v0 }
0x240f   :  { %3425 = vmatprep.subr.bf16.mxu0 %v3783_v0 }
0x2412   :  { %3426 = vmatpush3.bf16.msra.mxu0 %v4292_v23 }
0x2413   :  { %3439 = vmatprep.subr.bf16.mxu0 %v3783_v0 }
0x2427   :  { %v2474_v27 = vpop.permute.xlu1 %2473 }
0x2428   :  { %3420 = vmatmul.mubr.msk.bf16.vlgmr.msra.gmra.mrb[76].mxu1 %vm200_vm2, %v2474_v27 }
0x2429   :  { %3432 = vmatpush3.bf16.msra.mxu1 %v4307_v5  ;;  %3435 = vmatprep.mubr.msk.bf16.mxu1 %vm3785_vm0, %v3783_v0 }
0x242a   :  { %3433 = vmatprep.subr.bf16.mxu1 %v3783_v0 }
0x242d   :  { %3434 = vmatpush3.bf16.msra.mxu1 %v4313_v4 }
0x242e   :  { %3447 = vmatprep.subr.bf16.mxu1 %v3783_v0 }
0x24e0   :  { %v2465_v31 = vpop.f32.mrb[60].mxu0 }
0x24e1   :  { %v2466_v30 = vadd.f32 %v2465_v31, %v4390_v21  ;;  %v3413_v23 = vpop.f32.mrb[61].mxu0 }
0x24e2   :  { %v2468_v9 = vpop.f32.mrb[62].mxu0 }
0x24e3   :  { %3731 = vtanh.f32 %v2466_v30  ;;  %v3414_v41 = vpop.f32.mrb[63].mxu0  ;;  %v3080_v53 = vmul.f32 -1.442695, %v2466_v30 }
0x24ed   :  { %v3732_v47 = vpop.eup %3731 }
0x24ee   :  { %2534 = vrot.lane.b32.xlu0 %v3732_v47, %s3786_s0 }
0x24fb   :  { %v2512_v5 = vpop.f32.mrb[76].mxu1 }
0x24fc   :  { %v2513_v22 = vadd.f32 %v2512_v5, %v4379_v52  ;;  %v3421_v54 = vpop.f32.mrb[77].mxu1 }
0x24fd   :  { %v2515_v49 = vpop.f32.mrb[78].mxu1 }
0x24fe   :  { %3733 = vtanh.f32 %v2513_v22  ;;  %v3422_v51 = vpop.f32.mrb[79].mxu1  ;;  %v3081_v57 = vmul.f32 -1.442695, %v2513_v22 }
0x24ff   :  { %3735 = vpow2.f32 %v3080_v53 }
0x2508   :  { %v3734_v4 = vpop.eup %3733 }
0x2509   :  { %2545 = vrot.lane.b32.xlu1 %v3734_v4, %s3786_s0  ;;  %v3736_v21 = vpop.eup %3735 }
0x250a   :  { %v2521_v55 = vadd.f32 1.0, %v3736_v21 }
0x250c   :  { %3737 = vrcp.f32 %v2521_v55 }
0x250d   :  { %3739 = vpow2.f32 %v3081_v57 }
0x2516   :  { %v3738_v50 = vpop.eup %3737 }
0x2517   :  { %v3740_v52 = vpop.eup %3739  ;;  %v2532_v33 = vmul.f32 %v3738_v50, %v4566_v17 }
0x2518   :  { %v2527_v60 = vadd.f32 1.0, %v3740_v52 }
0x251a   :  { %3741 = vrcp.f32 %v2527_v60 }
0x2524   :  { %v3742_v38 = vpop.eup %3741 }
0x2525   :  { %v2543_v2 = vmul.f32 %v3742_v38, %v4571_v18 }
0x2560   :  { %v2535_v46 = vpop.permute.xlu0 %2534 }
0x2561   :  { %v2537_v59 = vmul.f32 %v3738_v50, %v2535_v46 }
0x2563   :  { %2539 = vrot.lane.b32.xlu0 %v2537_v59, %s3786_s0 }
0x257b   :  { %v2546_v19 = vpop.permute.xlu1 %2545 }
0x257c   :  { %v2548_v10 = vmul.f32 %v3742_v38, %v2546_v19 }
0x257e   :  { %2550 = vrot.lane.b32.xlu1 %v2548_v10, %s3786_s0 }
0x25d5   :  { %v2540_v37 = vpop.permute.xlu0 %2539 }
0x25d6   :  { %v4608_v32 = vadd.f32 %v2540_v37, %v2532_v33 }
0x25d8   :  { %3743 = vtanh.f32 %v4608_v32 }
0x25e2   :  { %v3744_v34 = vpop.eup %3743 }
0x25e3   :  { %2556 = vrot.lane.b32.xlu0 %v3744_v34, %s3786_s0 }
0x25f0   :  { %v2551_v61 = vpop.permute.xlu1 %2550 }
0x25f1   :  { %v4613_v20 = vadd.f32 %v2551_v61, %v2543_v2 }
0x25f3   :  { %3745 = vtanh.f32 %v4613_v20 }
0x25fd   :  { %v3746_v35 = vpop.eup %3745 }
0x25fe   :  { %2562 = vrot.lane.b32.xlu1 %v3746_v35, %s3786_s0 }
0x2655   :  { %v2557_v62 = vpop.permute.xlu0 %2556 }
0x2656   :  { %v4617_v24 = vmul.f32 %v3738_v50, %v2557_v62 }
0x2658   :  { %v2566_v36 = vmax.f32 %v4578_v7, %v4617_v24  ;;  %v2568_v15 = vpack.c.bf16 %v4617_v24, %v4617_v24 }
0x265a   :  { %2570 = vrot.lane.b32.xlu0 %v2568_v15, %s3787_s4 }
0x2670   :  { %v2563_v11 = vpop.permute.xlu1 %2562 }
0x2671   :  { %v4624_v48 = vmul.f32 %v3742_v38, %v2563_v11 }
0x2673   :  { %v2567_v14 = vmax.f32 %v4584_v43, %v4624_v48  ;;  %v2615_v16 = vpack.c.bf16 %v4624_v48, %v4624_v48 }
0x2675   :  { %2617 = vrot.lane.b32.xlu1 %v2615_v16, %s3787_s4 }
0x26cc   :  { %v2571_v13 = vpop.permute.xlu0 %2570 }
0x26cd   :  { %3428 = vmatmul.mubr.msk.bf16.vlgmr.msra.gmra.mrb[64].mxu0 %vm200_vm2, %v2571_v13 }
0x26ce   :  { %3440 = vmatpush3.bf16.msra.mxu0 %v3779_v8  ;;  %3443 = vmatprep.mubr.msk.bf16.mxu0 %vm3785_vm0, %v3783_v0 }
0x26cf   :  { %3441 = vmatprep.subr.bf16.mxu0 %v3783_v0 }
0x26d2   :  { %3442 = vmatpush3.bf16.msra.mxu0 %v3780_v56 }
0x26d3   :  { %3455 = vmatprep.subr.bf16.mxu0 %v3783_v0 }
0x26e7   :  { %v2618_v17 = vpop.permute.xlu1 %2617 }
0x26e8   :  { %3436 = vmatmul.mubr.msk.bf16.vlgmr.msra.gmra.mrb[80].mxu1 %vm200_vm2, %v2618_v17 }
0x26e9   :  { %3448 = vmatpush3.bf16.msra.mxu1 %v3781_v25  ;;  %3451 = vmatprep.mubr.msk.bf16.mxu1 %vm3785_vm0, %v3783_v0 }
0x26ea   :  { %3449 = vmatprep.subr.bf16.mxu1 %v3783_v0 }
0x26ed   :  { %3450 = vmatpush3.bf16.msra.mxu1 %v3782_v12 }
0x26ee   :  { %3463 = vmatprep.subr.bf16.mxu1 %v3783_v0 }
0x27a0   :  { %v2609_v1 = vpop.f32.mrb[64].mxu0 }
0x27a1   :  { %v2610_v18 = vadd.f32 %v2609_v1, %v4394_v39  ;;  %v3429_v3 = vpop.f32.mrb[65].mxu0 }
0x27a2   :  { %v2612_v29 = vpop.f32.mrb[66].mxu0 }
0x27a3   :  { %3747 = vtanh.f32 %v2610_v18  ;;  %v3430_v6 = vpop.f32.mrb[67].mxu0  ;;  %v3084_v30 = vmul.f32 -1.442695, %v2610_v18 }
0x27ad   :  { %v3748_v26 = vpop.eup %3747 }
0x27ae   :  { %2678 = vrot.lane.b32.xlu0 %v3748_v26, %s3786_s0 }
0x27bb   :  { %v2656_v28 = vpop.f32.mrb[80].mxu1 }
0x27bc   :  { %v2657_v58 = vadd.f32 %v2656_v28, %v4375_v63  ;;  %v3437_v44 = vpop.f32.mrb[81].mxu1 }
0x27bd   :  { %v2659_v45 = vpop.f32.mrb[82].mxu1 }
0x27be   :  { %3749 = vtanh.f32 %v2657_v58  ;;  %v3438_v27 = vpop.f32.mrb[83].mxu1  ;;  %v3085_v9 = vmul.f32 -1.442695, %v2657_v58 }
0x27bf   :  { %3751 = vpow2.f32 %v3084_v30  ;;  %v3519_v27 = vld [vmem:[%s4724_s9] sm:$0xff]  }
0x27c8   :  { %v3750_v31 = vpop.eup %3749 }
0x27c9   :  { %2689 = vrot.lane.b32.xlu1 %v3750_v31, %s3786_s0  ;;  %v3752_v39 = vpop.eup %3751  ;;  %v3520_v31 = vld [vmem:[%s4724_s9 + $0x8] sm:$0xff]  }
0x27ca   :  { %v2665_v23 = vadd.f32 1.0, %v3752_v39  ;;  %v3521_v39 = vld [vmem:[%s4725_s10] sm:$0xff]  }
0x27cc   :  { %3753 = vrcp.f32 %v2665_v23  ;;  %v3522_v23 = vld [vmem:[%s4725_s10 + $0x8] sm:$0xff]  }
0x27cd   :  { %3755 = vpow2.f32 %v3085_v9 }
0x27d6   :  { %v3754_v41 = vpop.eup %3753 }
0x27d7   :  { %v3756_v63 = vpop.eup %3755  ;;  %v2676_v4 = vmul.f32 %v3754_v41, %v4608_v32 }
0x27d8   :  { %v2671_v22 = vadd.f32 1.0, %v3756_v63 }
0x27da   :  { %3757 = vrcp.f32 %v2671_v22 }
0x27e4   :  { %v3758_v54 = vpop.eup %3757 }
0x27e5   :  { %v2687_v57 = vmul.f32 %v3758_v54, %v4613_v20 }
0x2820   :  { %v2679_v47 = vpop.permute.xlu0 %2678 }
0x2821   :  { %v2681_v5 = vmul.f32 %v3754_v41, %v2679_v47 }
0x2823   :  { %2683 = vrot.lane.b32.xlu0 %v2681_v5, %s3786_s0 }
0x283b   :  { %v2690_v49 = vpop.permute.xlu1 %2689 }
0x283c   :  { %v2692_v51 = vmul.f32 %v3758_v54, %v2690_v49 }
0x283e   :  { %2694 = vrot.lane.b32.xlu1 %v2692_v51, %s3786_s0 }
0x2895   :  { %v2684_v53 = vpop.permute.xlu0 %2683 }
0x2896   :  { %v2686_v21 = vadd.f32 %v2684_v53, %v2676_v4 }
0x2898   :  { %3759 = vtanh.f32 %v2686_v21 }
0x28a2   :  { %v3760_v55 = vpop.eup %3759 }
0x28a3   :  { %2700 = vrot.lane.b32.xlu0 %v3760_v55, %s3786_s0 }
0x28b0   :  { %v2695_v50 = vpop.permute.xlu1 %2694 }
0x28b1   :  { %v2697_v46 = vadd.f32 %v2695_v50, %v2687_v57  ;;  %v3096_v50 = vld [vmem:[%s4726_s11] ss:$0 sm:$0xff] }
0x28b3   :  { %3761 = vtanh.f32 %v2697_v46 }
0x28bd   :  { %v3762_v59 = vpop.eup %3761 }
0x28be   :  { %2706 = vrot.lane.b32.xlu1 %v3762_v59, %s3786_s0 }
0x2915   :  { %v2701_v52 = vpop.permute.xlu0 %2700 }
0x2916   :  { %v2703_v60 = vmul.f32 %v3754_v41, %v2701_v52 }
0x2918   :  { %v4666_v38 = vmax.f32 %v2566_v36, %v2703_v60  ;;  %v2712_v19 = vpack.c.bf16 %v2703_v60, %v2703_v60 }
0x291a   :  { %2714 = vrot.lane.b32.xlu0 %v2712_v19, %s3787_s4 }
0x2930   :  { %v2707_v10 = vpop.permute.xlu1 %2706 }
0x2931   :  { %v2709_v33 = vmul.f32 %v3758_v54, %v2707_v10 }
0x2933   :  { %v4672_v37 = vmax.f32 %v2567_v14, %v2709_v33  ;;  %v2759_v32 = vpack.c.bf16 %v2709_v33, %v2709_v33 }
0x2935   :  { %2761 = vrot.lane.b32.xlu1 %v2759_v32, %s3787_s4 }
0x298c   :  { %v2715_v34 = vpop.permute.xlu0 %2714 }
0x298d   :  { %3444 = vmatmul.mubr.msk.bf16.vlgmr.msra.gmra.mrb[68].mxu0 %vm200_vm2, %v2715_v34 }
0x298e   :  { %3459 = vmatprep.mubr.msk.bf16.mxu0 %vm3785_vm0, %v3783_v0  ;;  %3456 = vmatpush3.bf16.msra.mxu0 %v3521_v39 }
0x298f   :  { %3457 = vmatprep.subr.bf16.mxu0 %v3783_v0 }
0x2992   :  { %3458 = vmatpush3.bf16.msra.mxu0 %v3522_v23 }
0x29a7   :  { %v2762_v7 = vpop.permute.xlu1 %2761 }
0x29a8   :  { %3452 = vmatmul.mubr.msk.bf16.vlgmr.msra.gmra.mrb[84].mxu1 %vm200_vm2, %v2762_v7 }
0x29a9   :  { %3467 = vmatprep.mubr.msk.bf16.mxu1 %vm3785_vm0, %v3783_v0  ;;  %3464 = vmatpush3.bf16.msra.mxu1 %v3519_v27 }
0x29aa   :  { %3465 = vmatprep.subr.bf16.mxu1 %v3783_v0 }
0x29ad   :  { %3466 = vmatpush3.bf16.msra.mxu1 %v3520_v31 }
0x2a60   :  { %v2753_v2 = vpop.f32.mrb[68].mxu0 }
0x2a61   :  { %v2754_v43 = vadd.f32 %v2753_v2, %v4398_v42  ;;  %v3445_v61 = vpop.f32.mrb[69].mxu0 }
0x2a62   :  { %v2756_v20 = vpop.f32.mrb[70].mxu0 }
0x2a63   :  { %3763 = vtanh.f32 %v2754_v43  ;;  %v3446_v35 = vpop.f32.mrb[71].mxu0  ;;  %v3088_v16 = vmul.f32 -1.442695, %v2754_v43 }
0x2a6d   :  { %v3764_v62 = vpop.eup %3763 }
0x2a6e   :  { %2822 = vrot.lane.b32.xlu0 %v3764_v62, %s3786_s0 }
0x2a7b   :  { %v2800_v24 = vpop.f32.mrb[84].mxu1 }
0x2a7c   :  { %v2801_v36 = vadd.f32 %v2800_v24, %v4371_v40  ;;  %v3453_v15 = vpop.f32.mrb[85].mxu1 }
0x2a7d   :  { %v2803_v11 = vpop.f32.mrb[86].mxu1 }
0x2a7e   :  { %3765 = vtanh.f32 %v2801_v36  ;;  %v3454_v48 = vpop.f32.mrb[87].mxu1  ;;  %v3089_v8 = vmul.f32 -1.442695, %v2801_v36 }
0x2a7f   :  { %3767 = vpow2.f32 %v3088_v16 }
0x2a88   :  { %v3766_v14 = vpop.eup %3765 }
0x2a89   :  { %2833 = vrot.lane.b32.xlu1 %v3766_v14, %s3786_s0  ;;  %v3768_v42 = vpop.eup %3767 }
0x2a8a   :  { %v2809_v13 = vadd.f32 1.0, %v3768_v42 }
0x2a8c   :  { %3769 = vrcp.f32 %v2809_v13 }
0x2a8d   :  { %3771 = vpow2.f32 %v3089_v8 }
0x2a96   :  { %v3770_v56 = vpop.eup %3769 }
0x2a97   :  { %v3772_v40 = vpop.eup %3771  ;;  %v2820_v29 = vmul.f32 %v3770_v56, %v2686_v21 }
0x2a98   :  { %v2815_v12 = vadd.f32 1.0, %v3772_v40 }
0x2a9a   :  { %3773 = vrcp.f32 %v2815_v12 }
0x2aa4   :  { %v3774_v1 = vpop.eup %3773 }
0x2aa5   :  { %v2831_v58 = vmul.f32 %v3774_v1, %v2697_v46 }
0x2ae0   :  { %v2823_v17 = vpop.permute.xlu0 %2822 }
0x2ae1   :  { %v2825_v25 = vmul.f32 %v3770_v56, %v2823_v17 }
0x2ae3   :  { %2827 = vrot.lane.b32.xlu0 %v2825_v25, %s3786_s0 }
0x2afb   :  { %v2834_v18 = vpop.permute.xlu1 %2833 }
0x2afc   :  { %v2836_v3 = vmul.f32 %v3774_v1, %v2834_v18 }
0x2afe   :  { %2838 = vrot.lane.b32.xlu1 %v2836_v3, %s3786_s0 }
0x2b55   :  { %v2828_v6 = vpop.permute.xlu0 %2827 }
0x2b56   :  { %v2830_v26 = vadd.f32 %v2828_v6, %v2820_v29 }
0x2b58   :  { %3775 = vtanh.f32 %v2830_v26 }
0x2b62   :  { %v3776_v28 = vpop.eup %3775 }
0x2b63   :  { %2844 = vrot.lane.b32.xlu0 %v3776_v28, %s3786_s0 }
0x2b70   :  { %v2839_v44 = vpop.permute.xlu1 %2838 }
0x2b71   :  { %v2841_v45 = vadd.f32 %v2839_v44, %v2831_v58 }
0x2b73   :  { %3777 = vtanh.f32 %v2841_v45 }
0x2b7d   :  { %v3778_v30 = vpop.eup %3777 }
0x2b7e   :  { %2850 = vrot.lane.b32.xlu1 %v3778_v30, %s3786_s0 }
0x2bd5   :  { %v2845_v9 = vpop.permute.xlu0 %2844 }
0x2bd6   :  { %v2847_v41 = vmul.f32 %v3770_v56, %v2845_v9 }
0x2bd8   :  { %v2854_v47 = vmax.f32 %v4666_v38, %v2847_v41 }
0x2bda   :  { %v2856_v5 = vpack.c.bf16 %v2854_v47, %v2854_v47 }
0x2bdc   :  { %2925 = vrot.lane.b32.xlu1 %v2856_v5, %s3787_s4 }
0x2bf0   :  { %v2851_v63 = vpop.permute.xlu1 %2850 }
0x2bf1   :  { %v2853_v22 = vmul.f32 %v3774_v1, %v2851_v63 }
0x2bf3   :  { %v2855_v54 = vmax.f32 %v4672_v37, %v2853_v22 }
0x2bf5   :  { %v2861_v49 = vpack.c.bf16 %v2855_v54, %v2855_v54 }
0x2bf7   :  { %2867 = vrot.lane.b32.xlu0 %v2861_v49, %s3787_s4 }
0x2c4e   :  { %v2926_v51 = vpop.permute.xlu1 %2925 }
0x2c4f   :  { %3468 = vmatmul.mubr.msk.bf16.vlgmr.msra.gmra.mrb[88].mxu1 %vm200_vm2, %v2926_v51 }
0x2c69   :  { %v2868_v4 = vpop.permute.xlu0 %2867 }
0x2c6a   :  { %3460 = vmatmul.mubr.msk.bf16.vlgmr.msra.gmra.mrb[72].mxu0 %vm200_vm2, %v2868_v4 }
0x2d22   :  { %v2976_v0 = vpop.f32.mrb[88].mxu1 }
0x2d23   :  { %v3469_v53 = vpop.f32.mrb[89].mxu1 }
0x2d24   :  { %v2979_v21 = vpop.f32.mrb[90].mxu1 }
0x2d25   :  { %v3470_v55 = vpop.f32.mrb[91].mxu1 }
0x2d3d   :  { %v2918_v57 = vpop.f32.mrb[72].mxu0 }
0x2d3e   :  { %v2977_v46 = vadd.f32 %v2976_v0, %v2918_v57  ;;  %v3461_v59 = vpop.f32.mrb[73].mxu0 }
0x2d3f   :  { %v2921_v52 = vpop.f32.mrb[74].mxu0 }
0x2d40   :  { %v2989_v60 = vadd.f32 %v3096_v50, %v2977_v46  ;;  %v3462_v38 = vpop.f32.mrb[75].mxu0 }
0x2d42   :  { %2991 = vst.msk [vmem:[%s4727_s12] sm:$0xff] %vm2990_vm3, %v2989_v60 }

</bundles_post_ra>
